<compile_context>
chip_gen: v5e
topology: v5e:2x2
jax: 0.10.0
libtpu: 0.0.40
codegen_flags: <defaults>
</compile_context>

<pallas_src>
import jax
import jax.numpy as jnp
from jax import lax
from jax.experimental import pallas as pl
from jax.experimental.pallas import tpu as pltpu

EPS = 1e-5


def _round_up(v, m):
    return (v + m - 1) // m * m


def _bn_fused(h2d, tb, tb_t, gamma, beta, count, relu6):
    """Training-mode BatchNorm2d on lane-dense data, one-pass statistics.

    h2d   : (rows, W*C)  activations, lanes packed as (w, c)
    tb    : (C, W*C)     tb[c, w*C + c'] = (c == c')   channel -> lane broadcast
    tb_t  : (W*C, C)     = tb.T                         lane -> channel reduce
    gamma : (1, C), beta : (1, C)

    Both per-channel reduce and re-broadcast are batched 2-row MXU matmuls
    (one push each) — no transposes, no per-row pushes.
    """
    s1 = jnp.sum(h2d, axis=0, keepdims=True)              # (1, W*C)
    s2 = jnp.sum(h2d * h2d, axis=0, keepdims=True)        # (1, W*C)
    s12 = jnp.concatenate([s1, s2], axis=0)               # (2, W*C)
    sc = jnp.dot(s12, tb_t, preferred_element_type=jnp.float32)  # (2, C)
    inv_n = 1.0 / count
    mean = sc[0:1, :] * inv_n                              # (1, C)
    var = sc[1:2, :] * inv_n - mean * mean                 # biased variance
    scale_c = lax.rsqrt(var + EPS) * gamma                 # EUP rsqrt
    shift_c = beta - mean * scale_c
    ss = jnp.concatenate([scale_c, shift_c], axis=0)       # (2, C)
    st = jnp.dot(ss, tb, preferred_element_type=jnp.float32)      # (2, W*C)
    y = h2d * st[0:1, :] + st[1:2, :]
    if relu6:
        y = jnp.clip(y, 0.0, 6.0)
    return y


def linear_bottleneck_kernel(x_ref, w1_ref, wdw_ref, w3_ref,
                             tbe_ref, tbet_ref, tbo_ref, tbot_ref,
                             g1_ref, b1_ref, g2_ref, b2_ref, g3_ref, b3_ref,
                             o_ref, pad_ref, acc_ref):
    N, H_pad, WL = pad_ref.shape
    NH = x_ref.shape[0]
    H = NH // N
    E, WE = tbe_ref.shape
    W = WE // E
    count = float(NH * W)                                  # N*H*W per channel

    # ---- 1x1 expand conv (lane-dense block-diag matmul) + BN1 + ReLU6 ------
    h1 = jnp.dot(x_ref[...], w1_ref[...], preferred_element_type=jnp.float32)
    h1 = _bn_fused(h1, tbe_ref[...], tbet_ref[...], g1_ref[...], b1_ref[...],
                   count, relu6=True)

    # ---- stage into padded scratch: aligned interior store, halo-only zero --
    # (aligned/unmasked when H % 8 == 0 and W*E % 128 == 0, true for the demo;
    #  correct but masked otherwise — see TODO at top.)
    pad_ref[:, :H, :WE] = h1.reshape(N, H, WE)
    pad_ref[:, H:, :] = jnp.zeros((N, H_pad - H, WL), jnp.float32)
    pad_ref[:, :H, WE:] = jnp.zeros((N, H, WL - WE), jnp.float32)

    # ---- 3x3 depthwise conv, stride 1: taps via XLU rolls, vreg accumulator -
    # dy -> sublane roll by (1-dy); dx -> lane roll by (1-dx)*E.  Wrap-around
    # reads the zeroed pad region => correct zero borders.  Garbage only ever
    # lands in rows >= H / lanes >= W*E, which are sliced off before the store.
    for n in range(N):
        acc = None
        for dy in range(3):
            if dy != 1:
                row_slab = pltpu.roll(pad_ref[n], (1 - dy) % H_pad, axis=0)
            else:
                row_slab = pad_ref[n]
            for dx in range(3):
                if dx != 1:
                    tap = pltpu.roll(row_slab, ((1 - dx) * E) % WL, axis=1)
                else:
                    tap = row_slab
                w = wdw_ref[dy * 3 + dx, :].reshape(1, WL)
                term = tap * w
                acc = term if acc is None else acc + term
        # one aligned store per image (n*H multiple of 8, WE multiple of 128)
        acc_ref[pl.ds(n * H, H), :] = acc[:H, :WE]

    h2 = _bn_fused(acc_ref[...], tbe_ref[...], tbet_ref[...],
                   g2_ref[...], b2_ref[...], count, relu6=True)

    # ---- 1x1 project conv (lane-dense block-diag matmul) + BN3 (linear) ----
    h3 = jnp.dot(h2, w3_ref[...], preferred_element_type=jnp.float32)
    h3 = _bn_fused(h3, tbo_ref[...], tbot_ref[...], g3_ref[...], b3_ref[...],
                   count, relu6=False)
    o_ref[...] = h3                                        # (N*H, W*Cout)


def linear_bottleneck_pallas(x_nchw, w1_oi, wd_chw, w3_oi,
                             g1, b1, g2, b2, g3, b3, stride):
    """x_nchw: (N,Cin,H,W) f32; weights in PyTorch layouts. Returns NCHW."""
    if stride != 1:
        # TODO(synk): implement stride>1 by subsampling at the output-index
        # level (every other row / w-group); BN count must then use H',W'.
        raise NotImplementedError("LinearBottleneck Pallas kernel: stride>1")

    N, Cin, H, W = x_nchw.shape
    E = w1_oi.shape[0]
    Cout = w3_oi.shape[0]
    WE = W * E
    WCo = W * Cout
    H_pad = _round_up(H + 2, 8)            # sublane-aligned padded height
    WL = _round_up(WE + E, 128)            # lane-aligned padded (w,c) width

    # Lane-dense input layout for the HBM->VMEM DMA: (N*H, W*Cin).
    x_dense = jnp.transpose(x_nchw, (0, 2, 3, 1)).reshape(N * H, W * Cin)

    eye_w = jnp.eye(W, dtype=jnp.float32)
    w1_blk = jnp.kron(eye_w, jnp.transpose(w1_oi))        # (W*Cin, W*E)
    w3_blk = jnp.kron(eye_w, jnp.transpose(w3_oi))        # (W*E,  W*Cout)
    wd_taps = jnp.transpose(wd_chw, (1, 2, 0)).reshape(9, E)   # [dy*3+dx, c]
    wd_dense = jnp.concatenate(
        [jnp.tile(wd_taps, (1, W)), jnp.zeros((9, WL - WE), jnp.float32)],
        axis=1)                                           # (9, WL)
    tb_e = jnp.tile(jnp.eye(E, dtype=jnp.float32), (1, W))      # (E, W*E)
    tb_o = jnp.tile(jnp.eye(Cout, dtype=jnp.float32), (1, W))   # (Cout, W*Cout)
    tb_e_t = jnp.transpose(tb_e)                                # (W*E, E)
    tb_o_t = jnp.transpose(tb_o)                                # (W*Cout, Cout)

    args = (x_dense, w1_blk, wd_dense, w3_blk,
            tb_e, tb_e_t, tb_o, tb_o_t,
            g1.reshape(1, E), b1.reshape(1, E),
            g2.reshape(1, E), b2.reshape(1, E),
            g3.reshape(1, Cout), b3.reshape(1, Cout))

    def full(a):
        nd = a.ndim
        return pl.BlockSpec(a.shape, lambda i, _nd=nd: (0,) * _nd)

    out2d = pl.pallas_call(
        linear_bottleneck_kernel,
        out_shape=jax.ShapeDtypeStruct((N * H, WCo), jnp.float32),
        grid=(1,),
        in_specs=[full(a) for a in args],
        out_specs=pl.BlockSpec((N * H, WCo), lambda i: (0, 0)),
        scratch_shapes=[pltpu.VMEM((N, H_pad, WL), jnp.float32),  # padded h1
                        pltpu.VMEM((N * H, WE), jnp.float32)],    # dw result
        compiler_params=pltpu.CompilerParams(
            dimension_semantics=("arbitrary",)),
    )(*args)

    # Layout plumbing back to NCHW happens outside the kernel.
    return jnp.transpose(out2d.reshape(N, H, W, Cout), (0, 3, 1, 2))


# ---------------- pure-JAX reference (NCHW, matches PyTorch semantics) -------
def _bn_ref(x_nchw, gamma, beta, relu6):
    mean = jnp.mean(x_nchw, axis=(0, 2, 3), keepdims=True)
    var = jnp.mean((x_nchw - mean) ** 2, axis=(0, 2, 3), keepdims=True)
    y = (x_nchw - mean) * lax.rsqrt(var + EPS) * gamma[None, :, None, None] \
        + beta[None, :, None, None]
    if relu6:
        y = jnp.clip(y, 0.0, 6.0)
    return y


def linear_bottleneck_ref(x_nchw, w1_oi, wd_chw, w3_oi, g1, b1, g2, b2, g3, b3,
                          stride):
    dn = ("NCHW", "OIHW", "NCHW")
    E = w1_oi.shape[0]
    h = lax.conv_general_dilated(x_nchw, w1_oi[:, :, None, None], (1, 1),
                                 "VALID", dimension_numbers=dn)
    h = _bn_ref(h, g1, b1, relu6=True)
    h = lax.conv_general_dilated(h, wd_chw[:, None, :, :], (stride, stride),
                                 ((1, 1), (1, 1)), dimension_numbers=dn,
                                 feature_group_count=E)
    h = _bn_ref(h, g2, b2, relu6=True)
    h = lax.conv_general_dilated(h, w3_oi[:, :, None, None], (1, 1),
                                 "VALID", dimension_numbers=dn)
    h = _bn_ref(h, g3, b3, relu6=False)
    return h


if __name__ == "__main__":
    # LinearBottleneck(cin=4, k=6, cout=8, stride=1) -> ex_ch = 24
    N, Cin, H, W = 2, 4, 16, 16
    k_expand, Cout, stride = 6, 8, 1
    E = round(Cin * k_expand)

    key = jax.random.PRNGKey(0)
    ks = jax.random.split(key, 10)
    x_nchw = jax.random.normal(ks[0], (N, Cin, H, W), jnp.float32)

    # Parameter shapes follow the PyTorch module.
    w1_oi = 0.3 * jax.random.normal(ks[1], (E, Cin), jnp.float32)    # 1x1 expand
    wd_chw = 0.3 * jax.random.normal(ks[2], (E, 3, 3), jnp.float32)  # depthwise
    w3_oi = 0.3 * jax.random.normal(ks[3], (Cout, E), jnp.float32)   # 1x1 project
    g1 = 1.0 + 0.1 * jax.random.normal(ks[4], (E,), jnp.float32)
    b1 = 0.1 * jax.random.normal(ks[5], (E,), jnp.float32)
    g2 = 1.0 + 0.1 * jax.random.normal(ks[6], (E,), jnp.float32)
    b2 = 0.1 * jax.random.normal(ks[7], (E,), jnp.float32)
    g3 = 1.0 + 0.1 * jax.random.normal(ks[8], (Cout,), jnp.float32)
    b3 = 0.1 * jax.random.normal(ks[9], (Cout,), jnp.float32)

    out = jax.block_until_ready(
        linear_bottleneck_pallas(x_nchw, w1_oi, wd_chw, w3_oi,
                                 g1, b1, g2, b2, g3, b3, stride))
    ref = jax.block_until_ready(
        linear_bottleneck_ref(x_nchw, w1_oi, wd_chw, w3_oi,
                              g1, b1, g2, b2, g3, b3, stride))

    assert out.shape == ref.shape, (out.shape, ref.shape)
    max_err = float(jnp.max(jnp.abs(out - ref)))
    assert jnp.allclose(out, ref, rtol=5e-3, atol=5e-3), max_err
    print("KERNEL_OK")
</pallas_src>

<mosaic_0001>
module attributes {stable_mosaic.version = 11 : i64} {
  func.func @linear_bottleneck_kernel(%arg0: i32, %arg1: memref<32x64xf32, #tpu.memory_space<vmem>>, %arg2: memref<64x384xf32, #tpu.memory_space<vmem>>, %arg3: memref<9x512xf32, #tpu.memory_space<vmem>>, %arg4: memref<384x128xf32, #tpu.memory_space<vmem>>, %arg5: memref<24x384xf32, #tpu.memory_space<vmem>>, %arg6: memref<384x24xf32, #tpu.memory_space<vmem>>, %arg7: memref<8x128xf32, #tpu.memory_space<vmem>>, %arg8: memref<128x8xf32, #tpu.memory_space<vmem>>, %arg9: memref<1x24xf32, #tpu.memory_space<vmem>>, %arg10: memref<1x24xf32, #tpu.memory_space<vmem>>, %arg11: memref<1x24xf32, #tpu.memory_space<vmem>>, %arg12: memref<1x24xf32, #tpu.memory_space<vmem>>, %arg13: memref<1x8xf32, #tpu.memory_space<vmem>>, %arg14: memref<1x8xf32, #tpu.memory_space<vmem>>, %arg15: memref<32x128xf32, #tpu.memory_space<vmem>>, %arg16: memref<2x24x512xf32, #tpu.memory_space<vmem>>, %arg17: memref<32x384xf32, #tpu.memory_space<vmem>>) attributes {dimension_semantics = [#tpu.dimension_semantics<arbitrary>], iteration_bounds = array<i64: 1>, scalar_prefetch = 0 : i64, scratch_operands = 2 : i64, tpu.core_type = #tpu.core_type<tc>, window_params = [{pipeline_mode = #tpu.pipeline_mode<synchronous>, transform_indices = @transform_0, window_bounds = array<i64: 32, 64>}, {pipeline_mode = #tpu.pipeline_mode<synchronous>, transform_indices = @transform_1, window_bounds = array<i64: 64, 384>}, {pipeline_mode = #tpu.pipeline_mode<synchronous>, transform_indices = @transform_2, window_bounds = array<i64: 9, 512>}, {pipeline_mode = #tpu.pipeline_mode<synchronous>, transform_indices = @transform_3, window_bounds = array<i64: 384, 128>}, {pipeline_mode = #tpu.pipeline_mode<synchronous>, transform_indices = @transform_4, window_bounds = array<i64: 24, 384>}, {pipeline_mode = #tpu.pipeline_mode<synchronous>, transform_indices = @transform_5, window_bounds = array<i64: 384, 24>}, {pipeline_mode = #tpu.pipeline_mode<synchronous>, transform_indices = @transform_6, window_bounds = array<i64: 8, 128>}, {pipeline_mode = #tpu.pipeline_mode<synchronous>, transform_indices = @transform_7, window_bounds = array<i64: 128, 8>}, {pipeline_mode = #tpu.pipeline_mode<synchronous>, transform_indices = @transform_8, window_bounds = array<i64: 1, 24>}, {pipeline_mode = #tpu.pipeline_mode<synchronous>, transform_indices = @transform_9, window_bounds = array<i64: 1, 24>}, {pipeline_mode = #tpu.pipeline_mode<synchronous>, transform_indices = @transform_10, window_bounds = array<i64: 1, 24>}, {pipeline_mode = #tpu.pipeline_mode<synchronous>, transform_indices = @transform_11, window_bounds = array<i64: 1, 24>}, {pipeline_mode = #tpu.pipeline_mode<synchronous>, transform_indices = @transform_12, window_bounds = array<i64: 1, 8>}, {pipeline_mode = #tpu.pipeline_mode<synchronous>, transform_indices = @transform_13, window_bounds = array<i64: 1, 8>}, {pipeline_mode = #tpu.pipeline_mode<synchronous>, transform_indices = @transform_14, window_bounds = array<i64: 32, 128>}]} {
    %c0 = arith.constant 0 : index
    %c0_0 = arith.constant 0 : index
    %0 = vector.load %arg1[%c0, %c0_0] : memref<32x64xf32, #tpu.memory_space<vmem>>, vector<32x64xf32>
    %c0_1 = arith.constant 0 : index
    %c0_2 = arith.constant 0 : index
    %1 = vector.load %arg2[%c0_1, %c0_2] : memref<64x384xf32, #tpu.memory_space<vmem>>, vector<64x384xf32>
    %cst = arith.constant dense<0.000000e+00> : vector<32x384xf32>
    %2 = tpu.matmul %0, %1, %cst {dimension_numbers = #tpu.dot_dimension_numbers<[1], [0], [0], [1], [0, 0, 1, 1], [], []>} : vector<32x64xf32>, vector<64x384xf32>, vector<32x384xf32> -> vector<32x384xf32>
    %c0_3 = arith.constant 0 : index
    %c0_4 = arith.constant 0 : index
    %3 = vector.load %arg5[%c0_3, %c0_4] : memref<24x384xf32, #tpu.memory_space<vmem>>, vector<24x384xf32>
    %c0_5 = arith.constant 0 : index
    %c0_6 = arith.constant 0 : index
    %4 = vector.load %arg6[%c0_5, %c0_6] : memref<384x24xf32, #tpu.memory_space<vmem>>, vector<384x24xf32>
    %c0_7 = arith.constant 0 : index
    %c0_8 = arith.constant 0 : index
    %5 = vector.load %arg9[%c0_7, %c0_8] : memref<1x24xf32, #tpu.memory_space<vmem>>, vector<1x24xf32>
    %c0_9 = arith.constant 0 : index
    %c0_10 = arith.constant 0 : index
    %6 = vector.load %arg10[%c0_9, %c0_10] : memref<1x24xf32, #tpu.memory_space<vmem>>, vector<1x24xf32>
    %cst_11 = arith.constant dense<0.000000e+00> : vector<384xf32>
    %7 = vector.multi_reduction <add>, %2, %cst_11 [0] : vector<32x384xf32> to vector<384xf32>
    %8 = vector.shape_cast %7 : vector<384xf32> to vector<1x384xf32>
    %9 = arith.mulf %2, %2 : vector<32x384xf32>
    %cst_12 = arith.constant dense<0.000000e+00> : vector<384xf32>
    %10 = vector.multi_reduction <add>, %9, %cst_12 [0] : vector<32x384xf32> to vector<384xf32>
    %11 = vector.shape_cast %10 : vector<384xf32> to vector<1x384xf32>
    %12 = tpu.concatenate %8, %11 in 0 : vector<1x384xf32>, vector<1x384xf32> -> vector<2x384xf32>
    %cst_13 = arith.constant dense<0.000000e+00> : vector<2x24xf32>
    %13 = tpu.matmul %12, %4, %cst_13 {dimension_numbers = #tpu.dot_dimension_numbers<[1], [0], [0], [1], [0, 0, 1, 1], [], []>} : vector<2x384xf32>, vector<384x24xf32>, vector<2x24xf32> -> vector<2x24xf32>
    %14 = vector.extract_strided_slice %13 {offsets = [0, 0], sizes = [1, 24], strides = [1, 1]} : vector<2x24xf32> to vector<1x24xf32>
    %cst_14 = arith.constant 0.001953125 : f32
    %15 = vector.broadcast %cst_14 : f32 to vector<1x24xf32>
    %16 = arith.mulf %14, %15 : vector<1x24xf32>
    %17 = vector.extract_strided_slice %13 {offsets = [1, 0], sizes = [1, 24], strides = [1, 1]} : vector<2x24xf32> to vector<1x24xf32>
    %cst_15 = arith.constant 0.001953125 : f32
    %18 = vector.broadcast %cst_15 : f32 to vector<1x24xf32>
    %19 = arith.mulf %17, %18 : vector<1x24xf32>
    %20 = arith.mulf %16, %16 : vector<1x24xf32>
    %21 = arith.subf %19, %20 : vector<1x24xf32>
    %cst_16 = arith.constant 9.99999974E-6 : f32
    %22 = vector.broadcast %cst_16 : f32 to vector<1x24xf32>
    %23 = arith.addf %21, %22 : vector<1x24xf32>
    %24 = math.rsqrt %23 : vector<1x24xf32>
    %25 = arith.mulf %24, %5 : vector<1x24xf32>
    %26 = arith.mulf %16, %25 : vector<1x24xf32>
    %27 = arith.subf %6, %26 : vector<1x24xf32>
    %28 = tpu.concatenate %25, %27 in 0 : vector<1x24xf32>, vector<1x24xf32> -> vector<2x24xf32>
    %cst_17 = arith.constant dense<0.000000e+00> : vector<2x384xf32>
    %29 = tpu.matmul %28, %3, %cst_17 {dimension_numbers = #tpu.dot_dimension_numbers<[1], [0], [0], [1], [0, 0, 1, 1], [], []>} : vector<2x24xf32>, vector<24x384xf32>, vector<2x384xf32> -> vector<2x384xf32>
    %30 = vector.extract_strided_slice %29 {offsets = [0, 0], sizes = [1, 384], strides = [1, 1]} : vector<2x384xf32> to vector<1x384xf32>
    %31 = vector.broadcast %30 : vector<1x384xf32> to vector<32x384xf32>
    %32 = arith.mulf %2, %31 : vector<32x384xf32>
    %33 = vector.extract_strided_slice %29 {offsets = [1, 0], sizes = [1, 384], strides = [1, 1]} : vector<2x384xf32> to vector<1x384xf32>
    %34 = vector.broadcast %33 : vector<1x384xf32> to vector<32x384xf32>
    %35 = arith.addf %32, %34 : vector<32x384xf32>
    %cst_18 = arith.constant 0.000000e+00 : f32
    %cst_19 = arith.constant 6.000000e+00 : f32
    %36 = vector.broadcast %cst_18 : f32 to vector<32x384xf32>
    %37 = arith.maximumf %36, %35 : vector<32x384xf32>
    %38 = vector.broadcast %cst_19 : f32 to vector<32x384xf32>
    %39 = arith.minimumf %38, %37 : vector<32x384xf32>
    %40 = vector.shape_cast %39 : vector<32x384xf32> to vector<2x16x384xf32>
    %c0_20 = arith.constant 0 : index
    %c0_21 = arith.constant 0 : index
    %c0_22 = arith.constant 0 : index
    %41 = vector.load %arg16[%c0_20, %c0_21, %c0_22] : memref<2x24x512xf32, #tpu.memory_space<vmem>>, vector<2x16x384xf32>
    tpu.vector_store %arg16[%c0_20, %c0_21, %c0_22], %40 {strides = array<i32>} : memref<2x24x512xf32, #tpu.memory_space<vmem>>, vector<2x16x384xf32>,
    %cst_23 = arith.constant 0.000000e+00 : f32
    %42 = vector.broadcast %cst_23 : f32 to vector<2x8x512xf32>
    %c0_24 = arith.constant 0 : index
    %c16 = arith.constant 16 : index
    %c0_25 = arith.constant 0 : index
    %43 = vector.load %arg16[%c0_24, %c16, %c0_25] : memref<2x24x512xf32, #tpu.memory_space<vmem>>, vector<2x8x512xf32>
    tpu.vector_store %arg16[%c0_24, %c16, %c0_25], %42 {strides = array<i32>} : memref<2x24x512xf32, #tpu.memory_space<vmem>>, vector<2x8x512xf32>,
    %cst_26 = arith.constant 0.000000e+00 : f32
    %44 = vector.broadcast %cst_26 : f32 to vector<2x16x128xf32>
    %c0_27 = arith.constant 0 : index
    %c0_28 = arith.constant 0 : index
    %c384 = arith.constant 384 : index
    %45 = vector.load %arg16[%c0_27, %c0_28, %c384] : memref<2x24x512xf32, #tpu.memory_space<vmem>>, vector<2x16x128xf32>
    tpu.vector_store %arg16[%c0_27, %c0_28, %c384], %44 {strides = array<i32>} : memref<2x24x512xf32, #tpu.memory_space<vmem>>, vector<2x16x128xf32>,
    %c0_29 = arith.constant 0 : index
    %c0_30 = arith.constant 0 : index
    %c0_31 = arith.constant 0 : index
    %46 = vector.load %arg16[%c0_29, %c0_30, %c0_31] : memref<2x24x512xf32, #tpu.memory_space<vmem>>, vector<1x24x512xf32>
    %47 = vector.shape_cast %46 : vector<1x24x512xf32> to vector<24x512xf32>
    %c1_i32 = arith.constant 1 : i32
    %48 = tpu.dynamic_rotate %47 by %c1_i32 dim 0 : vector<24x512xf32>, i32 -> vector<24x512xf32>
    %c24_i32 = arith.constant 24 : i32
    %49 = tpu.dynamic_rotate %48 by %c24_i32 dim 1 : vector<24x512xf32>, i32 -> vector<24x512xf32>
    %c0_32 = arith.constant 0 : index
    %c0_33 = arith.constant 0 : index
    %50 = vector.load %arg3[%c0_32, %c0_33] : memref<9x512xf32, #tpu.memory_space<vmem>>, vector<1x512xf32>
    %51 = vector.shape_cast %50 : vector<1x512xf32> to vector<512xf32>
    %52 = vector.shape_cast %51 : vector<512xf32> to vector<1x512xf32>
    %53 = vector.broadcast %52 : vector<1x512xf32> to vector<24x512xf32>
    %54 = arith.mulf %49, %53 : vector<24x512xf32>
    %c1 = arith.constant 1 : index
    %c0_34 = arith.constant 0 : index
    %55 = vector.load %arg3[%c1, %c0_34] : memref<9x512xf32, #tpu.memory_space<vmem>>, vector<1x512xf32>
    %56 = vector.shape_cast %55 : vector<1x512xf32> to vector<512xf32>
    %57 = vector.shape_cast %56 : vector<512xf32> to vector<1x512xf32>
    %58 = vector.broadcast %57 : vector<1x512xf32> to vector<24x512xf32>
    %59 = arith.mulf %48, %58 : vector<24x512xf32>
    %60 = arith.addf %54, %59 : vector<24x512xf32>
    %c488_i32 = arith.constant 488 : i32
    %61 = tpu.dynamic_rotate %48 by %c488_i32 dim 1 : vector<24x512xf32>, i32 -> vector<24x512xf32>
    %c2 = arith.constant 2 : index
    %c0_35 = arith.constant 0 : index
    %62 = vector.load %arg3[%c2, %c0_35] : memref<9x512xf32, #tpu.memory_space<vmem>>, vector<1x512xf32>
    %63 = vector.shape_cast %62 : vector<1x512xf32> to vector<512xf32>
    %64 = vector.shape_cast %63 : vector<512xf32> to vector<1x512xf32>
    %65 = vector.broadcast %64 : vector<1x512xf32> to vector<24x512xf32>
    %66 = arith.mulf %61, %65 : vector<24x512xf32>
    %67 = arith.addf %60, %66 : vector<24x512xf32>
    %c0_36 = arith.constant 0 : index
    %c0_37 = arith.constant 0 : index
    %c0_38 = arith.constant 0 : index
    %68 = vector.load %arg16[%c0_36, %c0_37, %c0_38] : memref<2x24x512xf32, #tpu.memory_space<vmem>>, vector<1x24x512xf32>
    %69 = vector.shape_cast %68 : vector<1x24x512xf32> to vector<24x512xf32>
    %c24_i32_39 = arith.constant 24 : i32
    %70 = tpu.dynamic_rotate %69 by %c24_i32_39 dim 1 : vector<24x512xf32>, i32 -> vector<24x512xf32>
    %c3 = arith.constant 3 : index
    %c0_40 = arith.constant 0 : index
    %71 = vector.load %arg3[%c3, %c0_40] : memref<9x512xf32, #tpu.memory_space<vmem>>, vector<1x512xf32>
    %72 = vector.shape_cast %71 : vector<1x512xf32> to vector<512xf32>
    %73 = vector.shape_cast %72 : vector<512xf32> to vector<1x512xf32>
    %74 = vector.broadcast %73 : vector<1x512xf32> to vector<24x512xf32>
    %75 = arith.mulf %70, %74 : vector<24x512xf32>
    %76 = arith.addf %67, %75 : vector<24x512xf32>
    %c4 = arith.constant 4 : index
    %c0_41 = arith.constant 0 : index
    %77 = vector.load %arg3[%c4, %c0_41] : memref<9x512xf32, #tpu.memory_space<vmem>>, vector<1x512xf32>
    %78 = vector.shape_cast %77 : vector<1x512xf32> to vector<512xf32>
    %79 = vector.shape_cast %78 : vector<512xf32> to vector<1x512xf32>
    %80 = vector.broadcast %79 : vector<1x512xf32> to vector<24x512xf32>
    %81 = arith.mulf %69, %80 : vector<24x512xf32>
    %82 = arith.addf %76, %81 : vector<24x512xf32>
    %c488_i32_42 = arith.constant 488 : i32
    %83 = tpu.dynamic_rotate %69 by %c488_i32_42 dim 1 : vector<24x512xf32>, i32 -> vector<24x512xf32>
    %c5 = arith.constant 5 : index
    %c0_43 = arith.constant 0 : index
    %84 = vector.load %arg3[%c5, %c0_43] : memref<9x512xf32, #tpu.memory_space<vmem>>, vector<1x512xf32>
    %85 = vector.shape_cast %84 : vector<1x512xf32> to vector<512xf32>
    %86 = vector.shape_cast %85 : vector<512xf32> to vector<1x512xf32>
    %87 = vector.broadcast %86 : vector<1x512xf32> to vector<24x512xf32>
    %88 = arith.mulf %83, %87 : vector<24x512xf32>
    %89 = arith.addf %82, %88 : vector<24x512xf32>
    %c0_44 = arith.constant 0 : index
    %c0_45 = arith.constant 0 : index
    %c0_46 = arith.constant 0 : index
    %90 = vector.load %arg16[%c0_44, %c0_45, %c0_46] : memref<2x24x512xf32, #tpu.memory_space<vmem>>, vector<1x24x512xf32>
    %91 = vector.shape_cast %90 : vector<1x24x512xf32> to vector<24x512xf32>
    %c23_i32 = arith.constant 23 : i32
    %92 = tpu.dynamic_rotate %91 by %c23_i32 dim 0 : vector<24x512xf32>, i32 -> vector<24x512xf32>
    %c24_i32_47 = arith.constant 24 : i32
    %93 = tpu.dynamic_rotate %92 by %c24_i32_47 dim 1 : vector<24x512xf32>, i32 -> vector<24x512xf32>
    %c6 = arith.constant 6 : index
    %c0_48 = arith.constant 0 : index
    %94 = vector.load %arg3[%c6, %c0_48] : memref<9x512xf32, #tpu.memory_space<vmem>>, vector<1x512xf32>
    %95 = vector.shape_cast %94 : vector<1x512xf32> to vector<512xf32>
    %96 = vector.shape_cast %95 : vector<512xf32> to vector<1x512xf32>
    %97 = vector.broadcast %96 : vector<1x512xf32> to vector<24x512xf32>
    %98 = arith.mulf %93, %97 : vector<24x512xf32>
    %99 = arith.addf %89, %98 : vector<24x512xf32>
    %c7 = arith.constant 7 : index
    %c0_49 = arith.constant 0 : index
    %100 = vector.load %arg3[%c7, %c0_49] : memref<9x512xf32, #tpu.memory_space<vmem>>, vector<1x512xf32>
    %101 = vector.shape_cast %100 : vector<1x512xf32> to vector<512xf32>
    %102 = vector.shape_cast %101 : vector<512xf32> to vector<1x512xf32>
    %103 = vector.broadcast %102 : vector<1x512xf32> to vector<24x512xf32>
    %104 = arith.mulf %92, %103 : vector<24x512xf32>
    %105 = arith.addf %99, %104 : vector<24x512xf32>
    %c488_i32_50 = arith.constant 488 : i32
    %106 = tpu.dynamic_rotate %92 by %c488_i32_50 dim 1 : vector<24x512xf32>, i32 -> vector<24x512xf32>
    %c8 = arith.constant 8 : index
    %c0_51 = arith.constant 0 : index
    %107 = vector.load %arg3[%c8, %c0_51] : memref<9x512xf32, #tpu.memory_space<vmem>>, vector<1x512xf32>
    %108 = vector.shape_cast %107 : vector<1x512xf32> to vector<512xf32>
    %109 = vector.shape_cast %108 : vector<512xf32> to vector<1x512xf32>
    %110 = vector.broadcast %109 : vector<1x512xf32> to vector<24x512xf32>
    %111 = arith.mulf %106, %110 : vector<24x512xf32>
    %112 = arith.addf %105, %111 : vector<24x512xf32>
    %113 = vector.extract_strided_slice %112 {offsets = [0, 0], sizes = [16, 384], strides = [1, 1]} : vector<24x512xf32> to vector<16x384xf32>
    %c0_52 = arith.constant 0 : index
    %c0_53 = arith.constant 0 : index
    %114 = vector.load %arg17[%c0_52, %c0_53] : memref<32x384xf32, #tpu.memory_space<vmem>>, vector<16x384xf32>
    tpu.vector_store %arg17[%c0_52, %c0_53], %113 {strides = array<i32>} : memref<32x384xf32, #tpu.memory_space<vmem>>, vector<16x384xf32>,
    %c1_54 = arith.constant 1 : index
    %c0_55 = arith.constant 0 : index
    %c0_56 = arith.constant 0 : index
    %115 = vector.load %arg16[%c1_54, %c0_55, %c0_56] : memref<2x24x512xf32, #tpu.memory_space<vmem>>, vector<1x24x512xf32>
    %116 = vector.shape_cast %115 : vector<1x24x512xf32> to vector<24x512xf32>
    %c1_i32_57 = arith.constant 1 : i32
    %117 = tpu.dynamic_rotate %116 by %c1_i32_57 dim 0 : vector<24x512xf32>, i32 -> vector<24x512xf32>
    %c24_i32_58 = arith.constant 24 : i32
    %118 = tpu.dynamic_rotate %117 by %c24_i32_58 dim 1 : vector<24x512xf32>, i32 -> vector<24x512xf32>
    %c0_59 = arith.constant 0 : index
    %c0_60 = arith.constant 0 : index
    %119 = vector.load %arg3[%c0_59, %c0_60] : memref<9x512xf32, #tpu.memory_space<vmem>>, vector<1x512xf32>
    %120 = vector.shape_cast %119 : vector<1x512xf32> to vector<512xf32>
    %121 = vector.shape_cast %120 : vector<512xf32> to vector<1x512xf32>
    %122 = vector.broadcast %121 : vector<1x512xf32> to vector<24x512xf32>
    %123 = arith.mulf %118, %122 : vector<24x512xf32>
    %c1_61 = arith.constant 1 : index
    %c0_62 = arith.constant 0 : index
    %124 = vector.load %arg3[%c1_61, %c0_62] : memref<9x512xf32, #tpu.memory_space<vmem>>, vector<1x512xf32>
    %125 = vector.shape_cast %124 : vector<1x512xf32> to vector<512xf32>
    %126 = vector.shape_cast %125 : vector<512xf32> to vector<1x512xf32>
    %127 = vector.broadcast %126 : vector<1x512xf32> to vector<24x512xf32>
    %128 = arith.mulf %117, %127 : vector<24x512xf32>
    %129 = arith.addf %123, %128 : vector<24x512xf32>
    %c488_i32_63 = arith.constant 488 : i32
    %130 = tpu.dynamic_rotate %117 by %c488_i32_63 dim 1 : vector<24x512xf32>, i32 -> vector<24x512xf32>
    %c2_64 = arith.constant 2 : index
    %c0_65 = arith.constant 0 : index
    %131 = vector.load %arg3[%c2_64, %c0_65] : memref<9x512xf32, #tpu.memory_space<vmem>>, vector<1x512xf32>
    %132 = vector.shape_cast %131 : vector<1x512xf32> to vector<512xf32>
    %133 = vector.shape_cast %132 : vector<512xf32> to vector<1x512xf32>
    %134 = vector.broadcast %133 : vector<1x512xf32> to vector<24x512xf32>
    %135 = arith.mulf %130, %134 : vector<24x512xf32>
    %136 = arith.addf %129, %135 : vector<24x512xf32>
    %c1_66 = arith.constant 1 : index
    %c0_67 = arith.constant 0 : index
    %c0_68 = arith.constant 0 : index
    %137 = vector.load %arg16[%c1_66, %c0_67, %c0_68] : memref<2x24x512xf32, #tpu.memory_space<vmem>>, vector<1x24x512xf32>
    %138 = vector.shape_cast %137 : vector<1x24x512xf32> to vector<24x512xf32>
    %c24_i32_69 = arith.constant 24 : i32
    %139 = tpu.dynamic_rotate %138 by %c24_i32_69 dim 1 : vector<24x512xf32>, i32 -> vector<24x512xf32>
    %c3_70 = arith.constant 3 : index
    %c0_71 = arith.constant 0 : index
    %140 = vector.load %arg3[%c3_70, %c0_71] : memref<9x512xf32, #tpu.memory_space<vmem>>, vector<1x512xf32>
    %141 = vector.shape_cast %140 : vector<1x512xf32> to vector<512xf32>
    %142 = vector.shape_cast %141 : vector<512xf32> to vector<1x512xf32>
    %143 = vector.broadcast %142 : vector<1x512xf32> to vector<24x512xf32>
    %144 = arith.mulf %139, %143 : vector<24x512xf32>
    %145 = arith.addf %136, %144 : vector<24x512xf32>
    %c4_72 = arith.constant 4 : index
    %c0_73 = arith.constant 0 : index
    %146 = vector.load %arg3[%c4_72, %c0_73] : memref<9x512xf32, #tpu.memory_space<vmem>>, vector<1x512xf32>
    %147 = vector.shape_cast %146 : vector<1x512xf32> to vector<512xf32>
    %148 = vector.shape_cast %147 : vector<512xf32> to vector<1x512xf32>
    %149 = vector.broadcast %148 : vector<1x512xf32> to vector<24x512xf32>
    %150 = arith.mulf %138, %149 : vector<24x512xf32>
    %151 = arith.addf %145, %150 : vector<24x512xf32>
    %c488_i32_74 = arith.constant 488 : i32
    %152 = tpu.dynamic_rotate %138 by %c488_i32_74 dim 1 : vector<24x512xf32>, i32 -> vector<24x512xf32>
    %c5_75 = arith.constant 5 : index
    %c0_76 = arith.constant 0 : index
    %153 = vector.load %arg3[%c5_75, %c0_76] : memref<9x512xf32, #tpu.memory_space<vmem>>, vector<1x512xf32>
    %154 = vector.shape_cast %153 : vector<1x512xf32> to vector<512xf32>
    %155 = vector.shape_cast %154 : vector<512xf32> to vector<1x512xf32>
    %156 = vector.broadcast %155 : vector<1x512xf32> to vector<24x512xf32>
    %157 = arith.mulf %152, %156 : vector<24x512xf32>
    %158 = arith.addf %151, %157 : vector<24x512xf32>
    %c1_77 = arith.constant 1 : index
    %c0_78 = arith.constant 0 : index
    %c0_79 = arith.constant 0 : index
    %159 = vector.load %arg16[%c1_77, %c0_78, %c0_79] : memref<2x24x512xf32, #tpu.memory_space<vmem>>, vector<1x24x512xf32>
    %160 = vector.shape_cast %159 : vector<1x24x512xf32> to vector<24x512xf32>
    %c23_i32_80 = arith.constant 23 : i32
    %161 = tpu.dynamic_rotate %160 by %c23_i32_80 dim 0 : vector<24x512xf32>, i32 -> vector<24x512xf32>
    %c24_i32_81 = arith.constant 24 : i32
    %162 = tpu.dynamic_rotate %161 by %c24_i32_81 dim 1 : vector<24x512xf32>, i32 -> vector<24x512xf32>
    %c6_82 = arith.constant 6 : index
    %c0_83 = arith.constant 0 : index
    %163 = vector.load %arg3[%c6_82, %c0_83] : memref<9x512xf32, #tpu.memory_space<vmem>>, vector<1x512xf32>
    %164 = vector.shape_cast %163 : vector<1x512xf32> to vector<512xf32>
    %165 = vector.shape_cast %164 : vector<512xf32> to vector<1x512xf32>
    %166 = vector.broadcast %165 : vector<1x512xf32> to vector<24x512xf32>
    %167 = arith.mulf %162, %166 : vector<24x512xf32>
    %168 = arith.addf %158, %167 : vector<24x512xf32>
    %c7_84 = arith.constant 7 : index
    %c0_85 = arith.constant 0 : index
    %169 = vector.load %arg3[%c7_84, %c0_85] : memref<9x512xf32, #tpu.memory_space<vmem>>, vector<1x512xf32>
    %170 = vector.shape_cast %169 : vector<1x512xf32> to vector<512xf32>
    %171 = vector.shape_cast %170 : vector<512xf32> to vector<1x512xf32>
    %172 = vector.broadcast %171 : vector<1x512xf32> to vector<24x512xf32>
    %173 = arith.mulf %161, %172 : vector<24x512xf32>
    %174 = arith.addf %168, %173 : vector<24x512xf32>
    %c488_i32_86 = arith.constant 488 : i32
    %175 = tpu.dynamic_rotate %161 by %c488_i32_86 dim 1 : vector<24x512xf32>, i32 -> vector<24x512xf32>
    %c8_87 = arith.constant 8 : index
    %c0_88 = arith.constant 0 : index
    %176 = vector.load %arg3[%c8_87, %c0_88] : memref<9x512xf32, #tpu.memory_space<vmem>>, vector<1x512xf32>
    %177 = vector.shape_cast %176 : vector<1x512xf32> to vector<512xf32>
    %178 = vector.shape_cast %177 : vector<512xf32> to vector<1x512xf32>
    %179 = vector.broadcast %178 : vector<1x512xf32> to vector<24x512xf32>
    %180 = arith.mulf %175, %179 : vector<24x512xf32>
    %181 = arith.addf %174, %180 : vector<24x512xf32>
    %182 = vector.extract_strided_slice %181 {offsets = [0, 0], sizes = [16, 384], strides = [1, 1]} : vector<24x512xf32> to vector<16x384xf32>
    %c16_89 = arith.constant 16 : index
    %c0_90 = arith.constant 0 : index
    %183 = vector.load %arg17[%c16_89, %c0_90] : memref<32x384xf32, #tpu.memory_space<vmem>>, vector<16x384xf32>
    tpu.vector_store %arg17[%c16_89, %c0_90], %182 {strides = array<i32>} : memref<32x384xf32, #tpu.memory_space<vmem>>, vector<16x384xf32>,
    %c0_91 = arith.constant 0 : index
    %c0_92 = arith.constant 0 : index
    %184 = vector.load %arg17[%c0_91, %c0_92] : memref<32x384xf32, #tpu.memory_space<vmem>>, vector<32x384xf32>
    %c0_93 = arith.constant 0 : index
    %c0_94 = arith.constant 0 : index
    %185 = vector.load %arg5[%c0_93, %c0_94] : memref<24x384xf32, #tpu.memory_space<vmem>>, vector<24x384xf32>
    %c0_95 = arith.constant 0 : index
    %c0_96 = arith.constant 0 : index
    %186 = vector.load %arg6[%c0_95, %c0_96] : memref<384x24xf32, #tpu.memory_space<vmem>>, vector<384x24xf32>
    %c0_97 = arith.constant 0 : index
    %c0_98 = arith.constant 0 : index
    %187 = vector.load %arg11[%c0_97, %c0_98] : memref<1x24xf32, #tpu.memory_space<vmem>>, vector<1x24xf32>
    %c0_99 = arith.constant 0 : index
    %c0_100 = arith.constant 0 : index
    %188 = vector.load %arg12[%c0_99, %c0_100] : memref<1x24xf32, #tpu.memory_space<vmem>>, vector<1x24xf32>
    %cst_101 = arith.constant dense<0.000000e+00> : vector<384xf32>
    %189 = vector.multi_reduction <add>, %184, %cst_101 [0] : vector<32x384xf32> to vector<384xf32>
    %190 = vector.shape_cast %189 : vector<384xf32> to vector<1x384xf32>
    %191 = arith.mulf %184, %184 : vector<32x384xf32>
    %cst_102 = arith.constant dense<0.000000e+00> : vector<384xf32>
    %192 = vector.multi_reduction <add>, %191, %cst_102 [0] : vector<32x384xf32> to vector<384xf32>
    %193 = vector.shape_cast %192 : vector<384xf32> to vector<1x384xf32>
    %194 = tpu.concatenate %190, %193 in 0 : vector<1x384xf32>, vector<1x384xf32> -> vector<2x384xf32>
    %cst_103 = arith.constant dense<0.000000e+00> : vector<2x24xf32>
    %195 = tpu.matmul %194, %186, %cst_103 {dimension_numbers = #tpu.dot_dimension_numbers<[1], [0], [0], [1], [0, 0, 1, 1], [], []>} : vector<2x384xf32>, vector<384x24xf32>, vector<2x24xf32> -> vector<2x24xf32>
    %196 = vector.extract_strided_slice %195 {offsets = [0, 0], sizes = [1, 24], strides = [1, 1]} : vector<2x24xf32> to vector<1x24xf32>
    %cst_104 = arith.constant 0.001953125 : f32
    %197 = vector.broadcast %cst_104 : f32 to vector<1x24xf32>
    %198 = arith.mulf %196, %197 : vector<1x24xf32>
    %199 = vector.extract_strided_slice %195 {offsets = [1, 0], sizes = [1, 24], strides = [1, 1]} : vector<2x24xf32> to vector<1x24xf32>
    %cst_105 = arith.constant 0.001953125 : f32
    %200 = vector.broadcast %cst_105 : f32 to vector<1x24xf32>
    %201 = arith.mulf %199, %200 : vector<1x24xf32>
    %202 = arith.mulf %198, %198 : vector<1x24xf32>
    %203 = arith.subf %201, %202 : vector<1x24xf32>
    %cst_106 = arith.constant 9.99999974E-6 : f32
    %204 = vector.broadcast %cst_106 : f32 to vector<1x24xf32>
    %205 = arith.addf %203, %204 : vector<1x24xf32>
    %206 = math.rsqrt %205 : vector<1x24xf32>
    %207 = arith.mulf %206, %187 : vector<1x24xf32>
    %208 = arith.mulf %198, %207 : vector<1x24xf32>
    %209 = arith.subf %188, %208 : vector<1x24xf32>
    %210 = tpu.concatenate %207, %209 in 0 : vector<1x24xf32>, vector<1x24xf32> -> vector<2x24xf32>
    %cst_107 = arith.constant dense<0.000000e+00> : vector<2x384xf32>
    %211 = tpu.matmul %210, %185, %cst_107 {dimension_numbers = #tpu.dot_dimension_numbers<[1], [0], [0], [1], [0, 0, 1, 1], [], []>} : vector<2x24xf32>, vector<24x384xf32>, vector<2x384xf32> -> vector<2x384xf32>
    %212 = vector.extract_strided_slice %211 {offsets = [0, 0], sizes = [1, 384], strides = [1, 1]} : vector<2x384xf32> to vector<1x384xf32>
    %213 = vector.broadcast %212 : vector<1x384xf32> to vector<32x384xf32>
    %214 = arith.mulf %184, %213 : vector<32x384xf32>
    %215 = vector.extract_strided_slice %211 {offsets = [1, 0], sizes = [1, 384], strides = [1, 1]} : vector<2x384xf32> to vector<1x384xf32>
    %216 = vector.broadcast %215 : vector<1x384xf32> to vector<32x384xf32>
    %217 = arith.addf %214, %216 : vector<32x384xf32>
    %cst_108 = arith.constant 0.000000e+00 : f32
    %cst_109 = arith.constant 6.000000e+00 : f32
    %218 = vector.broadcast %cst_108 : f32 to vector<32x384xf32>
    %219 = arith.maximumf %218, %217 : vector<32x384xf32>
    %220 = vector.broadcast %cst_109 : f32 to vector<32x384xf32>
    %221 = arith.minimumf %220, %219 : vector<32x384xf32>
    %c0_110 = arith.constant 0 : index
    %c0_111 = arith.constant 0 : index
    %222 = vector.load %arg4[%c0_110, %c0_111] : memref<384x128xf32, #tpu.memory_space<vmem>>, vector<384x128xf32>
    %cst_112 = arith.constant dense<0.000000e+00> : vector<32x128xf32>
    %223 = tpu.matmul %221, %222, %cst_112 {dimension_numbers = #tpu.dot_dimension_numbers<[1], [0], [0], [1], [0, 0, 1, 1], [], []>} : vector<32x384xf32>, vector<384x128xf32>, vector<32x128xf32> -> vector<32x128xf32>
    %c0_113 = arith.constant 0 : index
    %c0_114 = arith.constant 0 : index
    %224 = vector.load %arg7[%c0_113, %c0_114] : memref<8x128xf32, #tpu.memory_space<vmem>>, vector<8x128xf32>
    %c0_115 = arith.constant 0 : index
    %c0_116 = arith.constant 0 : index
    %225 = vector.load %arg8[%c0_115, %c0_116] : memref<128x8xf32, #tpu.memory_space<vmem>>, vector<128x8xf32>
    %c0_117 = arith.constant 0 : index
    %c0_118 = arith.constant 0 : index
    %226 = vector.load %arg13[%c0_117, %c0_118] : memref<1x8xf32, #tpu.memory_space<vmem>>, vector<1x8xf32>
    %c0_119 = arith.constant 0 : index
    %c0_120 = arith.constant 0 : index
    %227 = vector.load %arg14[%c0_119, %c0_120] : memref<1x8xf32, #tpu.memory_space<vmem>>, vector<1x8xf32>
    %cst_121 = arith.constant dense<0.000000e+00> : vector<128xf32>
    %228 = vector.multi_reduction <add>, %223, %cst_121 [0] : vector<32x128xf32> to vector<128xf32>
    %229 = vector.shape_cast %228 : vector<128xf32> to vector<1x128xf32>
    %230 = arith.mulf %223, %223 : vector<32x128xf32>
    %cst_122 = arith.constant dense<0.000000e+00> : vector<128xf32>
    %231 = vector.multi_reduction <add>, %230, %cst_122 [0] : vector<32x128xf32> to vector<128xf32>
    %232 = vector.shape_cast %231 : vector<128xf32> to vector<1x128xf32>
    %233 = tpu.concatenate %229, %232 in 0 : vector<1x128xf32>, vector<1x128xf32> -> vector<2x128xf32>
    %cst_123 = arith.constant dense<0.000000e+00> : vector<2x8xf32>
    %234 = tpu.matmul %233, %225, %cst_123 {dimension_numbers = #tpu.dot_dimension_numbers<[1], [0], [0], [1], [0, 0, 1, 1], [], []>} : vector<2x128xf32>, vector<128x8xf32>, vector<2x8xf32> -> vector<2x8xf32>
    %235 = vector.extract_strided_slice %234 {offsets = [0, 0], sizes = [1, 8], strides = [1, 1]} : vector<2x8xf32> to vector<1x8xf32>
    %cst_124 = arith.constant 0.001953125 : f32
    %236 = vector.broadcast %cst_124 : f32 to vector<1x8xf32>
    %237 = arith.mulf %235, %236 : vector<1x8xf32>
    %238 = vector.extract_strided_slice %234 {offsets = [1, 0], sizes = [1, 8], strides = [1, 1]} : vector<2x8xf32> to vector<1x8xf32>
    %cst_125 = arith.constant 0.001953125 : f32
    %239 = vector.broadcast %cst_125 : f32 to vector<1x8xf32>
    %240 = arith.mulf %238, %239 : vector<1x8xf32>
    %241 = arith.mulf %237, %237 : vector<1x8xf32>
    %242 = arith.subf %240, %241 : vector<1x8xf32>
    %cst_126 = arith.constant 9.99999974E-6 : f32
    %243 = vector.broadcast %cst_126 : f32 to vector<1x8xf32>
    %244 = arith.addf %242, %243 : vector<1x8xf32>
    %245 = math.rsqrt %244 : vector<1x8xf32>
    %246 = arith.mulf %245, %226 : vector<1x8xf32>
    %247 = arith.mulf %237, %246 : vector<1x8xf32>
    %248 = arith.subf %227, %247 : vector<1x8xf32>
    %249 = tpu.concatenate %246, %248 in 0 : vector<1x8xf32>, vector<1x8xf32> -> vector<2x8xf32>
    %cst_127 = arith.constant dense<0.000000e+00> : vector<2x128xf32>
    %250 = tpu.matmul %249, %224, %cst_127 {dimension_numbers = #tpu.dot_dimension_numbers<[1], [0], [0], [1], [0, 0, 1, 1], [], []>} : vector<2x8xf32>, vector<8x128xf32>, vector<2x128xf32> -> vector<2x128xf32>
    %251 = vector.extract_strided_slice %250 {offsets = [0, 0], sizes = [1, 128], strides = [1, 1]} : vector<2x128xf32> to vector<1x128xf32>
    %252 = vector.broadcast %251 : vector<1x128xf32> to vector<32x128xf32>
    %253 = arith.mulf %223, %252 : vector<32x128xf32>
    %254 = vector.extract_strided_slice %250 {offsets = [1, 0], sizes = [1, 128], strides = [1, 1]} : vector<2x128xf32> to vector<1x128xf32>
    %255 = vector.broadcast %254 : vector<1x128xf32> to vector<32x128xf32>
    %256 = arith.addf %253, %255 : vector<32x128xf32>
    %c0_128 = arith.constant 0 : index
    %c0_129 = arith.constant 0 : index
    %257 = vector.load %arg15[%c0_128, %c0_129] : memref<32x128xf32, #tpu.memory_space<vmem>>, vector<32x128xf32>
    tpu.vector_store %arg15[%c0_128, %c0_129], %256 {strides = array<i32>} : memref<32x128xf32, #tpu.memory_space<vmem>>, vector<32x128xf32>,
    return
  }
  func.func @transform_0(%arg0: i32) -> (i32, i32) {
    %c0_i32 = arith.constant 0 : i32
    %c0_i32_0 = arith.constant 0 : i32
    %c0_i32_1 = arith.constant 0 : i32
    return %c0_i32, %c0_i32_0 : i32, i32
  }
  func.func @transform_1(%arg0: i32) -> (i32, i32) {
    %c0_i32 = arith.constant 0 : i32
    %c0_i32_0 = arith.constant 0 : i32
    %c0_i32_1 = arith.constant 0 : i32
    return %c0_i32, %c0_i32_0 : i32, i32
  }
  func.func @transform_2(%arg0: i32) -> (i32, i32) {
    %c0_i32 = arith.constant 0 : i32
    %c0_i32_0 = arith.constant 0 : i32
    %c0_i32_1 = arith.constant 0 : i32
    return %c0_i32, %c0_i32_0 : i32, i32
  }
  func.func @transform_3(%arg0: i32) -> (i32, i32) {
    %c0_i32 = arith.constant 0 : i32
    %c0_i32_0 = arith.constant 0 : i32
    %c0_i32_1 = arith.constant 0 : i32
    return %c0_i32, %c0_i32_0 : i32, i32
  }
  func.func @transform_4(%arg0: i32) -> (i32, i32) {
    %c0_i32 = arith.constant 0 : i32
    %c0_i32_0 = arith.constant 0 : i32
    %c0_i32_1 = arith.constant 0 : i32
    return %c0_i32, %c0_i32_0 : i32, i32
  }
  func.func @transform_5(%arg0: i32) -> (i32, i32) {
    %c0_i32 = arith.constant 0 : i32
    %c0_i32_0 = arith.constant 0 : i32
    %c0_i32_1 = arith.constant 0 : i32
    return %c0_i32, %c0_i32_0 : i32, i32
  }
  func.func @transform_6(%arg0: i32) -> (i32, i32) {
    %c0_i32 = arith.constant 0 : i32
    %c0_i32_0 = arith.constant 0 : i32
    %c0_i32_1 = arith.constant 0 : i32
    return %c0_i32, %c0_i32_0 : i32, i32
  }
  func.func @transform_7(%arg0: i32) -> (i32, i32) {
    %c0_i32 = arith.constant 0 : i32
    %c0_i32_0 = arith.constant 0 : i32
    %c0_i32_1 = arith.constant 0 : i32
    return %c0_i32, %c0_i32_0 : i32, i32
  }
  func.func @transform_8(%arg0: i32) -> (i32, i32) {
    %c0_i32 = arith.constant 0 : i32
    %c0_i32_0 = arith.constant 0 : i32
    %c0_i32_1 = arith.constant 0 : i32
    return %c0_i32, %c0_i32_0 : i32, i32
  }
  func.func @transform_9(%arg0: i32) -> (i32, i32) {
    %c0_i32 = arith.constant 0 : i32
    %c0_i32_0 = arith.constant 0 : i32
    %c0_i32_1 = arith.constant 0 : i32
    return %c0_i32, %c0_i32_0 : i32, i32
  }
  func.func @transform_10(%arg0: i32) -> (i32, i32) {
    %c0_i32 = arith.constant 0 : i32
    %c0_i32_0 = arith.constant 0 : i32
    %c0_i32_1 = arith.constant 0 : i32
    return %c0_i32, %c0_i32_0 : i32, i32
  }
  func.func @transform_11(%arg0: i32) -> (i32, i32) {
    %c0_i32 = arith.constant 0 : i32
    %c0_i32_0 = arith.constant 0 : i32
    %c0_i32_1 = arith.constant 0 : i32
    return %c0_i32, %c0_i32_0 : i32, i32
  }
  func.func @transform_12(%arg0: i32) -> (i32, i32) {
    %c0_i32 = arith.constant 0 : i32
    %c0_i32_0 = arith.constant 0 : i32
    %c0_i32_1 = arith.constant 0 : i32
    return %c0_i32, %c0_i32_0 : i32, i32
  }
  func.func @transform_13(%arg0: i32) -> (i32, i32) {
    %c0_i32 = arith.constant 0 : i32
    %c0_i32_0 = arith.constant 0 : i32
    %c0_i32_1 = arith.constant 0 : i32
    return %c0_i32, %c0_i32_0 : i32, i32
  }
  func.func @transform_14(%arg0: i32) -> (i32, i32) {
    %c0_i32 = arith.constant 0 : i32
    %c0_i32_0 = arith.constant 0 : i32
    %c0_i32_1 = arith.constant 0 : i32
    return %c0_i32, %c0_i32_0 : i32, i32
  }
}

</mosaic_0001>

<bundles_post_ra>
// kernel: tpu_custom_call.1
= control target key start
LH: loop header
LB: loop body
LE: loop exit
PB: predicated region body
PF: predicated region fallthrough
CT: control target
= control target key end

     0   :  { %19 = vsyncpa [#allocation5], 0  ;;  %s4038_s0 = inlined_call_operand.hbm [shape: f32[32,64], index: 0, kind: input, shape index: {}]   ;;  %s4039_s1 = inlined_call_operand.hbm [shape: f32[64,384], index: 1, kind: input, shape index: {}]   ;;  %s4040_s2 = inlined_call_operand.vmem [shape: f32[9,512], index: 2, kind: input, shape index: {}]   ;;  %s4041_s3 = inlined_call_operand.vmem [shape: f32[384,128], index: 3, kind: input, shape index: {}]   ;;  %s4042_s4 = inlined_call_operand.vmem [shape: f32[24,384], index: 4, kind: input, shape index: {}]   ;;  %s4043_s5 = inlined_call_operand.vmem [shape: f32[384,24], index: 5, kind: input, shape index: {}]   ;;  %s4044_s6 = inlined_call_operand.hbm [shape: f32[8,128], index: 6, kind: input, shape index: {}]   ;;  %s4045_s7 = inlined_call_operand.vmem [shape: f32[128,8], index: 7, kind: input, shape index: {}]   ;;  %s4046_s8 = inlined_call_operand.vmem [shape: f32[1,24], index: 8, kind: input, shape index: {}]   ;;  %s4047_s9 = inlined_call_operand.vmem [shape: f32[1,24], index: 9, kind: input, shape index: {}]   ;;  %s4048_s10 = inlined_call_operand.vmem [shape: f32[1,24], index: 10, kind: input, shape index: {}]   ;;  %s4049_s11 = inlined_call_operand.vmem [shape: f32[1,24], index: 11, kind: input, shape index: {}]   ;;  %s4050_s12 = inlined_call_operand.vmem [shape: f32[1,8], index: 12, kind: input, shape index: {}]   ;;  %s4051_s13 = inlined_call_operand.vmem [shape: f32[1,8], index: 13, kind: input, shape index: {}]   ;;  %s4052_s14 = inlined_call_operand.hbm [shape: f32[32,128], index: 14, kind: output, shape index: {}]  }
   0x1   :  { %20 = vsyncpa [#allocation8], 0  ;;  %s39_s15 = sshll.u32 %s4039_s1, 4  ;;  %s40_s15 = int_to_ptr.hbm [resolvable:$true] %s39_s15 }
   0x2   :  { %21 = vsyncpa [#allocation6], 0  ;;  %s2191_s16 = smov [#allocation7]   ;;  %s26_s20 = sshll.u32 %s4038_s0, 4  ;;  %s27_s20 = int_to_ptr.hbm [resolvable:$true] %s26_s20 }
   0x3   :  { %s41_s17 = sshll.u32 %s2191_s16, 4  ;;  %s2192_s21 = smov 384   ;;  %s42_s17 = int_to_ptr.vmem [resolvable:$true] %s41_s17 }
   0x4   :  { %s2193_s22 = smov 24   ;;  %s2194_s23 = smov [#allocation4]  }
   0x5   :  { %47 = dma.hbm_to_vmem [thread:$0]  %s40_s15, 3072, %s42_s17, [#allocation8], %s2192_s21, %s2192_s21, %s2193_s22  }
   0x6   :  { %s28_s24 = sshll.u32 %s2194_s23, 4  ;;  %s2195_s25 = smov 128   ;;  %s29_s24 = int_to_ptr.vmem [resolvable:$true] %s28_s24 }
   0x7   :  { %s2196_s26 = smov 8   ;;  %s61_s28 = sshll.u32 %s4044_s6, 4  ;;  %s62_s28 = int_to_ptr.hbm [resolvable:$true] %s61_s28 }
   0x8   :  { %34 = dma.hbm_to_vmem [thread:$0]  %s27_s20, 512, %s29_s24, [#allocation5], %s2195_s25, %s2195_s25, %s2196_s26  }
   0x9   :  { %s2197_s0 = smov [#allocation9]  }
   0xa   :  { %s63_s29 = sshll.u32 %s2197_s0, 4  ;;  %s64_s29 = int_to_ptr.vmem [resolvable:$true] %s63_s29 }
   0xb   :  { %66 = dma.hbm_to_vmem [thread:$0]  %s62_s28, 128, %s64_s29, [#allocation8]  }
   0xc   :  { %2185 = dma.done.wait [#allocation5], 512  }
   0xd   :  { %2186 = vsyncadd [#allocation5], 4294966784 }
   0xe   :  { %2187 = dma.done.wait [#allocation8], 3200  }
   0xf   :  { %2188 = vsyncadd [#allocation8], 4294964096  ;;  %v118_v0 = vld [vmem:[#allocation7 + $0xa8] sm:$0xff]  ;;  %v119_v1 = vld [vmem:[#allocation7 + $0xb0] sm:$0xff]  ;;  %vm121_vm0 = vcmask 523264   ;;  %vm346_vm1 = vcmask 1040384  }
  0x10   :  { %v120_v2 = vld [vmem:[#allocation7 + $0xb8] sm:$0xff]  ;;  %142 = vmatpush.msra.mxu0 %v118_v0  ;;  %171 = vmatpush.msra.mxu1 %v119_v1  ;;  %v115_v3 = vld [vmem:[#allocation7 + $0x90] sm:$0xff]  ;;  %v117_v5 = vld [vmem:[#allocation7 + $0xa0] sm:$0xff]  ;;  %s2199_s15 = smov 104   ;;  %vm440_vm5 = vcmask 195584   ;;  %s1945_s21 = sshll.u32 %s4052_s14, 4  ;;  %s1946_s21 = int_to_ptr.hbm [resolvable:$true] %s1945_s21 }
  0x11   :  { %v116_v4 = vld [vmem:[#allocation7 + $0x98] sm:$0xff]  ;;  %200 = vmatpush.msra.mxu2 %v120_v2  ;;  %v113_v7 = vld [vmem:[#allocation7 + $0x80] sm:$0xff]  ;;  %v114_v8 = vld [vmem:[#allocation7 + $0x88] sm:$0xff] }
  0x12   :  { %v112_v6 = vld [vmem:[#allocation7 + $0x78] sm:$0xff]  ;;  %143 = vmatpush.msra.mxu0 %v115_v3  ;;  %172 = vmatpush.msra.mxu1 %v116_v4  ;;  %v109_v9 = vld [vmem:[#allocation7 + $0x60] sm:$0xff]  ;;  %v110_v10 = vld [vmem:[#allocation7 + $0x68] sm:$0xff] }
  0x13   :  { %201 = vmatpush.msra.mxu2 %v117_v5  ;;  %v111_v11 = vld [vmem:[#allocation7 + $0x70] sm:$0xff]  ;;  %v106_v12 = vld [vmem:[#allocation7 + $0x48] sm:$0xff]  ;;  %v108_v14 = vld [vmem:[#allocation7 + $0x58] sm:$0xff] }
  0x14   :  { %144 = vmatpush.msra.mxu0 %v112_v6  ;;  %173 = vmatpush.msra.mxu1 %v113_v7  ;;  %v107_v13 = vld [vmem:[#allocation7 + $0x50] sm:$0xff]  ;;  %v104_v16 = vld [vmem:[#allocation7 + $0x38] sm:$0xff]  ;;  %v105_v17 = vld [vmem:[#allocation7 + $0x40] sm:$0xff] }
  0x15   :  { %202 = vmatpush.msra.mxu2 %v114_v8  ;;  %v103_v15 = vld [vmem:[#allocation7 + $0x30] sm:$0xff]  ;;  %v100_v18 = vld [vmem:[#allocation7 + $0x18] sm:$0xff]  ;;  %v101_v19 = vld [vmem:[#allocation7 + $0x20] sm:$0xff] }
  0x16   :  { %145 = vmatpush.msra.mxu0 %v109_v9  ;;  %174 = vmatpush.msra.mxu1 %v110_v10  ;;  %v102_v20 = vld [vmem:[#allocation7 + $0x28] sm:$0xff]  ;;  %v97_v21 = vld [vmem:[#allocation7] sm:$0xff]  ;;  %v99_v23 = vld [vmem:[#allocation7 + $0x10] sm:$0xff] }
  0x17   :  { %203 = vmatpush.msra.mxu2 %v111_v11  ;;  %v98_v22 = vld [vmem:[#allocation7 + $0x8] sm:$0xff]  ;;  %v93_v24 = vld [vmem:[#allocation4] sm:$0xff]  ;;  %v95_v26 = vld [vmem:[#allocation4 + $0x10] sm:$0xff] }
  0x18   :  { %146 = vmatpush.msra.mxu0 %v106_v12  ;;  %175 = vmatpush.msra.mxu1 %v107_v13  ;;  %v94_v25 = vld [vmem:[#allocation4 + $0x8] sm:$0xff]  ;;  %v96_v27 = vld [vmem:[#allocation4 + $0x18] sm:$0xff]  ;;  %v260_v30 = vld [vmem:[%s4043_s5 + $0xf0] sm:$0xff] }
  0x19   :  { %204 = vmatpush.msra.mxu2 %v108_v14  ;;  %v261_v28 = vld [vmem:[%s4043_s5 + $0xf8] sm:$0xff]  ;;  %v244_v31 = vld [vmem:[%s4043_s5 + $0x70] sm:$0xff]  ;;  %v259_v32 = vld [vmem:[%s4043_s5 + $0xe8] sm:$0xff] }
  0x1a   :  { %147 = vmatpush.msra.mxu0 %v103_v15  ;;  %176 = vmatpush.msra.mxu1 %v104_v16  ;;  %v245_v29 = vld [vmem:[%s4043_s5 + $0x78] sm:$0xff]  ;;  %v243_v33 = vld [vmem:[%s4043_s5 + $0x68] sm:$0xff]  ;;  %v258_v34 = vld [vmem:[%s4043_s5 + $0xe0] sm:$0xff] }
  0x1b   :  { %205 = vmatpush.msra.mxu2 %v105_v17  ;;  %350 = vmatpush.msra.mxu3 %v245_v29  ;;  %v242_v35 = vld [vmem:[%s4043_s5 + $0x60] sm:$0xff]  ;;  %v277_v36 = vld [vmem:[%s4043_s5 + $0x178] sm:$0xff]  ;;  %v276_v39 = vld [vmem:[%s4043_s5 + $0x170] sm:$0xff] }
  0x1c   :  { %148 = vmatpush.msra.mxu0 %v100_v18  ;;  %177 = vmatpush.msra.mxu1 %v101_v19  ;;  %v257_v37 = vld [vmem:[%s4043_s5 + $0xd8] sm:$0xff]  ;;  %v256_v40 = vld [vmem:[%s4043_s5 + $0xd0] sm:$0xff]  ;;  %v275_v42 = vld [vmem:[%s4043_s5 + $0x168] sm:$0xff] }
  0x1d   :  { %206 = vmatpush.msra.mxu2 %v102_v20  ;;  %351 = vmatpush.msra.mxu3 %v244_v31  ;;  %v241_v38 = vld [vmem:[%s4043_s5 + $0x58] sm:$0xff]  ;;  %v240_v41 = vld [vmem:[%s4043_s5 + $0x50] sm:$0xff]  ;;  %v255_v43 = vld [vmem:[%s4043_s5 + $0xc8] sm:$0xff] }
  0x1e   :  { %149 = vmatpush.msra.mxu0 %v97_v21  ;;  %178 = vmatpush.msra.mxu1 %v98_v22  ;;  %v239_v44 = vld [vmem:[%s4043_s5 + $0x48] sm:$0xff]  ;;  %v274_v45 = vld [vmem:[%s4043_s5 + $0x160] sm:$0xff]  ;;  %v273_v48 = vld [vmem:[%s4043_s5 + $0x158] sm:$0xff] }
  0x1f   :  { %207 = vmatpush.msra.mxu2 %v99_v23  ;;  %1959 = vmatmul.msk.f32.vlgmr.msra.gmra.mxu0 %vm121_vm0, %v93_v24  ;;  %v254_v46 = vld [vmem:[%s4043_s5 + $0xc0] sm:$0xff]  ;;  %v253_v49 = vld [vmem:[%s4043_s5 + $0xb8] sm:$0xff]  ;;  %v272_v51 = vld [vmem:[%s4043_s5 + $0x150] sm:$0xff] }
  0x20   :  { %1963 = vmatmul.msk.f32.vlgmr.msra.gmra.mxu1 %vm121_vm0, %v93_v24  ;;  %1967 = vmatmul.msk.f32.vlgmr.msra.gmra.mxu2 %vm121_vm0, %v93_v24  ;;  %v238_v47 = vld [vmem:[%s4043_s5 + $0x40] sm:$0xff]  ;;  %v237_v50 = vld [vmem:[%s4043_s5 + $0x38] sm:$0xff]  ;;  %v252_v52 = vld [vmem:[%s4043_s5 + $0xb0] sm:$0xff] }
  0x21   :  { %370 = vmatpush.msrb.mxu2 %v261_v28  ;;  %352 = vmatpush.msra.mxu3 %v243_v33  ;;  %v236_v53 = vld [vmem:[%s4043_s5 + $0x30] sm:$0xff]  ;;  %v271_v54 = vld [vmem:[%s4043_s5 + $0x148] sm:$0xff]  ;;  %v270_v57 = vld [vmem:[%s4043_s5 + $0x140] sm:$0xff] }
  0x22   :  { %390 = vmatpush.msrb.mxu1 %v277_v36  ;;  %v251_v55 = vld [vmem:[%s4043_s5 + $0xa8] sm:$0xff]  ;;  %v250_v60 = vld [vmem:[%s4043_s5 + $0xa0] sm:$0xff]  ;;  %v269_v62 = vld [vmem:[%s4043_s5 + $0x138] sm:$0xff] }
  0x23   :  { %371 = vmatpush.msrb.mxu2 %v260_v30  ;;  %353 = vmatpush.msra.mxu3 %v242_v35  ;;  %v235_v56 = vld [vmem:[%s4043_s5 + $0x28] sm:$0xff]  ;;  %v234_v61 = vld [vmem:[%s4043_s5 + $0x20] sm:$0xff]  ;;  %v249_v63 = vld [vmem:[%s4043_s5 + $0x98] sm:$0xff] }
  0x24   :  { %391 = vmatpush.msrb.mxu1 %v276_v39  ;;  %v233_v0 = vld [vmem:[%s4043_s5 + $0x18] sm:$0xff]  ;;  %v268_v1 = vld [vmem:[%s4043_s5 + $0x130] sm:$0xff]  ;;  %v267_v4 = vld [vmem:[%s4043_s5 + $0x128] sm:$0xff] }
  0x25   :  { %372 = vmatpush.msrb.mxu2 %v259_v32  ;;  %354 = vmatpush.msra.mxu3 %v241_v38  ;;  %v248_v2 = vld [vmem:[%s4043_s5 + $0x90] sm:$0xff]  ;;  %v247_v6 = vld [vmem:[%s4043_s5 + $0x88] sm:$0xff]  ;;  %v266_v8 = vld [vmem:[%s4043_s5 + $0x120] sm:$0xff] }
  0x26   :  { %392 = vmatpush.msrb.mxu1 %v275_v42  ;;  %v232_v3 = vld [vmem:[%s4043_s5 + $0x10] sm:$0xff]  ;;  %v231_v7 = vld [vmem:[%s4043_s5 + $0x8] sm:$0xff]  ;;  %v246_v10 = vld [vmem:[%s4043_s5 + $0x80] sm:$0xff] }
  0x27   :  { %1960 = vmatmul.msk.f32.gmra.mxu0 %vm121_vm0, %v94_v25  ;;  %373 = vmatpush.msrb.mxu2 %v258_v34  ;;  %v230_v11 = vld [vmem:[%s4043_s5] sm:$0xff]  ;;  %v265_v12 = vld [vmem:[%s4043_s5 + $0x118] sm:$0xff]  ;;  %v264_v14 = vld [vmem:[%s4043_s5 + $0x110] sm:$0xff] }
  0x28   :  { %1964 = vmatmul.msk.f32.gmra.mxu1 %vm121_vm0, %v94_v25  ;;  %1968 = vmatmul.msk.f32.gmra.mxu2 %vm121_vm0, %v94_v25  ;;  %v263_v15 = vld [vmem:[%s4043_s5 + $0x108] sm:$0xff]  ;;  %v262_v16 = vld [vmem:[%s4043_s5 + $0x100] sm:$0xff] }
  0x29   :  { %374 = vmatpush.msrb.mxu2 %v257_v37  ;;  %355 = vmatpush.msra.mxu3 %v240_v41 }
  0x2a   :  { %393 = vmatpush.msrb.mxu1 %v274_v45 }
  0x2b   :  { %375 = vmatpush.msrb.mxu2 %v256_v40  ;;  %356 = vmatpush.msra.mxu3 %v239_v44 }
  0x2c   :  { %394 = vmatpush.msrb.mxu1 %v273_v48 }
  0x2d   :  { %376 = vmatpush.msrb.mxu2 %v255_v43  ;;  %357 = vmatpush.msra.mxu3 %v238_v47 }
  0x2e   :  { %395 = vmatpush.msrb.mxu1 %v272_v51 }
  0x2f   :  { %1961 = vmatmul.msk.f32.gmra.mxu0 %vm121_vm0, %v95_v26  ;;  %377 = vmatpush.msrb.mxu2 %v254_v46 }
  0x30   :  { %1965 = vmatmul.msk.f32.gmra.mxu1 %vm121_vm0, %v95_v26  ;;  %1969 = vmatmul.msk.f32.gmra.mxu2 %vm121_vm0, %v95_v26 }
  0x31   :  { %378 = vmatpush.msrb.mxu2 %v253_v49  ;;  %358 = vmatpush.msra.mxu3 %v237_v50 }
  0x32   :  { %396 = vmatpush.msrb.mxu1 %v271_v54 }
  0x33   :  { %379 = vmatpush.msrb.mxu2 %v252_v52  ;;  %359 = vmatpush.msra.mxu3 %v236_v53 }
  0x34   :  { %397 = vmatpush.msrb.mxu1 %v270_v57 }
  0x35   :  { %380 = vmatpush.msrb.mxu2 %v251_v55  ;;  %360 = vmatpush.msra.mxu3 %v235_v56 }
  0x36   :  { %398 = vmatpush.msrb.mxu1 %v269_v62 }
  0x37   :  { %1962 = vmatmul.msk.f32.gmra.mxu0 %vm121_vm0, %v96_v27  ;;  %381 = vmatpush.msrb.mxu2 %v250_v60 }
  0x38   :  { %1966 = vmatmul.msk.f32.gmra.mxu1 %vm121_vm0, %v96_v27  ;;  %1970 = vmatmul.msk.f32.gmra.mxu2 %vm121_vm0, %v96_v27  ;;  %vm1901_vm0 = vcmask 64512  }
  0x39   :  { %361 = vmatpush.msra.mxu3 %v234_v61  ;;  %382 = vmatpush.msrb.mxu2 %v249_v63 }
  0x3a   :  { %399 = vmatpush.msrb.mxu1 %v268_v1 }
  0x3b   :  { %362 = vmatpush.msra.mxu3 %v233_v0  ;;  %383 = vmatpush.msrb.mxu2 %v248_v2 }
  0x3c   :  { %400 = vmatpush.msrb.mxu1 %v267_v4 }
  0x3d   :  { %363 = vmatpush.msra.mxu3 %v232_v3  ;;  %384 = vmatpush.msrb.mxu2 %v247_v6 }
  0x3e   :  { %401 = vmatpush.msrb.mxu1 %v266_v8 }
  0x3f   :  { %364 = vmatpush.msra.mxu3 %v231_v7  ;;  %385 = vmatpush.msrb.mxu2 %v246_v10 }
  0x40   :  { %402 = vmatpush.msrb.mxu1 %v265_v12 }
  0x41   :  { %365 = vmatpush.msra.mxu3 %v230_v11 }
  0x42   :  { %403 = vmatpush.msrb.mxu1 %v264_v14 }
  0x44   :  { %404 = vmatpush.msrb.mxu1 %v263_v15 }
  0x46   :  { %405 = vmatpush.msrb.mxu1 %v262_v16 }
  0x9c   :  { %v2391_v58 = vpop.f32.mrf.mxu0 }
  0x9d   :  { %v2393_v59 = vpop.f32.mrf.mxu1  ;;  %v307_v22 = vmul.f32 %v2391_v58, %v2391_v58 }
  0x9e   :  { %v308_v25 = vmul.f32 %v2393_v59, %v2393_v59 }
  0xa3   :  { %v2422_v5 = vpop.f32.mrf.mxu2 }
  0xa4   :  { %v2433_v9 = vpop.f32.mrf.mxu0  ;;  %v309_v42 = vmul.f32 %v2422_v5, %v2422_v5 }
  0xa5   :  { %v2444_v13 = vpop.f32.mrf.mxu1  ;;  %v310_v20 = vmul.f32 %v2433_v9, %v2433_v9  ;;  %v280_v23 = vadd.f32 %v2433_v9, %v2391_v58 }
  0xa6   :  { %v311_v21 = vmul.f32 %v2444_v13, %v2444_v13  ;;  %v289_v26 = vadd.f32 %v2444_v13, %v2393_v59 }
  0xa7   :  { %v319_v28 = vadd.f32 %v310_v20, %v307_v22 }
  0xa8   :  { %v328_v31 = vadd.f32 %v311_v21, %v308_v25 }
  0xab   :  { %v2455_v17 = vpop.f32.mrf.mxu2 }
  0xac   :  { %v2457_v18 = vpop.f32.mrf.mxu0  ;;  %v312_v34 = vmul.f32 %v2455_v17, %v2455_v17  ;;  %v298_v46 = vadd.f32 %v2455_v17, %v2422_v5 }
  0xad   :  { %v2459_v19 = vpop.f32.mrf.mxu1  ;;  %v313_v24 = vmul.f32 %v2457_v18, %v2457_v18  ;;  %v281_v29 = vadd.f32 %v280_v23, %v2457_v18 }
  0xae   :  { %v314_v27 = vmul.f32 %v2459_v19, %v2459_v19  ;;  %v290_v32 = vadd.f32 %v289_v26, %v2459_v19  ;;  %v337_v49 = vadd.f32 %v312_v34, %v309_v42 }
  0xaf   :  { %v320_v35 = vadd.f32 %v319_v28, %v313_v24 }
  0xb0   :  { %v329_v39 = vadd.f32 %v328_v31, %v314_v27 }
  0xb3   :  { %v2478_v30 = vpop.f32.mrf.mxu2 }
  0xb4   :  { %v2481_v33 = vpop.f32.mrf.mxu0  ;;  %v315_v43 = vmul.f32 %v2478_v30, %v2478_v30  ;;  %v299_v52 = vadd.f32 %v298_v46, %v2478_v30  ;;  %v228_v46 = vld [vmem:[%s4042_s4 + $0x38] sm:$0xff] }
  0xb5   :  { %v282_v36 = vadd.f32 %v281_v29, %v2481_v33  ;;  %v316_v37 = vmul.f32 %v2481_v33, %v2481_v33  ;;  %v2488_v38 = vpop.f32.mrf.mxu1  ;;  %477 = vmatpush.msra.mxu2 %v228_v46 }
  0xb6   :  { %v291_v40 = vadd.f32 %v290_v32, %v2488_v38  ;;  %v317_v41 = vmul.f32 %v2488_v38, %v2488_v38  ;;  %v338_v55 = vadd.f32 %v337_v49, %v315_v43  ;;  %v225_v49 = vld [vmem:[%s4042_s4 + $0x20] sm:$0xff] }
  0xb7   :  { %v283_v44 = vrot.slane %v282_v36, 4  ;;  %v321_v45 = vadd.f32 %v320_v35, %v316_v37  ;;  %478 = vmatpush.msra.mxu2 %v225_v49 }
  0xb8   :  { %v292_v47 = vrot.slane %v291_v40, 4  ;;  %v330_v48 = vadd.f32 %v329_v39, %v317_v41 }
  0xb9   :  { %v284_v50 = vadd.f32 %v283_v44, %v282_v36  ;;  %v322_v51 = vrot.slane %v321_v45, 4 }
  0xba   :  { %v293_v53 = vadd.f32 %v292_v47, %v291_v40  ;;  %v331_v54 = vrot.slane %v330_v48, 4  ;;  %v227_v47 = vld [vmem:[%s4042_s4 + $0x30] sm:$0xff] }
  0xbb   :  { %v285_v56 = vrot.slane %v284_v50, 2  ;;  %v323_v57 = vadd.f32 %v322_v51, %v321_v45  ;;  %v2500_v60 = vpop.f32.mrf.mxu2  ;;  %457 = vmatpush.msrb.mxu3 %v227_v47  ;;  %v222_v51 = vld [vmem:[%s4042_s4 + $0x8] sm:$0xff] }
  0xbc   :  { %v294_v61 = vrot.slane %v293_v53, 2  ;;  %v332_v62 = vadd.f32 %v331_v54, %v330_v48  ;;  %v300_v63 = vadd.f32 %v299_v52, %v2500_v60  ;;  %v318_v0 = vmul.f32 %v2500_v60, %v2500_v60  ;;  %v221_v52 = vld [vmem:[%s4042_s4] sm:$0xff]  ;;  %479 = vmatpush.msra.mxu2 %v222_v51 }
  0xbd   :  { %v286_v1 = vadd.f32 %v285_v56, %v284_v50  ;;  %v324_v2 = vrot.slane %v323_v57, 2  ;;  %v224_v50 = vld [vmem:[%s4042_s4 + $0x18] sm:$0xff]  ;;  %v226_v56 = vld [vmem:[%s4042_s4 + $0x28] sm:$0xff] }
  0xbe   :  { %v295_v3 = vadd.f32 %v294_v61, %v293_v53  ;;  %v333_v4 = vrot.slane %v332_v62, 2  ;;  %v301_v6 = vrot.slane %v300_v63, 4  ;;  %v339_v7 = vadd.f32 %v338_v55, %v318_v0  ;;  %458 = vmatpush.msrb.mxu3 %v224_v50  ;;  %v229_v55 = vld [vmem:[%s4042_s4 + $0x40] sm:$0xff]  ;;  %v223_v61 = vld [vmem:[%s4042_s4 + $0x10] sm:$0xff] }
  0xbf   :  { %v287_v8 = vrot.slane %v286_v1, 1  ;;  %v325_v10 = vadd.f32 %v324_v2, %v323_v57 }
  0xc0   :  { %v302_v11 = vadd.f32 %v301_v6, %v300_v63  ;;  %v340_v12 = vrot.slane %v339_v7, 4  ;;  %v296_v14 = vrot.slane %v295_v3, 1  ;;  %v334_v15 = vadd.f32 %v333_v4, %v332_v62  ;;  %459 = vmatpush.msrb.mxu3 %v221_v52 }
  0xc1   :  { %v326_v16 = vrot.slane %v325_v10, 1  ;;  %v288_v23 = vadd.f32 %v287_v8, %v286_v1  ;;  %v2198_v63 = vmov 0.0   ;;  %v2080_v8 = vld [vmem:[%s4046_s8] ss:$0 sm:$0xff] }
  0xc2   :  { %v303_v20 = vrot.slane %v302_v11, 2  ;;  %v341_v21 = vadd.f32 %v340_v12, %v339_v7  ;;  %v335_v22 = vrot.slane %v334_v15, 1  ;;  %v297_v27 = vadd.f32 %v296_v14, %v295_v3 }
  0xc3   :  { %v327_v24 = vadd.f32 %v326_v16, %v325_v10  ;;  %v2535_v0 = vrot.slane %v2198_v63, 7  ;;  %v2542_v6 = vrot.slane %v2198_v63, 1 }
  0xc4   :  { %v304_v25 = vadd.f32 %v303_v20, %v302_v11  ;;  %v342_v26 = vrot.slane %v341_v21, 2  ;;  %v336_v28 = vadd.f32 %v335_v22, %v334_v15  ;;  %v279_v20 = vld [vmem:[%s4047_s9] sm:$0x1] }
  0xc5   :  { %v347_v29 = vsel %vm346_vm1, %v288_v23, %v327_v24  ;;  %v2030_v2 = vpack.i.bf16 %v2535_v0, %v2535_v0  ;;  %v2035_v10 = vpack.i.bf16 0.0, %v2535_v0  ;;  %v2060_v12 = vpack.i.bf16 %v2542_v6, %v2542_v6 }
  0xc6   :  { %366 = vmatmul.f32.vlgmr.msra.gmra.mxu3 %v347_v29  ;;  %v348_v31 = vsel %vm346_vm1, %v297_v27, %v336_v28  ;;  %v305_v32 = vrot.slane %v304_v25, 1  ;;  %v343_v34 = vadd.f32 %v342_v26, %v341_v21  ;;  %v2040_v22 = vpack.i.bf16 %v2535_v0, %v2198_v63 }
  0xc7   :  { %386 = vmatmul.f32.vlgmr.msrb.gmra.mxu2 %v348_v31  ;;  %497 = vmatpush.msra.mxu3 %v229_v55 }
  0xc8   :  { %v344_v35 = vrot.slane %v343_v34, 1  ;;  %v306_v36 = vadd.f32 %v305_v32, %v304_v25  ;;  %2031 = vrot.lane.b32.xlu1 %v2030_v2, %s2199_s15  ;;  %2026 = vrot.lane.b32.xlu2 %v2030_v2, %s2193_s22 }
  0xc9   :  { %498 = vmatpush.msra.mxu3 %v226_v56  ;;  %2021 = vrot.lane.b32.xlu0 %v2030_v2, %s2199_s15 }
  0xca   :  { %v345_v37 = vadd.f32 %v344_v35, %v343_v34 }
  0xcb   :  { %499 = vmatpush.msra.mxu3 %v223_v61 }
  0xcc   :  { %v349_v39 = vsel %vm346_vm1, %v306_v36, %v345_v37 }
  0xcd   :  { %406 = vmatmul.f32.vlgmr.msrb.gmra.mxu1 %v349_v39 }
  0xd0   :  { %2036 = vrot.lane.b32.xlu1 %v2035_v10, %s2193_s22  ;;  %2051 = vrot.lane.b32.xlu2 %v2198_v63, %s2193_s22 }
  0xd1   :  { %2061 = vrot.lane.b32.xlu0 %v2060_v12, %s2193_s22 }
  0xd8   :  { %2041 = vrot.lane.b32.xlu1 %v2040_v22, %s2193_s22  ;;  %2071 = vrot.lane.b32.xlu2 %v2060_v12, %s2193_s22 }
  0xd9   :  { %2066 = vrot.lane.b32.xlu0 %v2060_v12, %s2199_s15 }
  0xe0   :  { %2046 = vrot.lane.b32.xlu1 %v2198_v63, %s2199_s15 }
  0xe8   :  { %2056 = vrot.lane.b32.xlu1 %v2198_v63, %s2199_s15 }
  0xf0   :  { %2076 = vrot.lane.b32.xlu1 %v2060_v12, %s2199_s15 }
 0x149   :  { %v367_v40 = vpop.f32.mrf.mxu3 }
 0x14a   :  { %v387_v41 = vpop.f32.mrf.mxu2  ;;  %v407_v43 = vpop.f32.mrf.mxu1 }
 0x14b   :  { %v388_v42 = vadd.f32 %v387_v41, %v367_v40 }
 0x14d   :  { %v408_v44 = vadd.f32 %v407_v43, %v388_v42 }
 0x14f   :  { %v410_v45 = vmul.f32 0.001953125, %v408_v44 }
 0x151   :  { %v411_v48 = vmul.f32 %v410_v45, %v410_v45 }
 0x153   :  { %v413_v53 = vrot.slane %v411_v48, 7 }
 0x155   :  { %v415_v54 = vsub.f32 %v410_v45, %v413_v53 }
 0x157   :  { %v416_v57 = vadd.f32 1e-05, %v415_v54 }
 0x159   :  { %2083 = vrsqrt.f32 %v416_v57  ;;  %vm423_vm3 = vweird.f32 %v416_v57 }
 0x15f   :  { %v2084_v62 = vpop.eup %2083 }
 0x160   :  { %v418_v1 = vmul.f32 %v2084_v62, %v416_v57  ;;  %vm424_vm2 = vweird.f32 %v2084_v62 }
 0x161   :  { %vm425_vm4 = vmor %vm423_vm3, %vm424_vm2 }
 0x162   :  { %v419_v3 = vmul.f32 %v2084_v62, %v418_v1 }
 0x164   :  { %v420_v4 = vmul.f32 0.5, %v419_v3 }
 0x166   :  { %v421_v7 = vsub.f32 1.5, %v420_v4 }
 0x168   :  { %v422_v11 = vmul.f32 %v2084_v62, %v421_v7 }
 0x16a   :  { %v426_v14 = vsel %vm425_vm4, %v2084_v62, %v422_v11 }
 0x16b   :  { %v430_v15 = vmul.f32 %v2080_v8, %v426_v14 }
 0x16d   :  { %v432_v16 = vrot.slane %v430_v15, 1 }
 0x16f   :  { %v434_v21 = vmul.f32 %v432_v16, %v410_v45 }
 0x171   :  { %v435_v23 = vsub.f32 %v279_v20, %v434_v21 }
 0x173   :  { %v437_v24 = vperm.slane %v435_v23, 0 }
 0x175   :  { %v439_v25 = vsel %vm346_vm1, %v432_v16, %v437_v24 }
 0x176   :  { %1971 = vmatmul.msk.f32.vlgmr.msrb.gmra.mxu3 %vm440_vm5, %v439_v25  ;;  %1972 = vmatmul.msk.f32.vlgmr.msra.gmra.mxu2 %vm440_vm5, %v439_v25 }
 0x17e   :  { %1973 = vmatmul.msk.f32.vlgmr.msra.gmra.mxu3 %vm440_vm5, %v439_v25 }
 0x1f9   :  { %v461_v26 = vpop.f32.mrf.mxu3  ;;  %v481_v27 = vpop.f32.mrf.mxu2 }
 0x1fa   :  { %v504_v28 = vperm.slane %v461_v26, 0  ;;  %v505_v29 = vperm.slane %v481_v27, 0  ;;  %v519_v32 = vperm.slane %v461_v26, 1  ;;  %v520_v36 = vperm.slane %v481_v27, 1  ;;  %v2685_v26 = vpop.permute.xlu1 %2031 }
 0x1fb   :  { %4116 = vst [vmem:[#allocation21_spill] sm:$0xff] %v2685_v26 }
 0x1fc   :  { %v507_v31 = vmul.f32 %v504_v28, %v2391_v58  ;;  %v508_v34 = vmul.f32 %v505_v29, %v2393_v59  ;;  %v511_v35 = vmul.f32 %v505_v29, %v2444_v13  ;;  %v517_v39 = vmul.f32 %v505_v29, %v2488_v38 }
 0x1fd   :  { %v513_v40 = vmul.f32 %v504_v28, %v2457_v18  ;;  %v514_v41 = vmul.f32 %v505_v29, %v2459_v19  ;;  %v606_v18 = vlaneseq  ;;  %v510_v38 = vmul.f32 %v504_v28, %v2433_v9  ;;  %v2695_v29 = vpop.permute.xlu2 %2026 }
 0x1fe   :  { %v522_v37 = vadd.f32 %v519_v32, %v507_v31  ;;  %v523_v42 = vadd.f32 %v520_v36, %v508_v34  ;;  %v526_v43 = vadd.f32 %v520_v36, %v511_v35  ;;  %v532_v58 = vadd.f32 %v520_v36, %v517_v39 }
 0x1ff   :  { %v528_v48 = vadd.f32 %v519_v32, %v513_v40  ;;  %v529_v59 = vadd.f32 %v520_v36, %v514_v41  ;;  %v2587_v52 = vshrl.u32 %v606_v18, 7  ;;  %v525_v54 = vadd.f32 %v519_v32, %v510_v38 }
 0x200   :  { %v534_v44 = vmax.f32 %v522_v37, 0.0  ;;  %v535_v45 = vmax.f32 %v523_v42, 0.0  ;;  %v538_v46 = vmax.f32 %v526_v43, 0.0  ;;  %v544_v19 = vmax.f32 %v532_v58, 0.0 }
 0x201   :  { %v540_v50 = vmax.f32 %v528_v48, 0.0  ;;  %v541_v51 = vmax.f32 %v529_v59, 0.0  ;;  %vm840_vm6 = vcmp.lt.s32.totalorder %v2587_v52, 7  ;;  %v537_v61 = vmax.f32 %v525_v54, 0.0  ;;  %v501_v43 = vpop.f32.mrf.mxu3  ;;  %v2750_v48 = vpop.permute.xlu0 %2021 }
 0x202   :  { %v2573_v47 = vmin.f32 %v534_v44, 6.0  ;;  %v2575_v49 = vmin.f32 %v535_v45, 6.0  ;;  %v2577_v13 = vmin.f32 %v538_v46, 6.0  ;;  %v2589_v53 = vmin.f32 %v544_v19, 6.0 }
 0x203   :  { %v2591_v55 = vmin.f32 %v540_v50, 6.0  ;;  %v2593_v56 = vmin.f32 %v541_v51, 6.0  ;;  %v2610_v2 = vmin.f32 %v537_v61, 6.0  ;;  %v516_v4 = vmul.f32 %v504_v28, %v2481_v33 }
 0x204   :  { %4109 = vst [vmem:[#allocation14_spill] sm:$0xff] %v2575_v49  ;;  %721 = vrot.lane.b32.xlu2 %v2573_v47, %s2193_s22  ;;  %727 = vrot.lane.b32.xlu1 %v2577_v13, %s2193_s22  ;;  %v833_v9 = vrot.slane %v2577_v13, 1  ;;  %v829_v57 = vrot.slane %v2575_v49, 1  ;;  %v1202_v1 = vrot.slane %v2589_v53, 1  ;;  %vm608_vm7 = vcmp.lt.s32.totalorder %v2587_v52, 1 }
 0x205   :  { %4110 = vst [vmem:[#allocation15_spill] sm:$0xff] %v2577_v13  ;;  %725 = vrot.lane.b32.xlu0 %v2575_v49, %s2193_s22  ;;  %v1198_v62 = vrot.slane %v2593_v56, 1  ;;  %v531_v7 = vadd.f32 %v519_v32, %v516_v4  ;;  %v976_v10 = vrot.slane %v2593_v56, 7  ;;  %v594_v12 = vrot.slane %v2573_v47, 7  ;;  %v2707_v32 = vpop.permute.xlu1 %2036  ;;  %v2709_v34 = vpop.permute.xlu2 %2051 }
 0x206   :  { %4111 = vst [vmem:[#allocation16_spill] sm:$0xff] %v2589_v53  ;;  %v2607_v63 = vsel %vm840_vm6, %v829_v57, %v833_v9  ;;  %v598_v14 = vrot.slane %v2610_v2, 7  ;;  %v595_v16 = vrot.slane %v2575_v49, 7  ;;  %v980_v20 = vrot.slane %v2589_v53, 7 }
 0x207   :  { %4112 = vst [vmem:[#allocation17_spill] sm:$0xff] %v2593_v56  ;;  %v2616_v3 = vsel %vm840_vm6, %v1198_v62, %v1202_v1  ;;  %v543_v8 = vmax.f32 %v531_v7, 0.0  ;;  %v2638_v33 = vsel %vm608_vm7, %v2535_v0, %v976_v10  ;;  %v2663_v21 = vsel %vm608_vm7, %v2535_v0, %v594_v12 }
 0x208   :  { %4113 = vst [vmem:[#allocation18_spill] sm:$0xff] %v2607_v63  ;;  %v2652_v15 = vsel %vm608_vm7, %v594_v12, %v598_v14  ;;  %v2668_v22 = vsel %vm608_vm7, %v2535_v0, %v595_v16  ;;  %v2674_v23 = vsel %vm608_vm7, %v976_v10, %v980_v20  ;;  %v599_v24 = vrot.slane %v2577_v13, 7 }
 0x209   :  { %4114 = vst [vmem:[#allocation19_spill] sm:$0xff] %v2616_v3  ;;  %v2633_v11 = vmin.f32 %v543_v8, 6.0  ;;  %v975_v27 = vrot.slane %v2591_v55, 7  ;;  %v2714_v35 = vsel %vm840_vm6, %v833_v9, %v2542_v6  ;;  %v828_v37 = vrot.slane %v2573_v47, 1  ;;  %v2776_v62 = vpop.permute.xlu0 %2061 }
 0x20a   :  { %4115 = vst [vmem:[#allocation20_spill] sm:$0xff] %v2674_v23  ;;  %v2683_v25 = vsel %vm608_vm7, %v595_v16, %v599_v24  ;;  %v832_v39 = vrot.slane %v2610_v2, 1  ;;  %v2744_v44 = vand.u32 127, %v606_v18  ;;  %v1197_v45 = vrot.slane %v2591_v55, 1 }
 0x20b   :  { %v979_v28 = vrot.slane %v2633_v11, 7  ;;  %4117 = vst [vmem:[#allocation22_spill] sm:$0xff] %v2714_v35  ;;  %v2731_v40 = vsel %vm608_vm7, %v2535_v0, %v975_v27  ;;  %v1201_v46 = vrot.slane %v2633_v11, 1  ;;  %v506_v59 = vperm.slane %v501_v43, 0 }
 0x20c   :  { %1099 = vrot.lane.b32.xlu2 %v2589_v53, %s2193_s22  ;;  %1093 = vrot.lane.b32.xlu1 %v2591_v55, %s2193_s22  ;;  %v2735_v41 = vsel %vm840_vm6, %v828_v37, %v832_v39  ;;  %v2039_v19 = vunpack.i.h.bf16 %v2707_v32  ;;  %vm635_vm8 = vcmp.lt.s32.totalorder %v2744_v44, 24  ;;  %v521_v54 = vperm.slane %v501_v43, 1 }
 0x20d   :  { %1097 = vrot.lane.b32.xlu0 %v2593_v56, %s2193_s22  ;;  %v2699_v31 = vsel %vm608_vm7, %v975_v27, %v979_v28  ;;  %v2722_v36 = vpop.permute.xlu1 %2041  ;;  %v2737_v42 = vpop.permute.xlu2 %2071  ;;  %v2758_v18 = vsel %vm840_vm6, %v1197_v45, %v1201_v46  ;;  %v515_v50 = vmul.f32 %v506_v59, %v2478_v30  ;;  %v2772_v57 = vsel %vm840_vm6, %v832_v39, %v2542_v6 }
 0x20e   :  { %4118 = vst [vmem:[#allocation23_spill] sm:$0xff] %v2758_v18  ;;  %v518_v4 = vmul.f32 %v506_v59, %v2500_v60  ;;  %v509_v8 = vmul.f32 %v506_v59, %v2422_v5  ;;  %v2797_v16 = vsel %vm840_vm6, %v1202_v1, %v2542_v6  ;;  %v512_v27 = vmul.f32 %v506_v59, %v2455_v17 }
 0x20f   :  { %v530_v9 = vadd.f32 %v521_v54, %v515_v50  ;;  %vm693_vm9 = vcmp.lt.s32.totalorder %v2744_v44, 104 }
 0x210   :  { %v533_v10 = vadd.f32 %v521_v54, %v518_v4  ;;  %v524_v14 = vadd.f32 %v521_v54, %v509_v8  ;;  %v527_v39 = vadd.f32 %v521_v54, %v512_v27 }
 0x211   :  { %v542_v7 = vmax.f32 %v530_v9, 0.0  ;;  %v2805_v60 = vpop.permute.xlu0 %2066  ;;  %v2837_v9 = vsel %vm840_vm6, %v1201_v46, %v2542_v6 }
 0x212   :  { %4122 = vst [vmem:[#allocation27_spill] sm:$0xff] %v2805_v60  ;;  %v545_v24 = vmax.f32 %v533_v10, 0.0  ;;  %v536_v28 = vmax.f32 %v524_v14, 0.0  ;;  %v539_v59 = vmax.f32 %v527_v39, 0.0  ;;  %v2044_v60 = vunpack.i.h.bf16 %v2722_v36 }
 0x213   :  { %v2788_v12 = vmin.f32 %v542_v7, 6.0  ;;  %4130 = vst [vmem:[#allocation35_spill] sm:$0xff] %v2837_v9 }
 0x214   :  { %785 = vrot.lane.b32.xlu2 %v2573_v47, %s2199_s15  ;;  %789 = vrot.lane.b32.xlu1 %v2575_v49, %s2199_s15  ;;  %v2808_v37 = vmin.f32 %v545_v24, 6.0  ;;  %v2810_v1 = vmin.f32 %v536_v28, 6.0  ;;  %v2830_v54 = vmin.f32 %v539_v59, 6.0  ;;  %v2043_v28 = vunpack.i.l.bf16 %v2722_v36 }
 0x215   :  { %723 = vrot.lane.b32.xlu0 %v2610_v2, %s2193_s22  ;;  %v2748_v58 = vpop.permute.xlu1 %2046  ;;  %4120 = vst [vmem:[#allocation25_spill] sm:$0xff] %v2788_v12 }
 0x216   :  { %4123 = vst [vmem:[#allocation28_spill] sm:$0xff] %v2808_v37  ;;  %v596_v50 = vrot.slane %v2810_v1, 7  ;;  %v600_v24 = vrot.slane %v2830_v54, 7  ;;  %v830_v26 = vrot.slane %v2810_v1, 1 }
 0x217   :  { %4124 = vst [vmem:[#allocation29_spill] sm:$0xff] %v2810_v1 }
 0x218   :  { %4129 = vst [vmem:[#allocation34_spill] sm:$0xff] %v2830_v54  ;;  %v2842_v4 = vsel %vm608_vm7, %v2535_v0, %v596_v50  ;;  %v2867_v27 = vsel %vm608_vm7, %v596_v50, %v600_v24 }
 0x219   :  { %4134 = vst [vmem:[#allocation39_spill] sm:$0xff] %v2867_v27 }
 0x21c   :  { %791 = vrot.lane.b32.xlu2 %v2577_v13, %s2199_s15  ;;  %1155 = vrot.lane.b32.xlu1 %v2591_v55, %s2199_s15 }
 0x21d   :  { %787 = vrot.lane.b32.xlu0 %v2610_v2, %s2199_s15  ;;  %v2774_v61 = vpop.permute.xlu1 %2056 }
 0x224   :  { %1159 = vrot.lane.b32.xlu2 %v2593_v56, %s2199_s15  ;;  %999 = vrot.lane.b32.xlu1 %v2638_v33, %s2193_s22 }
 0x225   :  { %1095 = vrot.lane.b32.xlu0 %v2633_v11, %s2193_s22  ;;  %v2803_v5 = vpop.permute.xlu1 %2076 }
 0x226   :  { %4121 = vst [vmem:[#allocation26_spill] sm:$0xff] %v2803_v5 }
 0x22c   :  { %1157 = vrot.lane.b32.xlu2 %v2633_v11, %s2199_s15  ;;  %619 = vrot.lane.b32.xlu1 %v2652_v15, %s2193_s22 }
 0x22d   :  { %1161 = vrot.lane.b32.xlu0 %v2589_v53, %s2199_s15 }
 0x234   :  { %677 = vrot.lane.b32.xlu2 %v2663_v21, %s2199_s15  ;;  %1001 = vrot.lane.b32.xlu1 %v2674_v23, %s2193_s22 }
 0x235   :  { %621 = vrot.lane.b32.xlu0 %v2668_v22, %s2193_s22 }
 0x23c   :  { %683 = vrot.lane.b32.xlu2 %v2683_v25, %s2199_s15  ;;  %681 = vrot.lane.b32.xlu1 %v2668_v22, %s2199_s15 }
 0x23d   :  { %623 = vrot.lane.b32.xlu0 %v2683_v25, %s2193_s22 }
 0x244   :  { %997 = vrot.lane.b32.xlu2 %v2699_v31, %s2193_s22  ;;  %1055 = vrot.lane.b32.xlu1 %v2638_v33, %s2199_s15 }
 0x245   :  { %617 = vrot.lane.b32.xlu0 %v2663_v21, %s2193_s22 }
 0x24c   :  { %855 = vrot.lane.b32.xlu2 %v2714_v35, %s2193_s22  ;;  %853 = vrot.lane.b32.xlu1 %v2607_v63, %s2193_s22 }
 0x24d   :  { %679 = vrot.lane.b32.xlu0 %v2652_v15, %s2199_s15 }
 0x254   :  { %1053 = vrot.lane.b32.xlu2 %v2699_v31, %s2199_s15  ;;  %849 = vrot.lane.b32.xlu1 %v2735_v41, %s2193_s22 }
 0x255   :  { %995 = vrot.lane.b32.xlu0 %v2731_v40, %s2193_s22 }
 0x25c   :  { %1221 = vrot.lane.b32.xlu2 %v2616_v3, %s2193_s22  ;;  %1217 = vrot.lane.b32.xlu1 %v2758_v18, %s2193_s22 }
 0x25d   :  { %1051 = vrot.lane.b32.xlu0 %v2731_v40, %s2199_s15 }
 0x25e   :  { %v722_v38 = vpop.permute.xlu2 %721 }
 0x25f   :  { %v2767_v51 = vsel %vm635_vm8, %v2039_v19, %v722_v38 }
 0x264   :  { %851 = vrot.lane.b32.xlu2 %v2772_v57, %s2193_s22  ;;  %917 = vrot.lane.b32.xlu1 %v2607_v63, %s2199_s15 }
 0x265   :  { %1057 = vrot.lane.b32.xlu0 %v2674_v23, %s2199_s15 }
 0x266   :  { %v2784_v30 = vpop.permute.xlu2 %1099 }
 0x267   :  { %4119 = vst [vmem:[#allocation24_spill] sm:$0xff] %v2784_v30 }
 0x26c   :  { %913 = vrot.lane.b32.xlu2 %v2735_v41, %s2199_s15  ;;  %1101 = vrot.lane.b32.xlu1 %v2788_v12, %s2193_s22 }
 0x26d   :  { %1223 = vrot.lane.b32.xlu0 %v2797_v16, %s2193_s22 }
 0x26e   :  { %v786_v20 = vpop.permute.xlu2 %785 }
 0x274   :  { %919 = vrot.lane.b32.xlu2 %v2714_v35, %s2199_s15  ;;  %1165 = vrot.lane.b32.xlu1 %v2808_v37, %s2199_s15 }
 0x275   :  { %915 = vrot.lane.b32.xlu0 %v2772_v57, %s2199_s15 }
 0x276   :  { %v2818_v43 = vpop.permute.xlu2 %791  ;;  %v2820_v45 = vpop.permute.xlu1 %727 }
 0x277   :  { %4125 = vst [vmem:[#allocation30_spill] sm:$0xff] %v2818_v43  ;;  %v2822_v17 = vpop.permute.xlu0 %725 }
 0x278   :  { %4126 = vst [vmem:[#allocation31_spill] sm:$0xff] %v2820_v45  ;;  %v2827_v19 = vsel %vm635_vm8, %v722_v38, %v2822_v17  ;;  %v2053_v38 = vunpack.i.l.bf16 %v2709_v34 }
 0x279   :  { %4127 = vst [vmem:[#allocation32_spill] sm:$0xff] %v2822_v17 }
 0x27a   :  { %4128 = vst [vmem:[#allocation33_spill] sm:$0xff] %v2827_v19 }
 0x27c   :  { %1279 = vrot.lane.b32.xlu2 %v2758_v18, %s2199_s15  ;;  %625 = vrot.lane.b32.xlu1 %v2842_v4, %s2193_s22  ;;  %v834_v18 = vrot.slane %v2830_v54, 1 }
 0x27d   :  { %1219 = vrot.lane.b32.xlu0 %v2837_v9, %s2193_s22 }
 0x27e   :  { %v2849_v7 = vpop.permute.xlu2 %1159  ;;  %v1094_v10 = vpop.permute.xlu1 %1093  ;;  %v2918_v56 = vsel %vm840_vm6, %v830_v26, %v834_v18 }
 0x27f   :  { %4131 = vst [vmem:[#allocation36_spill] sm:$0xff] %v2849_v7  ;;  %v2851_v8 = vpop.permute.xlu0 %1097  ;;  %v2860_v14 = vsel %vm635_vm8, %v2053_v38, %v1094_v10 }
 0x280   :  { %4132 = vst [vmem:[#allocation37_spill] sm:$0xff] %v2851_v8  ;;  %v2856_v46 = vsel %vm635_vm8, %v1094_v10, %v2851_v8 }
 0x281   :  { %4133 = vst [vmem:[#allocation38_spill] sm:$0xff] %v2856_v46  ;;  %v2897_v46 = vsel %vm840_vm6, %v834_v18, %v2542_v6  ;;  %v1203_v18 = vrot.slane %v2808_v37, 1 }
 0x282   :  { %4137 = vst [vmem:[#allocation42_spill] sm:$0xff] %v2897_v46 }
 0x283   :  { %4138 = vst [vmem:[#allocation43_spill] sm:$0xff] %v2918_v56 }
 0x284   :  { %729 = vrot.lane.b32.xlu2 %v2810_v1, %s2193_s22  ;;  %627 = vrot.lane.b32.xlu1 %v2867_v27, %s2193_s22 }
 0x285   :  { %731 = vrot.lane.b32.xlu0 %v2830_v54, %s2193_s22 }
 0x286   :  { %v1158_v39 = vpop.permute.xlu2 %1157  ;;  %v2875_v59 = vpop.permute.xlu1 %789 }
 0x287   :  { %4135 = vst [vmem:[#allocation40_spill] sm:$0xff] %v2875_v59  ;;  %v724_v38 = vpop.permute.xlu0 %723  ;;  %v2880_v10 = vsel %vm693_vm9, %v786_v20, %v2875_v59 }
 0x288   :  { %v2885_v50 = vsel %vm635_vm8, %v724_v38, %v2820_v45  ;;  %v2889_v24 = vsel %vm635_vm8, %v2043_v28, %v724_v38 }
 0x289   :  { %4136 = vst [vmem:[#allocation41_spill] sm:$0xff] %v2885_v50 }
 0x28c   :  { %793 = vrot.lane.b32.xlu2 %v2810_v1, %s2199_s15  ;;  %859 = vrot.lane.b32.xlu1 %v2897_v46, %s2193_s22  ;;  %v3030_v1 = vld [vmem:[%s4040_s2 + $0x2] ss:$8 sm:$0xf] }
 0x28d   :  { %795 = vrot.lane.b32.xlu0 %v2830_v54, %s2199_s15  ;;  %v3001_v54 = vld [vmem:[%s4040_s2] ss:$8 sm:$0xf] }
 0x28e   :  { %v678_v20 = vpop.permute.xlu2 %677  ;;  %v1156_v8 = vpop.permute.xlu1 %1155  ;;  %v644_v52 = vperm.slane %v3001_v54, 0 }
 0x28f   :  { %v788_v28 = vpop.permute.xlu0 %787  ;;  %v2906_v38 = vsel %vm693_vm9, %v1156_v8, %v2849_v7  ;;  %v2054_v8 = vunpack.i.h.bf16 %v2709_v34  ;;  %v2944_v34 = vsel %vm840_vm6, %v1203_v18, %v2542_v6  ;;  %v977_v6 = vrot.slane %v2788_v12, 7 }
 0x290   :  { %v2911_v5 = vsel %vm693_vm9, %v788_v28, %v2818_v43  ;;  %4141 = vst [vmem:[#allocation46_spill] sm:$0xff] %v2944_v34 }
 0x291   :  { %v2969_v43 = vsel %vm608_vm7, %v2535_v0, %v977_v6 }
 0x292   :  { %4143 = vst [vmem:[#allocation48_spill] sm:$0xff] %v2969_v43 }
 0x294   :  { %685 = vrot.lane.b32.xlu2 %v2842_v4, %s2199_s15  ;;  %921 = vrot.lane.b32.xlu1 %v2918_v56, %s2199_s15 }
 0x295   :  { %1103 = vrot.lane.b32.xlu0 %v2808_v37, %s2193_s22 }
 0x296   :  { %v2925_v7 = vpop.permute.xlu2 %683  ;;  %v2927_v28 = vpop.permute.xlu1 %999 }
 0x297   :  { %4139 = vst [vmem:[#allocation44_spill] sm:$0xff] %v2927_v28  ;;  %v1096_v53 = vpop.permute.xlu0 %1095 }
 0x298   :  { %v2932_v63 = vsel %vm635_vm8, %v1096_v53, %v2784_v30  ;;  %v2936_v26 = vsel %vm635_vm8, %v2054_v8, %v1096_v53  ;;  %v2029_v53 = vunpack.i.h.bf16 %v2695_v29 }
 0x299   :  { %4140 = vst [vmem:[#allocation45_spill] sm:$0xff] %v2932_v63 }
 0x29c   :  { %687 = vrot.lane.b32.xlu2 %v2867_v27, %s2199_s15  ;;  %1227 = vrot.lane.b32.xlu1 %v2944_v34, %s2193_s22 }
 0x29d   :  { %1163 = vrot.lane.b32.xlu0 %v2788_v12, %s2199_s15 }
 0x29e   :  { %v998_v8 = vpop.permute.xlu2 %997  ;;  %v620_v35 = vpop.permute.xlu1 %619 }
 0x29f   :  { %v2952_v30 = vpop.permute.xlu0 %1161  ;;  %v2956_v63 = vsel %vm635_vm8, %v2044_v60, %v998_v8  ;;  %v641_v23 = vsel %vm635_vm8, %v2029_v53, %v620_v35  ;;  %v981_v53 = vrot.slane %v2808_v37, 7  ;;  %v645_v37 = vperm.slane %v3001_v54, 1 }
 0x2a0   :  { %4142 = vst [vmem:[#allocation47_spill] sm:$0xff] %v2952_v30  ;;  %v2962_v36 = vsel %vm693_vm9, %v1158_v39, %v2952_v30 }
 0x2a4   :  { %1003 = vrot.lane.b32.xlu2 %v2969_v43, %s2193_s22  ;;  %1289 = vrot.lane.b32.xlu1 %v2944_v34, %s2199_s15  ;;  %v2996_v34 = vsel %vm608_vm7, %v977_v6, %v981_v53 }
 0x2a5   :  { %1059 = vrot.lane.b32.xlu0 %v2969_v43, %s2199_s15  ;;  %v2992_v43 = vld [vmem:[%s4040_s2 + $0x1] ss:$8 sm:$0xf]  ;;  %4146 = vst [vmem:[#allocation51_spill] sm:$0xff] %v2996_v34 }
 0x2a6   :  { %v2977_v60 = vpop.permute.xlu2 %855  ;;  %v2981_v30 = vpop.permute.xlu1 %1001 }
 0x2a7   :  { %v2979_v39 = vpop.permute.xlu0 %621  ;;  %4144 = vst [vmem:[#allocation49_spill] sm:$0xff] %v2981_v30  ;;  %v2987_v0 = vsel %vm635_vm8, %v998_v8, %v2981_v30  ;;  %v660_v8 = vperm.slane %v2992_v43, 1 }
 0x2a8   :  { %4145 = vst [vmem:[#allocation50_spill] sm:$0xff] %v2987_v0 }
 0x2ac   :  { %1005 = vrot.lane.b32.xlu2 %v2996_v34, %s2193_s22  ;;  %1281 = vrot.lane.b32.xlu1 %v2837_v9, %s2199_s15  ;;  %v669_v9 = vmul.f32 %v660_v8, %v2683_v25  ;;  %v2028_v25 = vunpack.i.l.bf16 %v2695_v29 }
 0x2ad   :  { %857 = vrot.lane.b32.xlu0 %v2918_v56, %s2193_s22  ;;  %v1199_v56 = vrot.slane %v2788_v12, 1 }
 0x2ae   :  { %v3011_v6 = vpop.permute.xlu2 %1053  ;;  %v3015_v0 = vpop.permute.xlu1 %681 }
 0x2af   :  { %v3013_v53 = vpop.permute.xlu0 %623  ;;  %v698_v13 = vsel %vm693_vm9, %v678_v20, %v3015_v0  ;;  %v3034_v27 = vsel %vm840_vm6, %v1199_v56, %v1203_v18  ;;  %v703_v56 = vperm.slane %v3030_v1, 0  ;;  %v666_v18 = vmul.f32 %v660_v8, %v2668_v22  ;;  %v3069_v22 = vld [vmem:[%s4040_s2 + $0x5] ss:$8 sm:$0xf] }
 0x2b0   :  { %4147 = vst [vmem:[#allocation52_spill] sm:$0xff] %v3013_v53  ;;  %v639_v30 = vsel %vm635_vm8, %v620_v35, %v3013_v53  ;;  %v659_v35 = vperm.slane %v2992_v43, 0 }
 0x2b1   :  { %v654_v45 = vmul.f32 %v645_v37, %v639_v30  ;;  %4149 = vst [vmem:[#allocation54_spill] sm:$0xff] %v3034_v27  ;;  %v3045_v30 = vld [vmem:[%s4040_s2 + $0x3] ss:$8 sm:$0xf]  ;;  %v709_v8 = vmul.f32 %v703_v56, %v698_v13 }
 0x2b2   :  { %v746_v53 = vperm.slane %v3045_v30, 0  ;;  %v668_v13 = vmul.f32 %v659_v35, %v2652_v15 }
 0x2b3   :  { %v3025_v50 = vadd.f32 %v669_v9, %v654_v45 }
 0x2b4   :  { %1061 = vrot.lane.b32.xlu2 %v2996_v34, %s2199_s15  ;;  %v3062_v34 = vld [vmem:[%s4040_s2 + $0x4] ss:$8 sm:$0xf] }
 0x2b5   :  { %4148 = vst [vmem:[#allocation53_spill] sm:$0xff] %v3025_v50  ;;  %1225 = vrot.lane.b32.xlu0 %v3034_v27, %s2193_s22  ;;  %v665_v50 = vmul.f32 %v659_v35, %v2663_v21  ;;  %v752_v21 = vmul.f32 %v746_v53, %v2767_v51 }
 0x2b6   :  { %v3047_v45 = vpop.permute.xlu2 %1221  ;;  %v3051_v20 = vpop.permute.xlu1 %1055 }
 0x2b7   :  { %4150 = vst [vmem:[#allocation55_spill] sm:$0xff] %v3047_v45  ;;  %v618_v9 = vpop.permute.xlu0 %617 }
 0x2b8   :  { %4151 = vst [vmem:[#allocation56_spill] sm:$0xff] %v3051_v20  ;;  %v638_v29 = vsel %vm635_vm8, %v618_v9, %v2979_v39  ;;  %v640_v12 = vsel %vm635_vm8, %v2028_v25, %v618_v9  ;;  %v767_v25 = vperm.slane %v3062_v34, 0  ;;  %v2064_v9 = vunpack.i.h.bf16 %v2776_v62 }
 0x2b9   :  { %v650_v59 = vmul.f32 %v644_v52, %v640_v12  ;;  %v651_v49 = vmul.f32 %v645_v37, %v638_v29  ;;  %v810_v12 = vperm.slane %v3069_v22, 0  ;;  %v653_v37 = vmul.f32 %v644_v52, %v641_v23 }
 0x2ba   :  { %v773_v23 = vmul.f32 %v767_v25, %v2573_v47  ;;  %v3105_v47 = vld [vmem:[%s4040_s2 + $0x6] ss:$8 sm:$0xf] }
 0x2bb   :  { %v671_v17 = vadd.f32 %v665_v50, %v650_v59  ;;  %v3071_v19 = vadd.f32 %v666_v18, %v651_v49  ;;  %v816_v15 = vmul.f32 %v810_v12, %v2880_v10  ;;  %v674_v35 = vadd.f32 %v668_v13, %v653_v37  ;;  %v3118_v13 = vld [vmem:[%s4040_s2] ss:$8 sm:$0xf] }
 0x2bc   :  { %923 = vrot.lane.b32.xlu2 %v2897_v46, %s2199_s15 }
 0x2bd   :  { %v715_v29 = vadd.f32 %v709_v8, %v671_v17  ;;  %1287 = vrot.lane.b32.xlu0 %v3034_v27, %s2199_s15 }
 0x2be   :  { %v852_v49 = vpop.permute.xlu2 %851  ;;  %v3089_v46 = vpop.permute.xlu1 %853 }
 0x2bf   :  { %v758_v59 = vadd.f32 %v752_v21, %v715_v29  ;;  %v3085_v50 = vsel %vm635_vm8, %v852_v49, %v2977_v60  ;;  %v870_v18 = vsel %vm635_vm8, %v2064_v9, %v852_v49  ;;  %v680_v51 = vpop.permute.xlu0 %679  ;;  %4152 = vst [vmem:[#allocation57_spill] sm:$0xff] %v3089_v46  ;;  %v3099_v21 = vld [vmem:[%s4040_s2 + $0x1] ss:$8 sm:$0xf]  ;;  %v755_v9 = vmul.f32 %v746_v53, %v2889_v24 }
 0x2c0   :  { %v699_v17 = vsel %vm693_vm9, %v680_v51, %v2925_v7  ;;  %v4086_v10 = vperm.slane %v3099_v21, 1  ;;  %v2038_v24 = vunpack.i.l.bf16 %v2707_v32  ;;  %v2063_v53 = vunpack.i.l.bf16 %v2776_v62 }
 0x2c1   :  { %v712_v52 = vmul.f32 %v703_v56, %v699_v17  ;;  %v779_v8 = vadd.f32 %v773_v23, %v758_v59  ;;  %v776_v56 = vmul.f32 %v767_v25, %v2610_v2  ;;  %v874_v59 = vperm.slane %v3105_v47, 0 }
 0x2c2   :  { %v819_v23 = vmul.f32 %v810_v12, %v2911_v5  ;;  %v4085_v2 = vperm.slane %v3118_v13, 1  ;;  %v1040_v12 = vmul.f32 %v4086_v10, %v2638_v33  ;;  %v3152_v33 = vld [vmem:[%s4040_s2 + $0x3] ss:$8 sm:$0xf] }
 0x2c3   :  { %v718_v29 = vadd.f32 %v712_v52, %v674_v35  ;;  %v822_v49 = vadd.f32 %v816_v15, %v779_v8  ;;  %4155 = vst [vmem:[#allocation60_spill] sm:$0xff] %v3152_v33 }
 0x2c4   :  { %1285 = vrot.lane.b32.xlu2 %v2797_v16, %s2199_s15 }
 0x2c5   :  { %v761_v37 = vadd.f32 %v755_v9, %v718_v29  ;;  %1283 = vrot.lane.b32.xlu0 %v2616_v3, %s2199_s15  ;;  %v883_v9 = vmul.f32 %v874_v59, %v870_v18  ;;  %v3143_v29 = vld [vmem:[%s4040_s2 + $0x2] ss:$8 sm:$0xf] }
 0x2c6   :  { %v914_v51 = vpop.permute.xlu2 %913  ;;  %v850_v15 = vpop.permute.xlu1 %849  ;;  %4153 = vst [vmem:[#allocation58_spill] sm:$0xff] %v3143_v29 }
 0x2c7   :  { %v782_v25 = vadd.f32 %v776_v56, %v761_v37  ;;  %v996_v17 = vpop.permute.xlu0 %995  ;;  %v3131_v35 = vsel %vm635_vm8, %v850_v15, %v3089_v46  ;;  %v869_v5 = vsel %vm635_vm8, %v2063_v53, %v850_v15  ;;  %v1033_v37 = vperm.slane %v3099_v21, 0  ;;  %v3192_v46 = vld [vmem:[%s4040_s2 + $0x6] ss:$8 sm:$0xf] }
 0x2c8   :  { %v1013_v32 = vsel %vm635_vm8, %v996_v17, %v2927_v28  ;;  %v1015_v62 = vsel %vm635_vm8, %v2038_v24, %v996_v17  ;;  %v880_v8 = vmul.f32 %v874_v59, %v869_v5  ;;  %v1019_v24 = vperm.slane %v3118_v13, 0 }
 0x2c9   :  { %v1026_v52 = vmul.f32 %v4085_v2, %v1013_v32  ;;  %v825_v56 = vadd.f32 %v819_v23, %v782_v25  ;;  %v1075_v59 = vperm.slane %v3143_v29, 0  ;;  %v3160_v23 = vld [vmem:[%s4040_s2 + $0x7] ss:$8 sm:$0xf]  ;;  %v2073_v25 = vunpack.i.l.bf16 %v2737_v42 }
 0x2ca   :  { %v886_v17 = vadd.f32 %v880_v8, %v822_v49  ;;  %v1025_v18 = vmul.f32 %v1019_v24, %v1015_v62  ;;  %v3168_v49 = vld [vmem:[%s4040_s2 + $0x4] ss:$8 sm:$0xf]  ;;  %v1039_v5 = vmul.f32 %v1033_v37, %v2731_v40  ;;  %v1117_v62 = vperm.slane %v3152_v33, 0 }
 0x2cb   :  { %v3147_v53 = vadd.f32 %v1040_v12, %v1026_v52  ;;  %v3154_v15 = vadd.f32 %v883_v9, %v825_v56  ;;  %v3175_v8 = vld [vmem:[%s4040_s2 + $0x5] ss:$8 sm:$0xf]  ;;  %v895_v2 = vperm.slane %v3160_v23, 0  ;;  %v1137_v27 = vperm.slane %v3168_v49, 0 }
 0x2cc   :  { %4156 = vst [vmem:[#allocation61_spill] sm:$0xff] %v3175_v8  ;;  %v1045_v10 = vadd.f32 %v1039_v5, %v1025_v18  ;;  %v1028_v18 = vmul.f32 %v1019_v24, %v2956_v63  ;;  %v1126_v24 = vmul.f32 %v1117_v62, %v2936_v26  ;;  %v2059_v26 = vunpack.i.h.bf16 %v2774_v61 }
 0x2cd   :  { %4154 = vst [vmem:[#allocation59_spill] sm:$0xff] %v3147_v53  ;;  %v901_v28 = vmul.f32 %v895_v2, %v2735_v41 }
 0x2ce   :  { %v3163_v32 = vpop.permute.xlu2 %919  ;;  %v1218_v52 = vpop.permute.xlu1 %1217 }
 0x2cf   :  { %v1052_v12 = vpop.permute.xlu0 %1051  ;;  %v3183_v56 = vsel %vm635_vm8, %v1218_v52, %v3047_v45  ;;  %v1237_v40 = vsel %vm635_vm8, %v2073_v25, %v1218_v52  ;;  %v1123_v45 = vmul.f32 %v1117_v62, %v2860_v14  ;;  %v1179_v25 = vperm.slane %v3175_v8, 0 }
 0x2d0   :  { %v1071_v9 = vsel %vm693_vm9, %v1052_v12, %v3051_v20  ;;  %4157 = vst [vmem:[#allocation62_spill] sm:$0xff] %v3183_v56  ;;  %v3197_v12 = vld [vmem:[%s4040_s2 + $0x20] ss:$8 sm:$0xf]  ;;  %v1241_v56 = vperm.slane %v3192_v46, 0  ;;  %v1042_v20 = vmul.f32 %v1033_v37, %v2699_v31 }
 0x2d1   :  { %v1081_v3 = vmul.f32 %v1075_v59, %v1071_v9  ;;  %v1143_v9 = vmul.f32 %v1137_v27, %v2591_v55  ;;  %v938_v53 = vperm.slane %v3197_v12, 0  ;;  %v1185_v14 = vmul.f32 %v1179_v25, %v2906_v38 }
 0x2d2   :  { %v1048_v63 = vadd.f32 %v1042_v20, %v1028_v18 }
 0x2d3   :  { %v1087_v52 = vadd.f32 %v1081_v3, %v1045_v10  ;;  %v1247_v10 = vmul.f32 %v1241_v56, %v1237_v40  ;;  %v2048_v40 = vunpack.i.l.bf16 %v2748_v58 }
 0x2d5   :  { %v1129_v5 = vadd.f32 %v1123_v45, %v1087_v52  ;;  %v907_v45 = vadd.f32 %v901_v28, %v886_v17  ;;  %v1188_v28 = vmul.f32 %v1179_v25, %v2962_v36 }
 0x2d6   :  { %v3207_v29 = vpop.permute.xlu2 %1279  ;;  %v3212_v3 = vpop.permute.xlu1 %917 }
 0x2d7   :  { %v1149_v33 = vadd.f32 %v1143_v9, %v1129_v5  ;;  %v3210_v8 = vpop.permute.xlu0 %1057  ;;  %v933_v31 = vsel %vm693_vm9, %v914_v51, %v3212_v3  ;;  %v1146_v9 = vmul.f32 %v1137_v27, %v2633_v11 }
 0x2d8   :  { %v1072_v55 = vsel %vm693_vm9, %v3011_v6, %v3210_v8  ;;  %v944_v38 = vmul.f32 %v938_v53, %v933_v31 }
 0x2d9   :  { %v1191_v41 = vadd.f32 %v1185_v14, %v1149_v33  ;;  %v1084_v37 = vmul.f32 %v1075_v59, %v1072_v55  ;;  %v904_v14 = vmul.f32 %v895_v2, %v2772_v57  ;;  %v704_v57 = vperm.slane %v3030_v1, 1 }
 0x2da   :  { %v3224_v20 = vadd.f32 %v944_v38, %v907_v45  ;;  %v2023_v2 = vunpack.i.l.bf16 %v2750_v48 }
 0x2db   :  { %v3222_v52 = vadd.f32 %v1247_v10, %v1191_v41  ;;  %v1090_v5 = vadd.f32 %v1084_v37, %v1048_v63  ;;  %v910_v25 = vadd.f32 %v904_v14, %v3154_v15  ;;  %v661_v41 = vperm.slane %v2992_v43, 2  ;;  %v4159_v14 = vld [vmem:[#allocation33_spill] sm:$0xff] }
 0x2dc   :  { %4158 = vst [vmem:[#allocation63_spill] sm:$0xff] %v3224_v20  ;;  %v2074_v10 = vunpack.i.h.bf16 %v2737_v42  ;;  %v747_v37 = vperm.slane %v3045_v30, 1  ;;  %v4168_v20 = vld [vmem:[#allocation31_spill] sm:$0xff] }
 0x2dd   :  { %v1132_v18 = vadd.f32 %v1126_v24, %v1090_v5  ;;  %v646_v24 = vperm.slane %v3001_v54, 2  ;;  %v705_v54 = vperm.slane %v3030_v1, 2 }
 0x2de   :  { %v730_v6 = vpop.permute.xlu2 %729  ;;  %v3230_v51 = vpop.permute.xlu1 %1101 }
 0x2df   :  { %v3228_v17 = vpop.permute.xlu0 %1223  ;;  %v1152_v33 = vadd.f32 %v1146_v9, %v1132_v18  ;;  %v768_v18 = vperm.slane %v3062_v34, 1 }
 0x2e1   :  { %v1194_v59 = vadd.f32 %v1188_v28, %v1152_v33  ;;  %v667_v33 = vmul.f32 %v661_v41, %v2842_v4  ;;  %v811_v4 = vperm.slane %v3069_v22, 1 }
 0x2e6   :  { %v794_v62 = vpop.permute.xlu2 %793  ;;  %v3235_v55 = vpop.permute.xlu1 %1165 }
 0x2e7   :  { %v916_v63 = vpop.permute.xlu0 %915  ;;  %v801_v11 = vsel %vm693_vm9, %v794_v62, %v2048_v40  ;;  %v3245_v36 = vsel %vm693_vm9, %v3235_v55, %v2059_v26 }
 0x2e8   :  { %v934_v27 = vsel %vm693_vm9, %v916_v63, %v3163_v32  ;;  %v753_v63 = vmul.f32 %v747_v37, %v4159_v14 }
 0x2e9   :  { %v947_v45 = vmul.f32 %v938_v53, %v934_v27  ;;  %v748_v27 = vperm.slane %v3045_v30, 2 }
 0x2eb   :  { %v3248_v31 = vadd.f32 %v947_v45, %v910_v25 }
 0x2ee   :  { %v686_v38 = vpop.permute.xlu2 %685  ;;  %v626_v9 = vpop.permute.xlu1 %625 }
 0x2ef   :  { %v1220_v5 = vpop.permute.xlu0 %1219  ;;  %v694_v53 = vsel %vm693_vm9, %v686_v38, %v2023_v2  ;;  %v696_v15 = vsel %vm693_vm9, %v3015_v0, %v686_v38  ;;  %v636_v26 = vsel %vm635_vm8, %v2979_v39, %v626_v9  ;;  %v769_v0 = vperm.slane %v3062_v34, 2  ;;  %v4160_v2 = vld [vmem:[#allocation32_spill] sm:$0xff] }
 0x2f0   :  { %v3265_v42 = vsel %vm635_vm8, %v1220_v5, %v3228_v17  ;;  %v1238_v43 = vsel %vm635_vm8, %v2074_v10, %v1220_v5  ;;  %v710_v28 = vmul.f32 %v704_v57, %v696_v15  ;;  %v652_v45 = vmul.f32 %v646_v24, %v636_v26  ;;  %v4161_v10 = vld [vmem:[#allocation14_spill] sm:$0xff]  ;;  %v4162_v39 = vld [vmem:[#allocation40_spill] sm:$0xff] }
 0x2f1   :  { %v1250_v40 = vmul.f32 %v1241_v56, %v1238_v43  ;;  %v737_v1 = vsel %vm635_vm8, %v4160_v2, %v730_v6  ;;  %v774_v38 = vmul.f32 %v768_v18, %v4161_v10  ;;  %v803_v34 = vsel %vm693_vm9, %v4162_v39, %v794_v62  ;;  %v4166_v39 = vld [vmem:[#allocation52_spill] sm:$0xff] }
 0x2f2   :  { %v716_v25 = vadd.f32 %v710_v28, %v3071_v19  ;;  %v711_v5 = vmul.f32 %v705_v54, %v694_v53  ;;  %v673_v30 = vadd.f32 %v667_v33, %v652_v45  ;;  %v2024_v19 = vunpack.i.h.bf16 %v2750_v48  ;;  %v4163_v33 = vld [vmem:[#allocation39_spill] sm:$0xff] }
 0x2f3   :  { %v3282_v56 = vadd.f32 %v1250_v40, %v1194_v59  ;;  %v754_v9 = vmul.f32 %v748_v27, %v737_v1  ;;  %v812_v43 = vperm.slane %v3069_v22, 2  ;;  %v875_v59 = vperm.slane %v3105_v47, 1  ;;  %v4164_v22 = vld [vmem:[#allocation29_spill] sm:$0xff] }
 0x2f4   :  { %v759_v15 = vadd.f32 %v753_v63, %v716_v25  ;;  %v717_v6 = vadd.f32 %v711_v5, %v673_v30  ;;  %v817_v40 = vmul.f32 %v811_v4, %v803_v34  ;;  %v670_v48 = vmul.f32 %v661_v41, %v4163_v33  ;;  %v4165_v1 = vld [vmem:[#allocation41_spill] sm:$0xff]  ;;  %v4169_v41 = vld [vmem:[#allocation15_spill] sm:$0xff] }
 0x2f5   :  { %v775_v45 = vmul.f32 %v769_v0, %v4164_v22  ;;  %v756_v10 = vmul.f32 %v747_v37, %v4165_v1  ;;  %v4167_v30 = vld [vmem:[#allocation53_spill] sm:$0xff]  ;;  %v896_v1 = vperm.slane %v3160_v23, 1 }
 0x2f6   :  { %v780_v28 = vadd.f32 %v774_v38, %v759_v15  ;;  %v688_v26 = vpop.permute.xlu2 %687  ;;  %v628_v53 = vpop.permute.xlu1 %627  ;;  %v760_v63 = vadd.f32 %v754_v9, %v717_v6  ;;  %v881_v38 = vmul.f32 %v875_v59, %v3131_v35  ;;  %v818_v15 = vmul.f32 %v812_v43, %v801_v11 }
 0x2f7   :  { %v732_v14 = vpop.permute.xlu0 %731  ;;  %v695_v2 = vsel %vm693_vm9, %v688_v26, %v2024_v19  ;;  %v697_v62 = vsel %vm693_vm9, %v2925_v7, %v688_v26  ;;  %v637_v34 = vsel %vm635_vm8, %v4166_v39, %v628_v53  ;;  %v777_v9 = vmul.f32 %v768_v18, %v4169_v41 }
 0x2f8   :  { %v713_v25 = vmul.f32 %v704_v57, %v697_v62  ;;  %v823_v5 = vadd.f32 %v817_v40, %v780_v28  ;;  %v655_v7 = vmul.f32 %v646_v24, %v637_v34  ;;  %v781_v26 = vadd.f32 %v775_v45, %v760_v63  ;;  %v4170_v63 = vld [vmem:[#allocation34_spill] sm:$0xff] }
 0x2f9   :  { %v738_v57 = vsel %vm635_vm8, %v4168_v20, %v732_v14  ;;  %v714_v37 = vmul.f32 %v705_v54, %v695_v2  ;;  %v2049_v53 = vunpack.i.h.bf16 %v2748_v58  ;;  %v778_v22 = vmul.f32 %v769_v0, %v4170_v63  ;;  %v3317_v20 = vld [vmem:[%s4040_s2 + $0x7] ss:$8 sm:$0xf] }
 0x2fa   :  { %v719_v19 = vadd.f32 %v713_v25, %v4167_v30  ;;  %v887_v6 = vadd.f32 %v881_v38, %v823_v5  ;;  %v676_v35 = vadd.f32 %v670_v48, %v655_v7  ;;  %v3308_v33 = vadd.f32 %v818_v15, %v781_v26  ;;  %v4171_v14 = vld [vmem:[#allocation30_spill] sm:$0xff]  ;;  %v4172_v26 = vld [vmem:[#allocation20_spill] sm:$0xff] }
 0x2fb   :  { %v757_v28 = vmul.f32 %v748_v27, %v738_v57  ;;  %v4104_v27 = vperm.slane %v3105_v47, 2  ;;  %v4100_v38 = vperm.slane %v3317_v20, 1  ;;  %v884_v39 = vmul.f32 %v875_v59, %v3085_v50  ;;  %v4174_v57 = vld [vmem:[#allocation22_spill] sm:$0xff] }
 0x2fc   :  { %v762_v62 = vadd.f32 %v756_v10, %v719_v19  ;;  %v720_v11 = vadd.f32 %v714_v37, %v676_v35  ;;  %v4101_v5 = vperm.slane %v3317_v20, 0  ;;  %v4103_v15 = vperm.slane %v3160_v23, 2 }
 0x2fd   :  { %v4106_v7 = vperm.slane %v3197_v12, 1  ;;  %v4173_v50 = vperm.slane %v3099_v21, 1  ;;  %v3344_v41 = vmul.f32 %v896_v1, %v4174_v57  ;;  %v4105_v63 = vperm.slane %v3168_v49, 2 }
 0x2fe   :  { %v783_v40 = vadd.f32 %v777_v9, %v762_v62  ;;  %v3311_v25 = vpop.permute.xlu2 %1003  ;;  %v860_v45 = vpop.permute.xlu1 %859  ;;  %v763_v18 = vadd.f32 %v757_v28, %v720_v11  ;;  %v4175_v9 = vld [vmem:[#allocation27_spill] sm:$0xff]  ;;  %v3353_v11 = vmul.f32 %v4100_v38, %v2797_v16  ;;  %v1021_v57 = vperm.slane %v3118_v13, 2 }
 0x2ff   :  { %v796_v24 = vpop.permute.xlu0 %795  ;;  %v866_v0 = vsel %vm635_vm8, %v2977_v60, %v860_v45  ;;  %v1035_v60 = vperm.slane %v3099_v21, 2  ;;  %v1043_v59 = vmul.f32 %v4173_v50, %v4172_v26  ;;  %v2068_v37 = vunpack.i.l.bf16 %v4175_v9 }
 0x300   :  { %v802_v54 = vsel %vm693_vm9, %v796_v24, %v2049_v53  ;;  %v804_v58 = vsel %vm693_vm9, %v4171_v14, %v796_v24  ;;  %v784_v10 = vadd.f32 %v778_v22, %v763_v18  ;;  %v4176_v53 = vld [vmem:[#allocation18_spill] sm:$0xff]  ;;  %v1138_v21 = vperm.slane %v3168_v49, 1  ;;  %v4177_v22 = vld [vmem:[#allocation35_spill] sm:$0xff] }
 0x301   :  { %v820_v2 = vmul.f32 %v811_v4, %v804_v58  ;;  %v821_v48 = vmul.f32 %v812_v43, %v802_v54  ;;  %v885_v4 = vmul.f32 %v4104_v27, %v866_v0  ;;  %v4102_v43 = vperm.slane %v3317_v20, 2  ;;  %v4178_v18 = vld [vmem:[#allocation42_spill] sm:$0xff]  ;;  %v4194_v27 = vld [vmem:[#allocation44_spill] sm:$0xff] }
 0x302   :  { %v902_v28 = vmul.f32 %v896_v1, %v4176_v53  ;;  %v3360_v45 = vmul.f32 %v4101_v5, %v4177_v22  ;;  %v3365_v54 = vmul.f32 %v4103_v15, %v4178_v18  ;;  %v4179_v58 = vld [vmem:[#allocation46_spill] sm:$0xff]  ;;  %v4185_v53 = vld [vmem:[#allocation16_spill] sm:$0xff] }
 0x303   :  { %v826_v34 = vadd.f32 %v820_v2, %v783_v40  ;;  %v827_v30 = vadd.f32 %v821_v48, %v784_v10  ;;  %v3377_v2 = vmul.f32 %v4102_v43, %v4179_v58  ;;  %v4180_v48 = vld [vmem:[#allocation49_spill] sm:$0xff]  ;;  %v4186_v22 = vld [vmem:[#allocation28_spill] sm:$0xff] }
 0x304   :  { %v908_v1 = vadd.f32 %v902_v28, %v887_v6  ;;  %v1148_v6 = vmul.f32 %v4105_v63, %v4186_v22  ;;  %v1395_v18 = vld [vmem:[%s4043_s5 + $0x178] sm:$0xff]  ;;  %v1393_v22 = vld [vmem:[%s4043_s5 + $0x168] sm:$0xff]  ;;  %v4193_v43 = vld [vmem:[#allocation61_spill] sm:$0xff] }
 0x305   :  { %v3337_v19 = vadd.f32 %v884_v39, %v826_v34  ;;  %v3347_v62 = vadd.f32 %v885_v4, %v827_v30  ;;  %v4181_v39 = vld [vmem:[#allocation48_spill] sm:$0xff]  ;;  %v4182_v30 = vld [vmem:[#allocation50_spill] sm:$0xff]  ;;  %v4183_v4 = vperm.slane %v3118_v13, 1  ;;  %1507 = vmatpush.msrb.mxu2 %v1395_v18  ;;  %v1180_v15 = vperm.slane %v4193_v43, 1 }
 0x306   :  { %v1006_v35 = vpop.permute.xlu2 %1005  ;;  %v922_v24 = vpop.permute.xlu1 %921  ;;  %v1041_v34 = vmul.f32 %v1035_v60, %v4181_v39  ;;  %v4188_v13 = vld [vmem:[#allocation60_spill] sm:$0xff]  ;;  %v4190_v39 = vld [vmem:[#allocation21_spill] sm:$0xff] }
 0x307   :  { %v1104_v40 = vpop.permute.xlu0 %1103  ;;  %v3369_v16 = vsel %vm693_vm9, %v922_v24, %v2068_v37  ;;  %v931_v14 = vsel %vm693_vm9, %v3212_v3, %v922_v24  ;;  %v1012_v0 = vsel %vm635_vm8, %v4180_v48, %v1006_v35  ;;  %v1029_v26 = vmul.f32 %v4183_v4, %v4182_v30  ;;  %v4184_v3 = vld [vmem:[#allocation51_spill] sm:$0xff]  ;;  %v4187_v35 = vld [vmem:[#allocation17_spill] sm:$0xff]  ;;  %v4189_v48 = vld [vmem:[#allocation58_spill] sm:$0xff] }
 0x308   :  { %v945_v10 = vmul.f32 %v4106_v7, %v931_v14  ;;  %v1044_v50 = vmul.f32 %v1035_v60, %v4184_v3  ;;  %v1147_v24 = vmul.f32 %v1138_v21, %v4185_v53  ;;  %v3397_v28 = vmul.f32 %v1138_v21, %v4187_v35  ;;  %v1394_v60 = vld [vmem:[%s4043_s5 + $0x170] sm:$0xff]  ;;  %v4191_v3 = vld [vmem:[#allocation26_spill] sm:$0xff]  ;;  %v4192_v35 = vld [vmem:[#allocation45_spill] sm:$0xff] }
 0x309   :  { %v1118_v14 = vperm.slane %v4188_v13, 1  ;;  %v1030_v58 = vmul.f32 %v1021_v57, %v1012_v0  ;;  %v2034_v30 = vunpack.i.h.bf16 %v4190_v39  ;;  %v2033_v21 = vunpack.i.l.bf16 %v4190_v39  ;;  %1508 = vmatpush.msrb.mxu2 %v1394_v60  ;;  %v4195_v39 = vld [vmem:[#allocation24_spill] sm:$0xff]  ;;  %v1392_v60 = vld [vmem:[%s4043_s5 + $0x160] sm:$0xff] }
 0x30a   :  { %v3390_v37 = vadd.f32 %v945_v10, %v908_v1  ;;  %v4108_v1 = vperm.slane %v4189_v48, 1  ;;  %v4107_v10 = vperm.slane %v4189_v48, 2  ;;  %v2058_v4 = vunpack.i.l.bf16 %v2774_v61 }
 0x30b   :  { %v2079_v53 = vunpack.i.h.bf16 %v4191_v3  ;;  %v1127_v38 = vmul.f32 %v1118_v14, %v4192_v35  ;;  %v1049_v0 = vadd.f32 %v1043_v59, %v1029_v26  ;;  %v1119_v5 = vperm.slane %v4188_v13, 2  ;;  %1509 = vmatpush.msrb.mxu2 %v1393_v22 }
 0x30c   :  { %v1011_v61 = vsel %vm635_vm8, %v4194_v27, %v3311_v25  ;;  %v1110_v63 = vsel %vm635_vm8, %v4195_v39, %v1104_v40  ;;  %v1050_v13 = vadd.f32 %v1044_v50, %v1030_v58  ;;  %v4197_v50 = vld [vmem:[#allocation47_spill] sm:$0xff]  ;;  %v1426_v44 = vmul.f32 %v3390_v37, %v3390_v37 }
 0x30d   :  { %v1174_v58 = vsel %vm693_vm9, %v4197_v50, %v3235_v55  ;;  %v1027_v39 = vmul.f32 %v1021_v57, %v1011_v61  ;;  %1510 = vmatpush.msrb.mxu2 %v1392_v60  ;;  %v1242_v55 = vperm.slane %v3192_v46, 1  ;;  %v1243_v50 = vperm.slane %v3192_v46, 2  ;;  %v1353_v46 = vld [vmem:[%s4043_s5 + $0x28] sm:$0xff] }
 0x30e   :  { %v1062_v18 = vpop.permute.xlu2 %1061  ;;  %v1228_v26 = vpop.permute.xlu1 %1227 }
 0x30f   :  { %v1164_v7 = vpop.permute.xlu0 %1163  ;;  %v1068_v35 = vsel %vm693_vm9, %v1062_v18, %v2034_v30  ;;  %v1070_v59 = vsel %vm693_vm9, %v3210_v8, %v1062_v18  ;;  %v4196_v30 = vld [vmem:[#allocation37_spill] sm:$0xff]  ;;  %v1047_v60 = vadd.f32 %v1041_v34, %v1027_v39 }
 0x310   :  { %v3435_v25 = vsel %vm693_vm9, %v1164_v7, %v2058_v4  ;;  %v1085_v27 = vmul.f32 %v4108_v1, %v1070_v59  ;;  %v1086_v40 = vmul.f32 %v4107_v10, %v1068_v35  ;;  %v1109_v8 = vsel %vm635_vm8, %v4196_v30, %v3230_v51  ;;  %v3456_v10 = vld [vmem:[%s4040_s2 + $0x20] ss:$8 sm:$0xf] }
 0x311   :  { %v1234_v4 = vsel %vm635_vm8, %v3228_v17, %v1228_v26  ;;  %v1128_v59 = vmul.f32 %v1119_v5, %v1110_v63  ;;  %v2069_v51 = vunpack.i.h.bf16 %v4175_v9  ;;  %v4198_v30 = vld [vmem:[#allocation38_spill] sm:$0xff]  ;;  %v1125_v18 = vmul.f32 %v1119_v5, %v1109_v8 }
 0x312   :  { %v1091_v35 = vadd.f32 %v1085_v27, %v1049_v0  ;;  %v1092_v22 = vadd.f32 %v1086_v40, %v1050_v13  ;;  %v1124_v1 = vmul.f32 %v1118_v14, %v4198_v30  ;;  %v1189_v17 = vmul.f32 %v1180_v15, %v1174_v58  ;;  %v1391_v30 = vld [vmem:[%s4043_s5 + $0x158] sm:$0xff] }
 0x313   :  { %v4199_v0 = vperm.slane %v4193_v43, 2  ;;  %v1251_v9 = vmul.f32 %v1242_v55, %v3265_v42  ;;  %v940_v14 = vperm.slane %v3197_v12, 2  ;;  %v1305_v26 = vperm.slane %v3456_v10, 2  ;;  %1511 = vmatpush.msrb.mxu2 %v1391_v30 }
 0x314   :  { %v1133_v63 = vadd.f32 %v1127_v38, %v1091_v35  ;;  %v1134_v57 = vadd.f32 %v1128_v59, %v1092_v22  ;;  %v911_v27 = vadd.f32 %v3344_v41, %v3337_v19  ;;  %v1252_v40 = vmul.f32 %v1243_v50, %v1234_v4  ;;  %v4200_v41 = vld [vmem:[#allocation56_spill] sm:$0xff] }
 0x315   :  { %v1190_v61 = vmul.f32 %v4199_v0, %v3245_v36  ;;  %v912_v36 = vadd.f32 %v3365_v54, %v3347_v62  ;;  %v4201_v4 = vperm.slane %v3197_v12, 1  ;;  %v4202_v62 = vperm.slane %v4189_v48, 1 }
 0x316   :  { %v1153_v13 = vadd.f32 %v1147_v24, %v1133_v63  ;;  %v1154_v5 = vadd.f32 %v1148_v6, %v1134_v57  ;;  %v924_v38 = vpop.permute.xlu2 %923  ;;  %v1290_v24 = vpop.permute.xlu1 %1289  ;;  %v4203_v59 = vperm.slane %v4189_v48, 2  ;;  %v4204_v48 = vld [vmem:[#allocation36_spill] sm:$0xff] }
 0x317   :  { %v1060_v8 = vpop.permute.xlu0 %1059  ;;  %v930_v42 = vsel %vm693_vm9, %v924_v38, %v2069_v51  ;;  %v932_v34 = vsel %vm693_vm9, %v3163_v32, %v924_v38  ;;  %v1296_v22 = vsel %vm693_vm9, %v1290_v24, %v2079_v53  ;;  %v1379_v51 = vld [vmem:[%s4043_s5 + $0xf8] sm:$0xff]  ;;  %v1173_v63 = vsel %vm693_vm9, %v4204_v48, %v1164_v7  ;;  %v1390_v38 = vld [vmem:[%s4043_s5 + $0x150] sm:$0xff] }
 0x318   :  { %v1196_v6 = vadd.f32 %v1190_v61, %v1154_v5  ;;  %v1067_v19 = vsel %vm693_vm9, %v1060_v8, %v2033_v21  ;;  %v1069_v58 = vsel %vm693_vm9, %v4200_v41, %v1060_v8  ;;  %v948_v39 = vmul.f32 %v4201_v4, %v932_v34  ;;  %v1363_v21 = vld [vmem:[%s4043_s5 + $0x78] sm:$0xff]  ;;  %v1362_v61 = vld [vmem:[%s4043_s5 + $0x70] sm:$0xff]  ;;  %1487 = vmatpush.msra.mxu1 %v1379_v51 }
 0x319   :  { %v1082_v54 = vmul.f32 %v4202_v62, %v1069_v58  ;;  %v1083_v35 = vmul.f32 %v4203_v59, %v1067_v19  ;;  %v949_v32 = vmul.f32 %v940_v14, %v930_v42  ;;  %v1195_v53 = vadd.f32 %v1189_v17, %v1153_v13  ;;  %1467 = vmatpush.msrb.mxu0 %v1363_v21  ;;  %v1378_v5 = vld [vmem:[%s4043_s5 + $0xf0] sm:$0xff]  ;;  %v1361_v17 = vld [vmem:[%s4043_s5 + $0x68] sm:$0xff] }
 0x31a   :  { %v1258_v57 = vadd.f32 %v1252_v40, %v1196_v6  ;;  %v3510_v0 = vadd.f32 %v948_v39, %v911_v27  ;;  %v4205_v8 = vld [vmem:[#allocation59_spill] sm:$0xff]  ;;  %v1314_v27 = vmul.f32 %v1305_v26, %v1296_v22  ;;  %v1304_v6 = vperm.slane %v3456_v10, 1  ;;  %1488 = vmatpush.msra.mxu1 %v1378_v5  ;;  %1512 = vmatpush.msrb.mxu2 %v1390_v38 }
 0x31b   :  { %v1088_v42 = vadd.f32 %v1082_v54, %v4205_v8  ;;  %v1089_v7 = vadd.f32 %v1083_v35, %v1047_v60  ;;  %v3522_v40 = vadd.f32 %v949_v32, %v912_v36  ;;  %v1257_v34 = vadd.f32 %v1251_v9, %v1195_v53  ;;  %1468 = vmatpush.msrb.mxu0 %v1362_v61  ;;  %v1377_v60 = vld [vmem:[%s4043_s5 + $0xe8] sm:$0xff]  ;;  %v1360_v9 = vld [vmem:[%s4043_s5 + $0x60] sm:$0xff]  ;;  %v1375_v53 = vld [vmem:[%s4043_s5 + $0xd8] sm:$0xff] }
 0x31c   :  { %v1278_v13 = vadd.f32 %v3377_v2, %v1258_v57  ;;  %v1389_v36 = vld [vmem:[%s4043_s5 + $0x148] sm:$0xff]  ;;  %v1303_v58 = vperm.slane %v3456_v10, 0  ;;  %v4206_v2 = vld [vmem:[#allocation25_spill] sm:$0xff]  ;;  %v4207_v4 = vperm.slane %v3168_v49, 2  ;;  %v1186_v62 = vmul.f32 %v1180_v15, %v1173_v63  ;;  %1489 = vmatpush.msra.mxu1 %v1377_v60  ;;  %v1387_v61 = vld [vmem:[%s4043_s5 + $0x138] sm:$0xff] }
 0x31d   :  { %v1130_v19 = vadd.f32 %v1124_v1, %v1088_v42  ;;  %v1131_v41 = vadd.f32 %v1125_v18, %v1089_v7  ;;  %v4208_v54 = vperm.slane %v4193_v43, 2  ;;  %v1276_v49 = vadd.f32 %v3360_v45, %v3282_v56  ;;  %1469 = vmatpush.msrb.mxu0 %v1361_v17  ;;  %v1376_v35 = vld [vmem:[%s4043_s5 + $0xe0] sm:$0xff]  ;;  %1513 = vmatpush.msrb.mxu2 %v1389_v36  ;;  %v1358_v42 = vld [vmem:[%s4043_s5 + $0x50] sm:$0xff]  ;;  %v1357_v36 = vld [vmem:[%s4043_s5 + $0x48] sm:$0xff] }
 0x31e   :  { %v1145_v39 = vmul.f32 %v4207_v4, %v4206_v2  ;;  %v3549_v18 = vadd.f32 %v1314_v27, %v1278_v13  ;;  %v1286_v59 = vpop.permute.xlu2 %1285  ;;  %v1388_v32 = vld [vmem:[%s4043_s5 + $0x140] sm:$0xff]  ;;  %v1277_v51 = vadd.f32 %v3353_v11, %v1257_v34  ;;  %v4210_v48 = vperm.slane %v3105_v47, 2  ;;  %1490 = vmatpush.msra.mxu1 %v1376_v35  ;;  %v1359_v11 = vld [vmem:[%s4043_s5 + $0x58] sm:$0xff]  ;;  %v4211_v47 = vld [vmem:[#allocation62_spill] sm:$0xff] }
 0x31f   :  { %v1187_v1 = vmul.f32 %v4208_v54, %v3435_v25  ;;  %v1150_v15 = vadd.f32 %v3397_v28, %v1130_v19  ;;  %v858_v22 = vpop.permute.xlu0 %857  ;;  %v1298_v43 = vsel %vm693_vm9, %v1286_v59, %v1290_v24  ;;  %v1282_v25 = vpop.permute.xlu1 %1281  ;;  %v4209_v56 = vld [vmem:[#allocation57_spill] sm:$0xff]  ;;  %1470 = vmatpush.msrb.mxu0 %v1360_v9  ;;  %1514 = vmatpush.msrb.mxu2 %v1388_v32  ;;  %v1374_v7 = vld [vmem:[%s4043_s5 + $0xd0] sm:$0xff]  ;;  %v4213_v27 = vperm.slane %v3160_v23, 2  ;;  %v1385_v23 = vld [vmem:[%s4043_s5 + $0x128] sm:$0xff] }
 0x320   :  { %v1151_v21 = vadd.f32 %v1145_v39, %v1131_v41  ;;  %v865_v45 = vsel %vm635_vm8, %v4209_v56, %v858_v22  ;;  %v1313_v30 = vmul.f32 %v1304_v6, %v1298_v43  ;;  %v1300_v28 = vsel %vm693_vm9, %v1282_v25, %v1286_v59  ;;  %v1386_v17 = vld [vmem:[%s4043_s5 + $0x130] sm:$0xff]  ;;  %1491 = vmatpush.msra.mxu1 %v1375_v53  ;;  %v1373_v41 = vld [vmem:[%s4043_s5 + $0xc8] sm:$0xff]  ;;  %v1356_v4 = vld [vmem:[%s4043_s5 + $0x40] sm:$0xff] }
 0x321   :  { %v882_v24 = vmul.f32 %v4210_v48, %v865_v45  ;;  %v1312_v63 = vmul.f32 %v1303_v58, %v1300_v28  ;;  %v1248_v5 = vmul.f32 %v1242_v55, %v4211_v47  ;;  %v1192_v8 = vadd.f32 %v1186_v62, %v1150_v15  ;;  %1471 = vmatpush.msrb.mxu0 %v1359_v11  ;;  %v4212_v13 = vld [vmem:[#allocation43_spill] sm:$0xff]  ;;  %v1372_v39 = vld [vmem:[%s4043_s5 + $0xc0] sm:$0xff]  ;;  %v1383_v59 = vld [vmem:[%s4043_s5 + $0x118] sm:$0xff] }
 0x322   :  { %v1193_v57 = vadd.f32 %v1187_v1, %v1151_v21  ;;  %v3586_v38 = vadd.f32 %v1313_v30, %v1277_v51  ;;  %v903_v55 = vmul.f32 %v4213_v27, %v4212_v13  ;;  %1515 = vmatpush.msrb.mxu2 %v1387_v61  ;;  %1492 = vmatpush.msra.mxu1 %v1374_v7  ;;  %v1384_v9 = vld [vmem:[%s4043_s5 + $0x120] sm:$0xff]  ;;  %v1371_v1 = vld [vmem:[%s4043_s5 + $0xb8] sm:$0xff]  ;;  %v1354_v35 = vld [vmem:[%s4043_s5 + $0x30] sm:$0xff]  ;;  %v2078_v21 = vunpack.i.l.bf16 %v4191_v3 }
 0x323   :  { %v888_v34 = vadd.f32 %v882_v24, %v3308_v33  ;;  %v3601_v60 = vadd.f32 %v1312_v63, %v1276_v49  ;;  %v3606_v19 = vadd.f32 %v1248_v5, %v1192_v8  ;;  %1472 = vmatpush.msrb.mxu0 %v1358_v42  ;;  %v946_v33 = vmul.f32 %v940_v14, %v3369_v16  ;;  %v1355_v16 = vld [vmem:[%s4043_s5 + $0x38] sm:$0xff]  ;;  %v4214_v14 = vld [vmem:[#allocation55_spill] sm:$0xff]  ;;  %v1381_v43 = vld [vmem:[%s4043_s5 + $0x108] sm:$0xff] }
 0x324   :  { %1516 = vmatpush.msrb.mxu2 %v1386_v17  ;;  %1493 = vmatpush.msra.mxu1 %v1373_v41  ;;  %v1370_v32 = vld [vmem:[%s4043_s5 + $0xb0] sm:$0xff]  ;;  %v1352_v25 = vld [vmem:[%s4043_s5 + $0x20] sm:$0xff]  ;;  %v4215_v51 = vld [vmem:[#allocation54_spill] sm:$0xff]  ;;  %v4216_v30 = vperm.slane %v3317_v20, 2  ;;  %v1430_v5 = vmul.f32 %v3522_v40, %v3522_v40  ;;  %v4218_v17 = vperm.slane %v3317_v20, 0 }
 0x325   :  { %v909_v2 = vadd.f32 %v903_v55, %v888_v34  ;;  %1473 = vmatpush.msrb.mxu0 %v1357_v36  ;;  %v1382_v15 = vld [vmem:[%s4043_s5 + $0x110] sm:$0xff]  ;;  %v1368_v56 = vld [vmem:[%s4043_s5 + $0xa0] sm:$0xff]  ;;  %v1351_v3 = vld [vmem:[%s4043_s5 + $0x18] sm:$0xff] }
 0x326   :  { %1517 = vmatpush.msrb.mxu2 %v1385_v23  ;;  %1494 = vmatpush.msra.mxu1 %v1372_v39  ;;  %v1380_v45 = vld [vmem:[%s4043_s5 + $0x100] sm:$0xff]  ;;  %v1269_v28 = vmul.f32 %v4216_v30, %v4215_v51  ;;  %v1367_v63 = vld [vmem:[%s4043_s5 + $0x98] sm:$0xff]  ;;  %v1350_v61 = vld [vmem:[%s4043_s5 + $0x10] sm:$0xff]  ;;  %v1435_v30 = vmul.f32 %v3586_v38, %v3586_v38 }
 0x327   :  { %v3626_v62 = vadd.f32 %v946_v33, %v909_v2  ;;  %v1226_v12 = vpop.permute.xlu0 %1225  ;;  %1474 = vmatpush.msrb.mxu0 %v1356_v4  ;;  %v1366_v47 = vld [vmem:[%s4043_s5 + $0x90] sm:$0xff]  ;;  %v1365_v27 = vld [vmem:[%s4043_s5 + $0x88] sm:$0xff]  ;;  %v1348_v41 = vld [vmem:[%s4043_s5] sm:$0xff]  ;;  %v4220_v33 = vperm.slane %v3317_v20, 1  ;;  %v1429_v20 = vmul.f32 %v3510_v0, %v3510_v0 }
 0x328   :  { %v1233_v54 = vsel %vm635_vm8, %v4214_v14, %v1226_v12  ;;  %1518 = vmatpush.msrb.mxu2 %v1384_v9  ;;  %1495 = vmatpush.msra.mxu1 %v1371_v1  ;;  %v4217_v7 = vld [vmem:[#allocation23_spill] sm:$0xff]  ;;  %v1364_v39 = vld [vmem:[%s4043_s5 + $0x80] sm:$0xff]  ;;  %v1428_v9 = vmul.f32 %v3248_v31, %v3248_v31  ;;  %v1436_v12 = vmul.f32 %v3549_v18, %v3549_v18 }
 0x329   :  { %v1249_v49 = vmul.f32 %v1243_v50, %v1233_v54  ;;  %1475 = vmatpush.msrb.mxu0 %v1355_v16  ;;  %v1369_v50 = vld [vmem:[%s4043_s5 + $0xa8] sm:$0xff]  ;;  %v1416_v42 = vadd.f32 %v3522_v40, %v3626_v62  ;;  %v1267_v13 = vmul.f32 %v4218_v17, %v4217_v7  ;;  %v4219_v23 = vld [vmem:[#allocation19_spill] sm:$0xff] }
 0x32a   :  { %1519 = vmatpush.msrb.mxu2 %v1383_v59  ;;  %1496 = vmatpush.msra.mxu1 %v1370_v32  ;;  %v1268_v2 = vmul.f32 %v4220_v33, %v4219_v23 }
 0x32b   :  { %v1255_v22 = vadd.f32 %v1249_v49, %v1193_v57  ;;  %1476 = vmatpush.msrb.mxu0 %v1354_v35  ;;  %v1427_v57 = vmul.f32 %v3626_v62, %v3626_v62  ;;  %v1273_v4 = vadd.f32 %v1267_v13, %v3222_v52 }
 0x32c   :  { %1520 = vmatpush.msrb.mxu2 %v1382_v15  ;;  %1497 = vmatpush.msra.mxu1 %v1369_v50  ;;  %v1274_v52 = vadd.f32 %v1268_v2, %v3606_v19 }
 0x32d   :  { %1477 = vmatpush.msrb.mxu0 %v1353_v46  ;;  %v1275_v11 = vadd.f32 %v1269_v28, %v1255_v22  ;;  %v1455_v36 = vadd.f32 %v1430_v5, %v1427_v57  ;;  %v4221_v22 = vld [vmem:[#allocation63_spill] sm:$0xff]  ;;  %v1434_v28 = vmul.f32 %v3601_v60, %v3601_v60 }
 0x32e   :  { %1521 = vmatpush.msrb.mxu2 %v1381_v43  ;;  %1498 = vmatpush.msra.mxu1 %v1368_v56  ;;  %v1425_v19 = vmul.f32 %v4221_v22, %v4221_v22  ;;  %v1398_v46 = vadd.f32 %v3248_v31, %v4221_v22 }
 0x32f   :  { %v1288_v48 = vpop.permute.xlu0 %1287  ;;  %1478 = vmatpush.msrb.mxu0 %v1352_v25  ;;  %v1446_v25 = vadd.f32 %v1429_v20, %v1426_v44 }
 0x330   :  { %v1295_v24 = vsel %vm693_vm9, %v1288_v48, %v2078_v21  ;;  %1522 = vmatpush.msrb.mxu2 %v1380_v45  ;;  %1499 = vmatpush.msra.mxu1 %v1367_v63 }
 0x331   :  { %v1311_v53 = vmul.f32 %v1305_v26, %v1295_v24  ;;  %1479 = vmatpush.msrb.mxu0 %v1351_v3  ;;  %v1349_v26 = vld [vmem:[%s4043_s5 + $0x8] sm:$0xff] }
 0x332   :  { %1500 = vmatpush.msra.mxu1 %v1366_v47 }
 0x333   :  { %v3693_v8 = vadd.f32 %v1311_v53, %v1275_v11  ;;  %1480 = vmatpush.msrb.mxu0 %v1350_v61 }
 0x334   :  { %1501 = vmatpush.msra.mxu1 %v1365_v27 }
 0x335   :  { %v1417_v55 = vadd.f32 %v1416_v42, %v3693_v8  ;;  %v1433_v34 = vmul.f32 %v3693_v8, %v3693_v8  ;;  %1481 = vmatpush.msrb.mxu0 %v1349_v26 }
 0x336   :  { %1502 = vmatpush.msra.mxu1 %v1364_v39 }
 0x337   :  { %v1418_v16 = vadd.f32 %v1417_v55, %v3549_v18  ;;  %v1456_v14 = vadd.f32 %v1455_v36, %v1433_v34  ;;  %v1284_v54 = vpop.permute.xlu0 %1283  ;;  %1482 = vmatpush.msrb.mxu0 %v1348_v41 }
 0x338   :  { %v1297_v1 = vsel %vm693_vm9, %v1284_v54, %v1288_v48  ;;  %v1299_v59 = vsel %vm693_vm9, %v3207_v29, %v1284_v54  ;;  %v1407_v29 = vadd.f32 %v3510_v0, %v3390_v37 }
 0x339   :  { %v1419_v49 = vrot.slane %v1418_v16, 4  ;;  %v1457_v35 = vadd.f32 %v1456_v14, %v1436_v12  ;;  %v1309_v32 = vmul.f32 %v1303_v58, %v1299_v59  ;;  %v1310_v15 = vmul.f32 %v1304_v6, %v1297_v1 }
 0x33a   :  { %v1437_v6 = vadd.f32 %v1428_v9, %v1425_v19 }
 0x33b   :  { %v3744_v50 = vadd.f32 %v1309_v32, %v1273_v4  ;;  %v3746_v43 = vadd.f32 %v1310_v15, %v1274_v52  ;;  %v1420_v58 = vadd.f32 %v1419_v49, %v1418_v16  ;;  %v1458_v10 = vrot.slane %v1457_v35, 4 }
 0x33d   :  { %v1399_v21 = vadd.f32 %v1398_v46, %v3744_v50  ;;  %v1408_v56 = vadd.f32 %v1407_v29, %v3746_v43  ;;  %v1431_v45 = vmul.f32 %v3744_v50, %v3744_v50  ;;  %v1432_v51 = vmul.f32 %v3746_v43, %v3746_v43 }
 0x33e   :  { %v1421_v48 = vrot.slane %v1420_v58, 2  ;;  %v1459_v3 = vadd.f32 %v1458_v10, %v1457_v35 }
 0x33f   :  { %v1400_v24 = vadd.f32 %v1399_v21, %v3601_v60  ;;  %v1409_v63 = vadd.f32 %v1408_v56, %v3586_v38  ;;  %v1438_v57 = vadd.f32 %v1437_v6, %v1431_v45  ;;  %v1447_v11 = vadd.f32 %v1446_v25, %v1432_v51 }
 0x340   :  { %v1422_v53 = vadd.f32 %v1421_v48, %v1420_v58  ;;  %v1460_v61 = vrot.slane %v1459_v3, 2 }
 0x341   :  { %v1410_v47 = vrot.slane %v1409_v63, 4  ;;  %v1448_v5 = vadd.f32 %v1447_v11, %v1435_v30  ;;  %v1401_v42 = vrot.slane %v1400_v24, 4  ;;  %v1439_v26 = vadd.f32 %v1438_v57, %v1434_v28  ;;  %v1345_v30 = vld [vmem:[%s4042_s4 + $0x30] sm:$0xff]  ;;  %v1342_v28 = vld [vmem:[%s4042_s4 + $0x18] sm:$0xff]  ;;  %v1343_v57 = vld [vmem:[%s4042_s4 + $0x20] sm:$0xff] }
 0x342   :  { %v1423_v7 = vrot.slane %v1422_v53, 1  ;;  %v1461_v17 = vadd.f32 %v1460_v61, %v1459_v3  ;;  %1573 = vmatpush.msrb.mxu3 %v1345_v30  ;;  %v1339_v3 = vld [vmem:[%s4042_s4] sm:$0xff]  ;;  %v1340_v11 = vld [vmem:[%s4042_s4 + $0x8] sm:$0xff]  ;;  %v1717_v30 = vld [vmem:[%s4041_s3 + $0x158] sm:$0xff] }
 0x343   :  { %v1402_v13 = vadd.f32 %v1401_v42, %v1400_v24  ;;  %v1440_v27 = vrot.slane %v1439_v26, 4  ;;  %v1411_v55 = vadd.f32 %v1410_v47, %v1409_v63  ;;  %v1449_v34 = vrot.slane %v1448_v5, 4  ;;  %v1346_v24 = vld [vmem:[%s4042_s4 + $0x38] sm:$0xff] }
 0x344   :  { %v1462_v36 = vrot.slane %v1461_v17, 1  ;;  %v1424_v4 = vadd.f32 %v1423_v7, %v1422_v53  ;;  %1574 = vmatpush.msrb.mxu3 %v1342_v28  ;;  %v1705_v7 = vld [vmem:[%s4041_s3 + $0xf8] sm:$0xff]  ;;  %v1676_v28 = vld [vmem:[%s4041_s3 + $0x10] sm:$0xff] }
 0x345   :  { %v1403_v41 = vrot.slane %v1402_v13, 2  ;;  %v1441_v23 = vadd.f32 %v1440_v27, %v1439_v26  ;;  %v1412_v33 = vrot.slane %v1411_v55, 2  ;;  %v1450_v2 = vadd.f32 %v1449_v34, %v1448_v5  ;;  %v2081_v26 = vld [vmem:[%s4048_s10] ss:$0 sm:$0xff]  ;;  %1751 = vmatpush.msra.mxu0 %v1705_v7  ;;  %v1703_v34 = vld [vmem:[%s4041_s3 + $0xe8] sm:$0xff] }
 0x346   :  { %v1463_v39 = vadd.f32 %v1462_v36, %v1461_v17  ;;  %1575 = vmatpush.msrb.mxu3 %v1339_v3  ;;  %v1716_v3 = vld [vmem:[%s4041_s3 + $0x150] sm:$0xff]  ;;  %v1691_v7 = vld [vmem:[%s4041_s3 + $0x88] sm:$0xff] }
 0x347   :  { %v1404_v9 = vadd.f32 %v1403_v41, %v1402_v13  ;;  %v1442_v12 = vrot.slane %v1441_v23, 2  ;;  %v1413_v16 = vadd.f32 %v1412_v33, %v1411_v55  ;;  %v1451_v14 = vrot.slane %v1450_v2, 2  ;;  %v1704_v13 = vld [vmem:[%s4041_s3 + $0xf0] sm:$0xff]  ;;  %v1702_v41 = vld [vmem:[%s4041_s3 + $0xe0] sm:$0xff] }
 0x348   :  { %v1466_v54 = vsel %vm346_vm1, %v1424_v4, %v1463_v39  ;;  %1593 = vmatpush.msra.mxu3 %v1346_v24  ;;  %1752 = vmatpush.msra.mxu0 %v1704_v13  ;;  %v3805_v4 = vld [vmem:[%s4041_s3 + $0x178] sm:$0xff]  ;;  %v1675_v24 = vld [vmem:[%s4041_s3 + $0x8] sm:$0xff]  ;;  %v1690_v13 = vld [vmem:[%s4041_s3 + $0x80] sm:$0xff] }
 0x349   :  { %1523 = vmatmul.f32.vlgmr.msrb.gmra.mxu2 %v1466_v54  ;;  %v1405_v20 = vrot.slane %v1404_v9, 1  ;;  %v1443_v52 = vadd.f32 %v1442_v12, %v1441_v23  ;;  %v1414_v1 = vrot.slane %v1413_v16, 1  ;;  %v1452_v59 = vadd.f32 %v1451_v14, %v1450_v2  ;;  %v1397_v23 = vld [vmem:[%s4049_s11] sm:$0x1]  ;;  %v1701_v2 = vld [vmem:[%s4041_s3 + $0xd8] sm:$0xff]  ;;  %1994 = vmatpush.msrb.mxu1 %v3805_v4  ;;  %v3814_v12 = vld [vmem:[%s4041_s3 + $0x170] sm:$0xff] }
 0x34a   :  { %1594 = vmatpush.msra.mxu3 %v1343_v57  ;;  %1753 = vmatpush.msra.mxu0 %v1703_v34  ;;  %v1347_v14 = vld [vmem:[%s4042_s4 + $0x40] sm:$0xff]  ;;  %v1715_v57 = vld [vmem:[%s4041_s3 + $0x148] sm:$0xff]  ;;  %v1708_v34 = vld [vmem:[%s4041_s3 + $0x110] sm:$0xff] }
 0x34b   :  { %v1444_v49 = vrot.slane %v1443_v52, 1  ;;  %v1453_v35 = vrot.slane %v1452_v59, 1  ;;  %v1406_v32 = vadd.f32 %v1405_v20, %v1404_v9  ;;  %v1415_v19 = vadd.f32 %v1414_v1, %v1413_v16  ;;  %v1700_v9 = vld [vmem:[%s4041_s3 + $0xd0] sm:$0xff]  ;;  %1995 = vmatpush.msrb.mxu1 %v3814_v12  ;;  %v1344_v20 = vld [vmem:[%s4042_s4 + $0x28] sm:$0xff]  ;;  %v1689_v1 = vld [vmem:[%s4041_s3 + $0x78] sm:$0xff] }
 0x34c   :  { %1595 = vmatpush.msra.mxu3 %v1340_v11  ;;  %1754 = vmatpush.msra.mxu0 %v1702_v41  ;;  %v1674_v11 = vld [vmem:[%s4041_s3] sm:$0xff] }
 0x34d   :  { %v1445_v15 = vadd.f32 %v1444_v49, %v1443_v52  ;;  %v1454_v46 = vadd.f32 %v1453_v35, %v1452_v59  ;;  %v1341_v52 = vld [vmem:[%s4042_s4 + $0x10] sm:$0xff]  ;;  %v1687_v49 = vld [vmem:[%s4041_s3 + $0x68] sm:$0xff]  ;;  %v1686_v35 = vld [vmem:[%s4041_s3 + $0x60] sm:$0xff] }
 0x34e   :  { %1755 = vmatpush.msra.mxu0 %v1701_v2  ;;  %v1688_v59 = vld [vmem:[%s4041_s3 + $0x70] sm:$0xff]  ;;  %v1706_v41 = vld [vmem:[%s4041_s3 + $0x100] sm:$0xff] }
 0x34f   :  { %v1464_v44 = vsel %vm346_vm1, %v1406_v32, %v1445_v15  ;;  %v1465_v29 = vsel %vm346_vm1, %v1415_v19, %v1454_v46  ;;  %v1685_v32 = vld [vmem:[%s4041_s3 + $0x58] sm:$0xff]  ;;  %v1684_v15 = vld [vmem:[%s4041_s3 + $0x50] sm:$0xff]  ;;  %v1683_v19 = vld [vmem:[%s4041_s3 + $0x48] sm:$0xff] }
 0x350   :  { %1483 = vmatmul.f32.vlgmr.msrb.gmra.mxu0 %v1464_v44  ;;  %1503 = vmatmul.f32.vlgmr.msra.gmra.mxu1 %v1465_v29  ;;  %v1682_v46 = vld [vmem:[%s4041_s3 + $0x40] sm:$0xff]  ;;  %v1681_v44 = vld [vmem:[%s4041_s3 + $0x38] sm:$0xff]  ;;  %v1680_v29 = vld [vmem:[%s4041_s3 + $0x30] sm:$0xff] }
 0x351   :  { %1756 = vmatpush.msra.mxu0 %v1700_v9 }
 0x3cc   :  { %v1524_v25 = vpop.f32.mrf.mxu2 }
 0x3cd   :  { %v1484_v58 = vpop.f32.mrf.mxu0  ;;  %v1504_v10 = vpop.f32.mrf.mxu1 }
 0x3ce   :  { %v1505_v6 = vadd.f32 %v1504_v10, %v1484_v58  ;;  %v1679_v58 = vld [vmem:[%s4041_s3 + $0x28] sm:$0xff] }
 0x3cf   :  { %v1699_v10 = vld [vmem:[%s4041_s3 + $0xc8] sm:$0xff] }
 0x3d0   :  { %v1525_v21 = vadd.f32 %v1524_v25, %v1505_v6  ;;  %v1719_v6 = vld [vmem:[%s4041_s3 + $0x168] sm:$0xff]  ;;  %1757 = vmatpush.msra.mxu0 %v1699_v10  ;;  %v1678_v25 = vld [vmem:[%s4041_s3 + $0x20] sm:$0xff] }
 0x3d1   :  { %1996 = vmatpush.msrb.mxu1 %v1719_v6 }
 0x3d2   :  { %v1527_v56 = vmul.f32 0.001953125, %v1525_v21  ;;  %v1698_v21 = vld [vmem:[%s4041_s3 + $0xc0] sm:$0xff] }
 0x3d3   :  { %1758 = vmatpush.msra.mxu0 %v1698_v21 }
 0x3d4   :  { %v1528_v45 = vmul.f32 %v1527_v56, %v1527_v56 }
 0x3d6   :  { %v1530_v51 = vrot.slane %v1528_v45, 7  ;;  %v1677_v45 = vld [vmem:[%s4041_s3 + $0x18] sm:$0xff] }
 0x3d8   :  { %v1532_v48 = vsub.f32 %v1527_v56, %v1530_v51  ;;  %v1697_v51 = vld [vmem:[%s4041_s3 + $0xb8] sm:$0xff] }
 0x3d9   :  { %1759 = vmatpush.msra.mxu0 %v1697_v51 }
 0x3da   :  { %v1533_v63 = vadd.f32 1e-05, %v1532_v48  ;;  %v1696_v48 = vld [vmem:[%s4041_s3 + $0xb0] sm:$0xff] }
 0x3db   :  { %1760 = vmatpush.msra.mxu0 %v1696_v48 }
 0x3dc   :  { %2085 = vrsqrt.f32 %v1533_v63  ;;  %vm1540_vm11 = vweird.f32 %v1533_v63 }
 0x3e2   :  { %v2086_v53 = vpop.eup %2085 }
 0x3e3   :  { %v1535_v61 = vmul.f32 %v2086_v53, %v1533_v63  ;;  %vm1541_vm10 = vweird.f32 %v2086_v53  ;;  %v1695_v63 = vld [vmem:[%s4041_s3 + $0xa8] sm:$0xff] }
 0x3e4   :  { %vm1542_vm12 = vmor %vm1540_vm11, %vm1541_vm10  ;;  %1761 = vmatpush.msra.mxu0 %v1695_v63 }
 0x3e5   :  { %v1536_v47 = vmul.f32 %v2086_v53, %v1535_v61  ;;  %v1714_v61 = vld [vmem:[%s4041_s3 + $0x140] sm:$0xff] }
 0x3e7   :  { %v1537_v5 = vmul.f32 0.5, %v1536_v47  ;;  %v1693_v47 = vld [vmem:[%s4041_s3 + $0x98] sm:$0xff] }
 0x3e9   :  { %v1538_v42 = vsub.f32 1.5, %v1537_v5  ;;  %v1713_v5 = vld [vmem:[%s4041_s3 + $0x138] sm:$0xff] }
 0x3eb   :  { %v1539_v17 = vmul.f32 %v2086_v53, %v1538_v42  ;;  %v1692_v42 = vld [vmem:[%s4041_s3 + $0x90] sm:$0xff] }
 0x3ed   :  { %v1543_v27 = vsel %vm1542_vm12, %v2086_v53, %v1539_v17  ;;  %v1694_v53 = vld [vmem:[%s4041_s3 + $0xa0] sm:$0xff]  ;;  %v1711_v17 = vld [vmem:[%s4041_s3 + $0x128] sm:$0xff] }
 0x3ee   :  { %v1547_v55 = vmul.f32 %v2081_v26, %v1543_v27  ;;  %1762 = vmatpush.msra.mxu0 %v1694_v53  ;;  %v1712_v26 = vld [vmem:[%s4041_s3 + $0x130] sm:$0xff]  ;;  %v1710_v27 = vld [vmem:[%s4041_s3 + $0x120] sm:$0xff] }
 0x3f0   :  { %v1549_v36 = vrot.slane %v1547_v55, 1  ;;  %1763 = vmatpush.msra.mxu0 %v1693_v47  ;;  %v1709_v55 = vld [vmem:[%s4041_s3 + $0x118] sm:$0xff] }
 0x3f2   :  { %v1551_v33 = vmul.f32 %v1549_v36, %v1527_v56  ;;  %v1718_v56 = vld [vmem:[%s4041_s3 + $0x160] sm:$0xff]  ;;  %1764 = vmatpush.msra.mxu0 %v1692_v42 }
 0x3f3   :  { %1997 = vmatpush.msrb.mxu1 %v1718_v56 }
 0x3f4   :  { %v1552_v39 = vsub.f32 %v1397_v23, %v1551_v33  ;;  %1765 = vmatpush.msra.mxu0 %v1691_v7 }
 0x3f5   :  { %1998 = vmatpush.msrb.mxu1 %v1717_v30 }
 0x3f6   :  { %v1554_v16 = vperm.slane %v1552_v39, 0  ;;  %1766 = vmatpush.msra.mxu0 %v1690_v13 }
 0x3f7   :  { %1999 = vmatpush.msrb.mxu1 %v1716_v3 }
 0x3f8   :  { %v1556_v54 = vsel %vm346_vm1, %v1549_v36, %v1554_v16  ;;  %1780 = vmatpush.msrb.mxu0 %v3805_v4  ;;  %v1707_v36 = vld [vmem:[%s4041_s3 + $0x108] sm:$0xff] }
 0x3f9   :  { %1990 = vmatmul.msk.f32.vlgmr.msrb.gmra.mxu3 %vm440_vm5, %v1556_v54  ;;  %2000 = vmatpush.msrb.mxu1 %v1715_v57 }
 0x3fa   :  { %1613 = vmatpush.msrb.mxu3 %v1347_v14  ;;  %1781 = vmatpush.msrb.mxu0 %v3814_v12 }
 0x3fb   :  { %2001 = vmatpush.msrb.mxu1 %v1714_v61 }
 0x3fc   :  { %1614 = vmatpush.msrb.mxu3 %v1344_v20  ;;  %1782 = vmatpush.msrb.mxu0 %v1719_v6 }
 0x3fd   :  { %2002 = vmatpush.msrb.mxu1 %v1713_v5 }
 0x3fe   :  { %1615 = vmatpush.msrb.mxu3 %v1341_v52  ;;  %1783 = vmatpush.msrb.mxu0 %v1718_v56 }
 0x3ff   :  { %2003 = vmatpush.msrb.mxu1 %v1712_v26 }
 0x400   :  { %1784 = vmatpush.msrb.mxu0 %v1717_v30 }
 0x401   :  { %1991 = vmatmul.msk.f32.vlgmr.msra.gmra.mxu3 %vm440_vm5, %v1556_v54  ;;  %2004 = vmatpush.msrb.mxu1 %v1711_v17 }
 0x402   :  { %1722 = vmatpush.msra.mxu3 %v1689_v1  ;;  %1785 = vmatpush.msrb.mxu0 %v1716_v3 }
 0x403   :  { %2005 = vmatpush.msrb.mxu1 %v1710_v27 }
 0x404   :  { %1723 = vmatpush.msra.mxu3 %v1688_v59  ;;  %1786 = vmatpush.msrb.mxu0 %v1715_v57 }
 0x405   :  { %2006 = vmatpush.msrb.mxu1 %v1709_v55 }
 0x406   :  { %1724 = vmatpush.msra.mxu3 %v1687_v49  ;;  %1787 = vmatpush.msrb.mxu0 %v1714_v61 }
 0x407   :  { %2007 = vmatpush.msrb.mxu1 %v1708_v34 }
 0x408   :  { %1725 = vmatpush.msra.mxu3 %v1686_v35  ;;  %1788 = vmatpush.msrb.mxu0 %v1713_v5 }
 0x409   :  { %1992 = vmatmul.msk.f32.vlgmr.msrb.gmra.mxu3 %vm440_vm5, %v1556_v54  ;;  %2008 = vmatpush.msrb.mxu1 %v1707_v36 }
 0x40a   :  { %1726 = vmatpush.msra.mxu3 %v1685_v32  ;;  %1789 = vmatpush.msrb.mxu0 %v1712_v26 }
 0x40b   :  { %2009 = vmatpush.msrb.mxu1 %v1706_v41 }
 0x40c   :  { %1727 = vmatpush.msra.mxu3 %v1684_v15  ;;  %1790 = vmatpush.msrb.mxu0 %v1711_v17 }
 0x40e   :  { %1728 = vmatpush.msra.mxu3 %v1683_v19  ;;  %1791 = vmatpush.msrb.mxu0 %v1710_v27 }
 0x410   :  { %1729 = vmatpush.msra.mxu3 %v1682_v46  ;;  %1792 = vmatpush.msrb.mxu0 %v1709_v55  ;;  %v1825_v55 = vld [vmem:[%s4045_s7 + $0x78] sm:$0xff] }
 0x411   :  { %1851 = vmatpush.msra.mxu2 %v1825_v55 }
 0x412   :  { %1730 = vmatpush.msra.mxu3 %v1681_v44  ;;  %1793 = vmatpush.msrb.mxu0 %v1708_v34 }
 0x414   :  { %1731 = vmatpush.msra.mxu3 %v1680_v29  ;;  %1794 = vmatpush.msrb.mxu0 %v1707_v36 }
 0x416   :  { %1732 = vmatpush.msra.mxu3 %v1679_v58  ;;  %1795 = vmatpush.msrb.mxu0 %v1706_v41  ;;  %v1822_v41 = vld [vmem:[%s4045_s7 + $0x60] sm:$0xff] }
 0x418   :  { %1733 = vmatpush.msra.mxu3 %v1678_v25 }
 0x41a   :  { %1734 = vmatpush.msra.mxu3 %v1677_v45 }
 0x41c   :  { %1735 = vmatpush.msra.mxu3 %v1676_v28 }
 0x41e   :  { %1736 = vmatpush.msra.mxu3 %v1675_v24 }
 0x420   :  { %1737 = vmatpush.msra.mxu3 %v1674_v11 }
 0x47c   :  { %v1577_v23 = vpop.f32.mrf.mxu3 }
 0x47d   :  { %v1620_v33 = vperm.slane %v1577_v23, 0  ;;  %v1635_v4 = vperm.slane %v1577_v23, 1 }
 0x47f   :  { %v1623_v2 = vmul.f32 %v1620_v33, %v4221_v22  ;;  %v1626_v9 = vmul.f32 %v1620_v33, %v3248_v31  ;;  %v1629_v22 = vmul.f32 %v1620_v33, %v3744_v50  ;;  %v1632_v50 = vmul.f32 %v1620_v33, %v3601_v60  ;;  %v1821_v33 = vld [vmem:[%s4045_s7 + $0x58] sm:$0xff] }
 0x481   :  { %v1638_v39 = vadd.f32 %v1635_v4, %v1623_v2  ;;  %v1641_v20 = vadd.f32 %v1635_v4, %v1626_v9  ;;  %v1644_v15 = vadd.f32 %v1635_v4, %v1629_v22  ;;  %v1647_v56 = vadd.f32 %v1635_v4, %v1632_v50  ;;  %v1819_v9 = vld [vmem:[%s4045_s7 + $0x48] sm:$0xff]  ;;  %v1813_v22 = vld [vmem:[%s4045_s7 + $0x18] sm:$0xff] }
 0x483   :  { %v1650_v12 = vmax.f32 %v1638_v39, 0.0  ;;  %v1653_v59 = vmax.f32 %v1641_v20, 0.0  ;;  %v1656_v10 = vmax.f32 %v1644_v15, 0.0  ;;  %v1820_v39 = vld [vmem:[%s4045_s7 + $0x50] sm:$0xff]  ;;  %v1811_v15 = vld [vmem:[%s4045_s7 + $0x8] sm:$0xff] }
 0x484   :  { %v1597_v16 = vpop.f32.mrf.mxu3 }
 0x485   :  { %v1621_v14 = vperm.slane %v1597_v16, 0  ;;  %v1662_v54 = vmin.f32 %v1650_v12, 6.0  ;;  %v1636_v1 = vperm.slane %v1597_v16, 1  ;;  %v1665_v46 = vmin.f32 %v1653_v59, 6.0  ;;  %v1818_v12 = vld [vmem:[%s4045_s7 + $0x40] sm:$0xff]  ;;  %v1817_v16 = vld [vmem:[%s4045_s7 + $0x38] sm:$0xff] }
 0x486   :  { %v1668_v45 = vmin.f32 %v1656_v10, 6.0 }
 0x487   :  { %v1624_v52 = vmul.f32 %v1621_v14, %v3390_v37  ;;  %1738 = vmatmul.f32.vlgmr.msra.gmra.mxu3 %v1662_v54  ;;  %v1627_v35 = vmul.f32 %v1621_v14, %v3510_v0  ;;  %v1630_v25 = vmul.f32 %v1621_v14, %v3746_v43  ;;  %v1633_v60 = vmul.f32 %v1621_v14, %v3586_v38  ;;  %v1816_v54 = vld [vmem:[%s4045_s7 + $0x30] sm:$0xff] }
 0x489   :  { %v1639_v49 = vadd.f32 %v1636_v1, %v1624_v52  ;;  %v1642_v29 = vadd.f32 %v1636_v1, %v1627_v35  ;;  %v1645_v28 = vadd.f32 %v1636_v1, %v1630_v25  ;;  %v1648_v63 = vadd.f32 %v1636_v1, %v1633_v60  ;;  %v1815_v52 = vld [vmem:[%s4045_s7 + $0x28] sm:$0xff]  ;;  %v1814_v1 = vld [vmem:[%s4045_s7 + $0x20] sm:$0xff]  ;;  %v1812_v35 = vld [vmem:[%s4045_s7 + $0x10] sm:$0xff] }
 0x48b   :  { %v1651_v31 = vmax.f32 %v1639_v49, 0.0  ;;  %v1654_v0 = vmax.f32 %v1642_v29, 0.0  ;;  %v1657_v48 = vmax.f32 %v1645_v28, 0.0  ;;  %v1660_v57 = vmax.f32 %v1648_v63, 0.0  ;;  %v1810_v29 = vld [vmem:[%s4045_s7] sm:$0xff] }
 0x48c   :  { %v1617_v32 = vpop.f32.mrf.mxu3 }
 0x48d   :  { %v1622_v19 = vperm.slane %v1617_v32, 0  ;;  %v1663_v44 = vmin.f32 %v1651_v31, 6.0  ;;  %v1637_v58 = vperm.slane %v1617_v32, 1  ;;  %v1666_v51 = vmin.f32 %v1654_v0, 6.0 }
 0x48e   :  { %v1669_v24 = vmin.f32 %v1657_v48, 6.0  ;;  %v1672_v11 = vmin.f32 %v1660_v57, 6.0 }
 0x48f   :  { %v1634_v37 = vmul.f32 %v1622_v19, %v3549_v18  ;;  %1741 = vmatmul.f32.gmra.mxu3 %v1665_v46  ;;  %1767 = vmatmul.f32.vlgmr.msra.gmra.mxu0 %v1663_v44  ;;  %v1659_v18 = vmax.f32 %v1647_v56, 0.0  ;;  %v1625_v43 = vmul.f32 %v1622_v19, %v3626_v62  ;;  %v1628_v47 = vmul.f32 %v1622_v19, %v3522_v40  ;;  %v1824_v40 = vld [vmem:[%s4045_s7 + $0x70] sm:$0xff] }
 0x490   :  { %v1631_v38 = vmul.f32 %v1622_v19, %v3693_v8  ;;  %v1823_v8 = vld [vmem:[%s4045_s7 + $0x68] sm:$0xff]  ;;  %1852 = vmatpush.msra.mxu2 %v1824_v40 }
 0x491   :  { %v1649_v6 = vadd.f32 %v1637_v58, %v1634_v37  ;;  %v1671_v3 = vmin.f32 %v1659_v18, 6.0  ;;  %v1640_v53 = vadd.f32 %v1637_v58, %v1625_v43  ;;  %v1643_v42 = vadd.f32 %v1637_v58, %v1628_v47 }
 0x492   :  { %v1646_v17 = vadd.f32 %v1637_v58, %v1631_v38  ;;  %1853 = vmatpush.msra.mxu2 %v1823_v8 }
 0x493   :  { %v1661_v21 = vmax.f32 %v1649_v6, 0.0  ;;  %v1652_v61 = vmax.f32 %v1640_v53, 0.0  ;;  %v1655_v26 = vmax.f32 %v1643_v42, 0.0 }
 0x494   :  { %v1658_v13 = vmax.f32 %v1646_v17, 0.0  ;;  %1854 = vmatpush.msra.mxu2 %v1822_v41 }
 0x495   :  { %v1673_v30 = vmin.f32 %v1661_v21, 6.0  ;;  %v1664_v5 = vmin.f32 %v1652_v61, 6.0  ;;  %v1667_v7 = vmin.f32 %v1655_v26, 6.0 }
 0x496   :  { %v1670_v27 = vmin.f32 %v1658_v13, 6.0  ;;  %1855 = vmatpush.msra.mxu2 %v1821_v33 }
 0x497   :  { %1744 = vmatmul.f32.gmra.mxu3 %v1668_v45  ;;  %1770 = vmatmul.f32.gmra.mxu0 %v1666_v51 }
 0x498   :  { %1805 = vmatmul.f32.vlgmr.msrb.gmra.mxu1 %v1673_v30  ;;  %1856 = vmatpush.msra.mxu2 %v1820_v39 }
 0x49a   :  { %1857 = vmatpush.msra.mxu2 %v1819_v9  ;;  %v1827_v9 = vld [vmem:[%s4051_s13] sm:$0x1] }
 0x49c   :  { %1858 = vmatpush.msra.mxu2 %v1818_v12 }
 0x49e   :  { %1859 = vmatpush.msra.mxu2 %v1817_v16 }
 0x49f   :  { %1747 = vmatmul.f32.gmra.mxu3 %v1671_v3  ;;  %1773 = vmatmul.f32.gmra.mxu0 %v1669_v24 }
 0x4a0   :  { %1860 = vmatpush.msra.mxu2 %v1816_v54 }
 0x4a2   :  { %1861 = vmatpush.msra.mxu2 %v1815_v52 }
 0x4a4   :  { %1862 = vmatpush.msra.mxu2 %v1814_v1 }
 0x4a6   :  { %1863 = vmatpush.msra.mxu2 %v1813_v22 }
 0x4a7   :  { %1776 = vmatmul.f32.gmra.mxu0 %v1672_v11 }
 0x4a8   :  { %1864 = vmatpush.msra.mxu2 %v1812_v35 }
 0x4aa   :  { %1865 = vmatpush.msra.mxu2 %v1811_v15 }
 0x4ac   :  { %1866 = vmatpush.msra.mxu2 %v1810_v29 }
 0x4af   :  { %1796 = vmatmul.f32.vlgmr.msrb.gmra.mxu0 %v1664_v5 }
 0x4b7   :  { %1799 = vmatmul.f32.gmra.mxu0 %v1667_v7 }
 0x4bf   :  { %1802 = vmatmul.f32.gmra.mxu0 %v1670_v27  ;;  %v1809_v27 = vld [vmem:[#allocation9] sm:$0xff] }
 0x4c0   :  { %1920 = vmatpush.msrb.mxu2 %v1809_v27 }
 0x50a   :  { %v1739_v36 = vpop.f32.mrf.mxu3 }
 0x50c   :  { %v1768_v62 = vpop.f32.mrf.mxu0 }
 0x50d   :  { %v1769_v31 = vadd.f32 %v1768_v62, %v1739_v36 }
 0x512   :  { %v1742_v2 = vpop.f32.mrf.mxu3 }
 0x514   :  { %v1771_v34 = vpop.f32.mrf.mxu0 }
 0x515   :  { %v1772_v49 = vadd.f32 %v1771_v34, %v1742_v2  ;;  %v1806_v50 = vpop.f32.mrf.mxu1 }
 0x51a   :  { %v1745_v20 = vpop.f32.mrf.mxu3 }
 0x51c   :  { %v1774_v23 = vpop.f32.mrf.mxu0 }
 0x51d   :  { %v1775_v37 = vadd.f32 %v1774_v23, %v1745_v20  ;;  %v2082_v23 = vld [vmem:[%s4050_s12] ss:$0 sm:$0xff]  ;;  %s2200_s12 = smov [#allocation10]  }
 0x51e   :  { %s1943_s13 = sshll.u32 %s2200_s12, 4  ;;  %s1944_s13 = int_to_ptr.vmem [resolvable:$true] %s1943_s13 }
 0x522   :  { %v1748_v19 = vpop.f32.mrf.mxu3 }
 0x524   :  { %v1777_v4 = vpop.f32.mrf.mxu0 }
 0x525   :  { %v1778_v46 = vadd.f32 %v1777_v4, %v1748_v19 }
 0x527   :  { %v1807_v0 = vadd.f32 %v1806_v50, %v1778_v46 }
 0x529   :  { %v1840_v30 = vmul.f32 %v1807_v0, %v1807_v0 }
 0x52c   :  { %v1797_v14 = vpop.f32.mrf.mxu0 }
 0x52d   :  { %v4011_v44 = vadd.f32 %v1797_v14, %v1769_v31 }
 0x52f   :  { %v1837_v6 = vmul.f32 %v4011_v44, %v4011_v44 }
 0x534   :  { %v1800_v59 = vpop.f32.mrf.mxu0 }
 0x535   :  { %v4006_v32 = vadd.f32 %v1800_v59, %v1772_v49 }
 0x537   :  { %v1838_v58 = vmul.f32 %v4006_v32, %v4006_v32  ;;  %v1828_v25 = vadd.f32 %v4006_v32, %v4011_v44 }
 0x539   :  { %v1841_v56 = vadd.f32 %v1838_v58, %v1837_v6 }
 0x53c   :  { %v1803_v10 = vpop.f32.mrf.mxu0 }
 0x53d   :  { %v1804_v21 = vadd.f32 %v1803_v10, %v1775_v37 }
 0x53f   :  { %v1829_v45 = vadd.f32 %v1828_v25, %v1804_v21  ;;  %v1839_v51 = vmul.f32 %v1804_v21, %v1804_v21 }
 0x541   :  { %v1830_v28 = vadd.f32 %v1829_v45, %v1807_v0  ;;  %v1842_v18 = vadd.f32 %v1841_v56, %v1839_v51 }
 0x543   :  { %v1831_v48 = vrot.slane %v1830_v28, 4  ;;  %v1843_v60 = vadd.f32 %v1842_v18, %v1840_v30 }
 0x545   :  { %v1832_v3 = vadd.f32 %v1831_v48, %v1830_v28  ;;  %v1844_v24 = vrot.slane %v1843_v60, 4 }
 0x547   :  { %v1833_v63 = vrot.slane %v1832_v3, 2  ;;  %v1845_v43 = vadd.f32 %v1844_v24, %v1843_v60 }
 0x549   :  { %v1834_v57 = vadd.f32 %v1833_v63, %v1832_v3  ;;  %v1846_v11 = vrot.slane %v1845_v43, 2 }
 0x54b   :  { %v1835_v53 = vrot.slane %v1834_v57, 1  ;;  %v1847_v61 = vadd.f32 %v1846_v11, %v1845_v43 }
 0x54d   :  { %v1848_v47 = vrot.slane %v1847_v61, 1  ;;  %v1836_v5 = vadd.f32 %v1835_v53, %v1834_v57 }
 0x54f   :  { %v1849_v42 = vadd.f32 %v1848_v47, %v1847_v61 }
 0x551   :  { %v1850_v26 = vsel %vm346_vm1, %v1836_v5, %v1849_v42 }
 0x552   :  { %1867 = vmatmul.f32.vlgmr.msra.gmra.mxu2 %v1850_v26 }
 0x5d5   :  { %v1868_v38 = vpop.f32.mrf.mxu2 }
 0x5d6   :  { %v1871_v7 = vmul.f32 0.001953125, %v1868_v38 }
 0x5d8   :  { %v1872_v17 = vmul.f32 %v1871_v7, %v1871_v7 }
 0x5da   :  { %v1874_v13 = vrot.slane %v1872_v17, 7 }
 0x5dc   :  { %v1876_v62 = vsub.f32 %v1871_v7, %v1874_v13 }
 0x5de   :  { %v1877_v55 = vadd.f32 1e-05, %v1876_v62 }
 0x5e0   :  { %2087 = vrsqrt.f32 %v1877_v55  ;;  %vm1884_vm14 = vweird.f32 %v1877_v55 }
 0x5e6   :  { %v2088_v34 = vpop.eup %2087 }
 0x5e7   :  { %v1879_v40 = vmul.f32 %v2088_v34, %v1877_v55  ;;  %vm1885_vm13 = vweird.f32 %v2088_v34 }
 0x5e8   :  { %vm1886_vm15 = vmor %vm1884_vm14, %vm1885_vm13 }
 0x5e9   :  { %v1880_v8 = vmul.f32 %v2088_v34, %v1879_v40 }
 0x5eb   :  { %v1881_v36 = vmul.f32 0.5, %v1880_v8 }
 0x5ed   :  { %v1882_v41 = vsub.f32 1.5, %v1881_v36 }
 0x5ef   :  { %v1883_v33 = vmul.f32 %v2088_v34, %v1882_v41 }
 0x5f1   :  { %v1887_v2 = vsel %vm1886_vm15, %v2088_v34, %v1883_v33 }
 0x5f2   :  { %v1891_v4 = vmul.f32 %v2082_v23, %v1887_v2 }
 0x5f4   :  { %v1893_v39 = vrot.slane %v1891_v4, 1 }
 0x5f6   :  { %v1895_v12 = vmul.f32 %v1893_v39, %v1871_v7 }
 0x5f8   :  { %v1896_v16 = vsub.f32 %v1827_v9, %v1895_v12 }
 0x5fa   :  { %v1898_v14 = vperm.slane %v1896_v16, 0 }
 0x5fc   :  { %v1900_v54 = vsel %vm346_vm1, %v1893_v39, %v1898_v14 }
 0x5fd   :  { %1993 = vmatmul.msk.f32.vlgmr.msrb.gmra.mxu2 %vm1901_vm0, %v1900_v54 }
 0x680   :  { %v1922_v20 = vpop.f32.mrf.mxu2 }
 0x681   :  { %v1925_v52 = vperm.slane %v1922_v20, 0  ;;  %v1930_v1 = vperm.slane %v1922_v20, 1 }
 0x683   :  { %v1926_v22 = vmul.f32 %v1925_v52, %v4011_v44  ;;  %v1927_v59 = vmul.f32 %v1925_v52, %v4006_v32  ;;  %v1928_v49 = vmul.f32 %v1925_v52, %v1804_v21  ;;  %v1929_v35 = vmul.f32 %v1925_v52, %v1807_v0 }
 0x685   :  { %v1931_v31 = vadd.f32 %v1930_v1, %v1926_v22  ;;  %v1932_v15 = vadd.f32 %v1930_v1, %v1927_v59  ;;  %v1933_v19 = vadd.f32 %v1930_v1, %v1928_v49  ;;  %v1934_v46 = vadd.f32 %v1930_v1, %v1929_v35 }
 0x687   :  { %1935 = vst [vmem:[#allocation10] sm:$0xff] %v1931_v31 }
 0x688   :  { %1936 = vst [vmem:[#allocation10 + $0x8] sm:$0xff] %v1932_v15 }
 0x689   :  { %1937 = vst [vmem:[#allocation10 + $0x10] sm:$0xff] %v1933_v19 }
 0x68a   :  { %1938 = vst [vmem:[#allocation10 + $0x18] sm:$0xff] %v1934_v46 }
 0x68b   :  { %1951 = dma.vmem_to_hbm [thread:$0]  %s1944_s13, 512, %s1946_s21, [#allocation6], %s2195_s25, %s2195_s25, %s2196_s26  }
 0x68c   :  { %2189 = dma.done.wait [#allocation6], 512  }
 0x68d   :  { %2190 = vsyncadd [#allocation6], 4294966784 }
 0x68e   :  { %1956 = vsyncpa [#allocation5], 1 }
 0x68f   :  { %1957 = vsyncpa [#allocation8], 1 }
 0x690   :  { %1958 = vsyncpa [#allocation6], 1 }

</bundles_post_ra>
